<compile_context>
chip_gen: v6e
topology: v6e:2x2x1
jax: 0.10.0
libtpu: 0.0.40
codegen_flags: <defaults>
</compile_context>

<pallas_src>
import numpy as np
import jax
import jax.numpy as jnp
from jax.experimental import pallas as pl
from jax.experimental.pallas import tpu as pltpu

LEAK = 0.2


def _lrelu(h):
    return jnp.where(h >= 0.0, h, LEAK * h)


def _round_up(n, m):
    return ((n + m - 1) // m) * m


# --------------------------------------------------------------------------
# Kernel: one batch tile (tb batch elements == tb*N atom rows) end to end.
# --------------------------------------------------------------------------
def fused_forward_kernel(x_ref, w1_ref, b1_ref, w2_ref, b2_ref, w3_ref, b3_ref,
                         p_ref, wf1_ref, bf1_ref, wf2_ref, bf2_ref,
                         wo_ref, bo_ref, feat_ref, out_ref):
    bf16 = jnp.bfloat16
    E = wf1_ref.shape[0]
    tbp = p_ref.shape[0] // E          # per-element row block (multiple of 8)
    tb = feat_ref.shape[0]             # real batch elements in this tile

    # Conv2d(1, 512, (1,3)) as one small MXU push (x pre-padded to K=8).
    h = jnp.dot(x_ref[...].astype(bf16), w1_ref[...],
                preferred_element_type=jnp.float32) + b1_ref[...]
    h = _lrelu(h)                                                 # (rows,512) f32

    # 1x1 convs == rowwise matmuls: bf16 operands, f32 accumulation.
    h = _lrelu(jnp.dot(h.astype(bf16), w2_ref[...],
                       preferred_element_type=jnp.float32) + b2_ref[...])
    h = _lrelu(jnp.dot(h.astype(bf16), w3_ref[...],
                       preferred_element_type=jnp.float32) + b3_ref[...])  # (rows,C)

    # Per-element average pool over atoms: ONE MXU push with the block-diagonal
    # averaging matrix.  Output row e*tbp + t = batch item t, element e.
    pooled = jnp.dot(p_ref[...], h.astype(bf16),
                     preferred_element_type=jnp.float32)          # (E*tbp, C) f32

    # feature_layer Linear #1 fused with the element concat: wf1 rows were
    # pre-permuted to element-major (e, c), so no transpose/reshape is needed.
    acc = None
    for e in range(E):                               # tiny static unrolled loop
        pe = pooled[e * tbp:(e + 1) * tbp, :].astype(bf16)        # 8-aligned slice
        term = jnp.dot(pe, wf1_ref[e],
                       preferred_element_type=jnp.float32)        # (tbp, F1P)
        acc = term if acc is None else acc + term
    f = _lrelu(acc + bf1_ref[...])                                # (tbp, F1P)

    # feature_layer Linear #2 and output Linear.
    f = _lrelu(jnp.dot(f.astype(bf16), wf2_ref[...],
                       preferred_element_type=jnp.float32) + bf2_ref[...])
    o = jnp.dot(f.astype(bf16), wo_ref[...],
                preferred_element_type=jnp.float32) + bo_ref[...]

    # Drop the (<=7) alignment-padding rows when storing.
    feat_ref[...] = f[:tb, :]
    out_ref[...] = o[:tb, :]


# --------------------------------------------------------------------------
# Tile selection / parameter prep (all hoisted out of the hot path).
# --------------------------------------------------------------------------
def _vmem_limit_bytes():
    """~3/4 of physical VMEM (=> ~96 MiB on v5e/v6e, ~48 MiB on v7x),
    capped at 100 MiB; conservative 48 MiB if the query fails."""
    try:
        cap = int(pltpu.get_tpu_info().vmem_capacity_bytes)
    except Exception:
        cap = 64 * 1024 * 1024
    return int(min(100 * 1024 * 1024, max(32 * 1024 * 1024, cap * 3 // 4)))


def _tile_vmem_bytes(tb, N, E, C, f1p):
    """Rough live-VMEM bytes for one batch tile (tile-shaped operands with
    double buffering + activation intermediates)."""
    rows = tb * N
    tbp = _round_up(tb, 8)
    b = 0
    b += 2 * rows * 8 * 4                       # x tile (f32, double-buffered)
    b += 2 * E * tbp * rows * 2                 # pooling matrix (bf16, 2 bufs)
    b += rows * (512 + 512 + C) * 4             # f32 activation stages
    b += rows * (8 + 512 + 512 + C) * 2         # bf16 casts of x / h
    b += E * tbp * C * (4 + 2)                  # pooled f32 + bf16 slices
    b += tbp * (2 * f1p + 2 * 256) * 4          # head intermediates (generous)
    return b


def _choose_tb(B, N, E, C, f1p, budget_bytes):
    """Batch elements per grid step.  tb must divide B; unless the tile covers
    the whole batch, tb and tb*N must be multiples of 8 (blocked dims rule).
    Target rows = tb*N in 1024..4096, stay under the VMEM budget, and prefer an
    even number of grid steps (>=2) so v7x can split batch tiles across its
    two TensorCores."""
    cands = [tb for tb in range(1, B + 1)
             if B % tb == 0 and (tb == B or (tb % 8 == 0 and (tb * N) % 8 == 0))]
    fitting = [tb for tb in cands
               if tb * N <= 4096 and _tile_vmem_bytes(tb, N, E, C, f1p) <= budget_bytes]
    if not fitting:
        # TODO(synk): also tile the atom dimension for very large N (even the
        # smallest legal batch tile overflows the budget); fall back gracefully.
        fitting = [min(cands)]
    even = [tb for tb in fitting
            if tb * N >= 1024 and B // tb >= 2 and (B // tb) % 2 == 0]
    if even:
        return max(even)
    big = [tb for tb in fitting if tb * N >= 1024]
    if big:
        return max(big)
    return max(fitting)


def _pool_matrix(n_atoms_elements, tb):
    """(E*TBP, tb*N) bf16 block-diagonal averaging matrix.  Row e*TBP + t
    averages the atoms of element e for batch item t of the tile; rows with
    t >= tb are zero padding so the per-element blocks stay 8-row aligned."""
    E = len(n_atoms_elements)
    N = int(sum(n_atoms_elements))
    tbp = _round_up(tb, 8)
    P = np.zeros((E * tbp, tb * N), np.float32)
    start = 0
    for e, n in enumerate(n_atoms_elements):
        for t in range(tb):
            P[e * tbp + t, t * N + start: t * N + start + n] = 1.0 / float(n)
        start += n
    return jnp.asarray(P, jnp.bfloat16)


def init_params(key, n_atoms_elements):
    """Deterministic synthetic parameters with the shapes implied by __init__."""
    E = len(n_atoms_elements)
    keys = jax.random.split(key, 12)
    s = 0.05
    return {
        # Conv2d(1, 512, (1,3)) -> weight stored as (3, 512)
        "w1": s * jax.random.normal(keys[0], (3, 512), jnp.float32),
        "b1": s * jax.random.normal(keys[1], (1, 512), jnp.float32),
        # Conv2d(512, 512, 1x1)
        "w2": s * jax.random.normal(keys[2], (512, 512), jnp.float32),
        "b2": s * jax.random.normal(keys[3], (1, 512), jnp.float32),
        # Conv2d(512, 256, 1x1)
        "w3": s * jax.random.normal(keys[4], (512, 256), jnp.float32),
        "b3": s * jax.random.normal(keys[5], (1, 256), jnp.float32),
        # Linear(256*E, 1000)
        "wf1": s * jax.random.normal(keys[6], (256 * E, 1000), jnp.float32),
        "bf1": s * jax.random.normal(keys[7], (1, 1000), jnp.float32),
        # Linear(1000, 200)
        "wf2": s * jax.random.normal(keys[8], (1000, 200), jnp.float32),
        "bf2": s * jax.random.normal(keys[9], (1, 200), jnp.float32),
        # Linear(200, 10)
        "wo": s * jax.random.normal(keys[10], (200, 10), jnp.float32),
        "bo": s * jax.random.normal(keys[11], (1, 10), jnp.float32),
    }


def make_forward(params, n_atoms_elements, B):
    """Prepares (permute/pad/cast) weights + pooling matrix once and returns a
    jitted forward: x (B,1,N,3) -> (feature (B,200), out (B,10))."""
    E = len(n_atoms_elements)
    N = int(sum(n_atoms_elements))
    C = params["w3"].shape[1]                   # 256
    F1 = params["wf1"].shape[1]                 # 1000
    F2 = params["wf2"].shape[1]                 # 200
    O = params["wo"].shape[1]                   # 10
    F1P, F2P, OP = _round_up(F1, 128), _round_up(F2, 128), _round_up(O, 128)
    bf16 = jnp.bfloat16

    # Weights: pad ragged widths to lane multiples, permute wf1 rows from
    # PyTorch's channel-major flatten order (c*E + e) to element-major (e, c),
    # cast MXU operands to bf16 (biases stay f32).  Zero padding is exact.
    w1 = jnp.pad(params["w1"], ((0, 5), (0, 0))).astype(bf16)            # (8,512)
    w2 = params["w2"].astype(bf16)
    w3 = params["w3"].astype(bf16)
    wf1 = jnp.transpose(params["wf1"].reshape(C, E, F1), (1, 0, 2))      # (E,C,F1)
    wf1 = jnp.pad(wf1, ((0, 0), (0, 0), (0, F1P - F1))).astype(bf16)     # (E,C,F1P)
    bf1 = jnp.pad(params["bf1"], ((0, 0), (0, F1P - F1)))
    wf2 = jnp.pad(params["wf2"], ((0, F1P - F1), (0, F2P - F2))).astype(bf16)
    bf2 = jnp.pad(params["bf2"], ((0, 0), (0, F2P - F2)))
    wo = jnp.pad(params["wo"], ((0, F2P - F2), (0, OP - O))).astype(bf16)
    bo = jnp.pad(params["bo"], ((0, 0), (0, OP - O)))
    b1, b2, b3 = params["b1"], params["b2"], params["b3"]

    consts = (w1, b1, w2, b2, w3, b3, wf1, bf1, wf2, bf2, wo, bo)
    weight_bytes = 2 * sum(int(a.size) * a.dtype.itemsize for a in consts)

    vmem_limit = _vmem_limit_bytes()
    budget = vmem_limit - weight_bytes - 8 * 1024 * 1024
    tb = _choose_tb(B, N, E, C, F1P, budget)
    tbp = _round_up(tb, 8)
    rows = tb * N
    grid = (B // tb,)
    P = _pool_matrix(n_atoms_elements, tb)                               # (E*tbp, rows)

    flops = (2 * B * N * (8 * 512 + 512 * 512 + 512 * C)
             + 2 * (B // tb) * (E * tbp * rows * C
                                + tbp * (E * C * F1P + F1P * F2P + F2P * OP)))
    bytes_accessed = (weight_bytes // 2 + int(P.size) * 2
                      + 4 * B * (N * 8 + F2P + OP))
    cost = pl.CostEstimate(flops=int(flops), transcendentals=0,
                           bytes_accessed=int(bytes_accessed))

    in_specs = [
        pl.BlockSpec((rows, 8), lambda b: (b, 0)),           # x, batch tile
        pl.BlockSpec((8, 512), lambda b: (0, 0)),            # w1 (pad, bf16)
        pl.BlockSpec((1, 512), lambda b: (0, 0)),            # b1
        pl.BlockSpec((512, 512), lambda b: (0, 0)),          # w2
        pl.BlockSpec((1, 512), lambda b: (0, 0)),            # b2
        pl.BlockSpec((512, C), lambda b: (0, 0)),            # w3
        pl.BlockSpec((1, C), lambda b: (0, 0)),              # b3
        pl.BlockSpec((E * tbp, rows), lambda b: (0, 0)),     # pooling matrix
        pl.BlockSpec((E, C, F1P), lambda b: (0, 0, 0)),      # wf1 (perm+pad)
        pl.BlockSpec((1, F1P), lambda b: (0, 0)),            # bf1
        pl.BlockSpec((F1P, F2P), lambda b: (0, 0)),          # wf2
        pl.BlockSpec((1, F2P), lambda b: (0, 0)),            # bf2
        pl.BlockSpec((F2P, OP), lambda b: (0, 0)),           # wo
        pl.BlockSpec((1, OP), lambda b: (0, 0)),             # bo
    ]
    out_specs = (pl.BlockSpec((tb, F2P), lambda b: (b, 0)),
                 pl.BlockSpec((tb, OP), lambda b: (b, 0)))

    call = pl.pallas_call(
        fused_forward_kernel,
        out_shape=(jax.ShapeDtypeStruct((B, F2P), jnp.float32),
                   jax.ShapeDtypeStruct((B, OP), jnp.float32)),
        grid=grid,
        in_specs=in_specs,
        out_specs=out_specs,
        compiler_params=pltpu.CompilerParams(
            dimension_semantics=("parallel",),
            vmem_limit_bytes=int(vmem_limit)),
        cost_estimate=cost,
    )

    @jax.jit
    def forward(x):
        x2 = x.reshape(B * N, 3).astype(jnp.float32)
        x2 = jnp.pad(x2, ((0, 0), (0, 5)))                  # K=3 -> K=8 (exact)
        feat_pad, out_pad = call(x2, w1, b1, w2, b2, w3, b3, P,
                                 wf1, bf1, wf2, bf2, wo, bo)
        return feat_pad[:, :F2], out_pad[:, :O]             # strip lane padding

    return forward


# --------------------------------------------------------------------------
# References.
# --------------------------------------------------------------------------
def reference_forward_f32(x, params, n_atoms_elements):
    """Pure-f32 JAX reference mirroring the PyTorch forward exactly."""
    B = x.shape[0]
    N = int(sum(n_atoms_elements))
    x3 = x.reshape(B, N, 3).astype(jnp.float32)
    w1 = params["w1"]
    h = _lrelu(x3[..., 0:1] * w1[0] + x3[..., 1:2] * w1[1]
               + x3[..., 2:3] * w1[2] + params["b1"])
    h = _lrelu(h @ params["w2"] + params["b2"])
    h = _lrelu(h @ params["w3"] + params["b3"])              # (B, N, 256)
    pooled, start = [], 0
    for n in n_atoms_elements:
        pooled.append(jnp.mean(h[:, start:start + n, :], axis=1))
        start += n
    pooled = jnp.stack(pooled, axis=1)                       # (B, E, 256)
    flat = jnp.transpose(pooled, (0, 2, 1)).reshape(B, -1)   # torch flatten order
    f = _lrelu(flat @ params["wf1"] + params["bf1"])
    f = _lrelu(f @ params["wf2"] + params["bf2"])
    return f, f @ params["wo"] + params["bo"]


def reference_forward_bf16(x, params, n_atoms_elements):
    """Same math as the kernel: bf16 MXU operands, f32 accumulation & activations."""
    B = x.shape[0]
    N = int(sum(n_atoms_elements))
    bf16 = jnp.bfloat16
    mm = lambda a, w: jnp.dot(a.astype(bf16), w.astype(bf16),
                              preferred_element_type=jnp.float32)
    x2 = jnp.pad(x.reshape(B * N, 3).astype(jnp.float32), ((0, 0), (0, 5)))
    w1 = jnp.pad(params["w1"], ((0, 5), (0, 0)))
    h = _lrelu(mm(x2, w1) + params["b1"])
    h = _lrelu(mm(h, params["w2"]) + params["b2"])
    h = _lrelu(mm(h, params["w3"]) + params["b3"])           # (B*N, 256)
    h = h.astype(bf16).astype(jnp.float32).reshape(B, N, -1)
    pooled, start = [], 0
    for n in n_atoms_elements:
        inv = jnp.asarray(1.0 / n, bf16).astype(jnp.float32)
        pooled.append(jnp.sum(h[:, start:start + n, :], axis=1) * inv)
        start += n
    pooled = jnp.stack(pooled, axis=1)                       # (B, E, 256)
    flat = jnp.transpose(pooled, (0, 2, 1)).reshape(B, -1)
    f = _lrelu(mm(flat, params["wf1"]) + params["bf1"])
    f = _lrelu(mm(f, params["wf2"]) + params["bf2"])
    return f, mm(f, params["wo"]) + params["bo"]


# --------------------------------------------------------------------------
if __name__ == "__main__":
    n_atoms_elements = [4, 4]          # 2 element types, 4 atoms each
    B = 2
    N = int(sum(n_atoms_elements))

    key = jax.random.PRNGKey(0)
    kx, kp = jax.random.split(key)
    x = jax.random.normal(kx, (B, 1, N, 3), jnp.float32)     # NCHW like PyTorch
    params = init_params(kp, n_atoms_elements)

    fwd = make_forward(params, n_atoms_elements, B)
    feature, out = fwd(x)
    feature = jax.block_until_ready(feature)
    out = jax.block_until_ready(out)
    assert feature.shape == (B, 200) and out.shape == (B, 10)

    # Tight check against a reference that uses the same bf16-on-MXU math.
    ref_feat_bf, ref_out_bf = reference_forward_bf16(x, params, n_atoms_elements)
    assert jnp.allclose(feature, ref_feat_bf, atol=2e-3, rtol=2e-3), \
        float(jnp.max(jnp.abs(feature - ref_feat_bf)))
    assert jnp.allclose(out, ref_out_bf, atol=2e-3, rtol=2e-3), \
        float(jnp.max(jnp.abs(out - ref_out_bf)))

    # Loose check against the exact-f32 PyTorch-equivalent reference
    # (difference is only the bf16 quantization of the MXU operands).
    ref_feat, ref_out = reference_forward_f32(x, params, n_atoms_elements)
    assert jnp.allclose(feature, ref_feat, atol=5e-2, rtol=5e-2), \
        float(jnp.max(jnp.abs(feature - ref_feat)))
    assert jnp.allclose(out, ref_out, atol=5e-2, rtol=5e-2), \
        float(jnp.max(jnp.abs(out - ref_out)))

    print("KERNEL_OK")
</pallas_src>

<mosaic_0001>
module attributes {stable_mosaic.version = 11 : i64} {
  func.func @fused_forward_kernel(%arg0: i32, %arg1: memref<16x8xf32, #tpu.memory_space<vmem>>, %arg2: memref<8x512xbf16, #tpu.memory_space<vmem>>, %arg3: memref<1x512xf32, #tpu.memory_space<vmem>>, %arg4: memref<512x512xbf16, #tpu.memory_space<vmem>>, %arg5: memref<1x512xf32, #tpu.memory_space<vmem>>, %arg6: memref<512x256xbf16, #tpu.memory_space<vmem>>, %arg7: memref<1x256xf32, #tpu.memory_space<vmem>>, %arg8: memref<16x16xbf16, #tpu.memory_space<vmem>>, %arg9: memref<2x256x1024xbf16, #tpu.memory_space<vmem>>, %arg10: memref<1x1024xf32, #tpu.memory_space<vmem>>, %arg11: memref<1024x256xbf16, #tpu.memory_space<vmem>>, %arg12: memref<1x256xf32, #tpu.memory_space<vmem>>, %arg13: memref<256x128xbf16, #tpu.memory_space<vmem>>, %arg14: memref<1x128xf32, #tpu.memory_space<vmem>>, %arg15: memref<2x256xf32, #tpu.memory_space<vmem>>, %arg16: memref<2x128xf32, #tpu.memory_space<vmem>>) attributes {dimension_semantics = [#tpu.dimension_semantics<parallel>], iteration_bounds = array<i64: 1>, scalar_prefetch = 0 : i64, scratch_operands = 0 : i64, tpu.core_type = #tpu.core_type<tc>, window_params = [{transform_indices = @transform_0, window_bounds = array<i64: 16, 8>}, {pipeline_mode = #tpu.pipeline_mode<synchronous>, transform_indices = @transform_1, window_bounds = array<i64: 8, 512>}, {pipeline_mode = #tpu.pipeline_mode<synchronous>, transform_indices = @transform_2, window_bounds = array<i64: 1, 512>}, {pipeline_mode = #tpu.pipeline_mode<synchronous>, transform_indices = @transform_3, window_bounds = array<i64: 512, 512>}, {pipeline_mode = #tpu.pipeline_mode<synchronous>, transform_indices = @transform_4, window_bounds = array<i64: 1, 512>}, {pipeline_mode = #tpu.pipeline_mode<synchronous>, transform_indices = @transform_5, window_bounds = array<i64: 512, 256>}, {pipeline_mode = #tpu.pipeline_mode<synchronous>, transform_indices = @transform_6, window_bounds = array<i64: 1, 256>}, {pipeline_mode = #tpu.pipeline_mode<synchronous>, transform_indices = @transform_7, window_bounds = array<i64: 16, 16>}, {pipeline_mode = #tpu.pipeline_mode<synchronous>, transform_indices = @transform_8, window_bounds = array<i64: 2, 256, 1024>}, {pipeline_mode = #tpu.pipeline_mode<synchronous>, transform_indices = @transform_9, window_bounds = array<i64: 1, 1024>}, {pipeline_mode = #tpu.pipeline_mode<synchronous>, transform_indices = @transform_10, window_bounds = array<i64: 1024, 256>}, {pipeline_mode = #tpu.pipeline_mode<synchronous>, transform_indices = @transform_11, window_bounds = array<i64: 1, 256>}, {pipeline_mode = #tpu.pipeline_mode<synchronous>, transform_indices = @transform_12, window_bounds = array<i64: 256, 128>}, {pipeline_mode = #tpu.pipeline_mode<synchronous>, transform_indices = @transform_13, window_bounds = array<i64: 1, 128>}, {transform_indices = @transform_14, window_bounds = array<i64: 2, 256>}, {transform_indices = @transform_15, window_bounds = array<i64: 2, 128>}]} {
    %c0 = arith.constant 0 : index
    %c0_0 = arith.constant 0 : index
    %0 = vector.load %arg1[%c0, %c0_0] : memref<16x8xf32, #tpu.memory_space<vmem>>, vector<16x8xf32>
    %1 = arith.truncf %0 : vector<16x8xf32> to vector<16x8xbf16>
    %c0_1 = arith.constant 0 : index
    %c0_2 = arith.constant 0 : index
    %2 = vector.load %arg2[%c0_1, %c0_2] : memref<8x512xbf16, #tpu.memory_space<vmem>>, vector<8x512xbf16>
    %cst = arith.constant dense<0.000000e+00> : vector<16x512xf32>
    %3 = tpu.matmul %1, %2, %cst {dimension_numbers = #tpu.dot_dimension_numbers<[1], [0], [0], [1], [0, 0, 1, 1], [], []>} : vector<16x8xbf16>, vector<8x512xbf16>, vector<16x512xf32> -> vector<16x512xf32>
    %c0_3 = arith.constant 0 : index
    %c0_4 = arith.constant 0 : index
    %4 = vector.load %arg3[%c0_3, %c0_4] : memref<1x512xf32, #tpu.memory_space<vmem>>, vector<1x512xf32>
    %5 = vector.broadcast %4 : vector<1x512xf32> to vector<16x512xf32>
    %6 = arith.addf %3, %5 : vector<16x512xf32>
    %cst_5 = arith.constant 0.000000e+00 : f32
    %7 = vector.broadcast %cst_5 : f32 to vector<16x512xf32>
    %8 = arith.cmpf oge, %6, %7 : vector<16x512xf32>
    %cst_6 = arith.constant 2.000000e-01 : f32
    %9 = vector.broadcast %cst_6 : f32 to vector<16x512xf32>
    %10 = arith.mulf %9, %6 : vector<16x512xf32>
    %11 = arith.select %8, %6, %10 : vector<16x512xi1>, vector<16x512xf32>
    %12 = arith.truncf %11 : vector<16x512xf32> to vector<16x512xbf16>
    %c0_7 = arith.constant 0 : index
    %c0_8 = arith.constant 0 : index
    %13 = vector.load %arg4[%c0_7, %c0_8] : memref<512x512xbf16, #tpu.memory_space<vmem>>, vector<512x512xbf16>
    %cst_9 = arith.constant dense<0.000000e+00> : vector<16x512xf32>
    %14 = tpu.matmul %12, %13, %cst_9 {dimension_numbers = #tpu.dot_dimension_numbers<[1], [0], [0], [1], [0, 0, 1, 1], [], []>} : vector<16x512xbf16>, vector<512x512xbf16>, vector<16x512xf32> -> vector<16x512xf32>
    %c0_10 = arith.constant 0 : index
    %c0_11 = arith.constant 0 : index
    %15 = vector.load %arg5[%c0_10, %c0_11] : memref<1x512xf32, #tpu.memory_space<vmem>>, vector<1x512xf32>
    %16 = vector.broadcast %15 : vector<1x512xf32> to vector<16x512xf32>
    %17 = arith.addf %14, %16 : vector<16x512xf32>
    %cst_12 = arith.constant 0.000000e+00 : f32
    %18 = vector.broadcast %cst_12 : f32 to vector<16x512xf32>
    %19 = arith.cmpf oge, %17, %18 : vector<16x512xf32>
    %cst_13 = arith.constant 2.000000e-01 : f32
    %20 = vector.broadcast %cst_13 : f32 to vector<16x512xf32>
    %21 = arith.mulf %20, %17 : vector<16x512xf32>
    %22 = arith.select %19, %17, %21 : vector<16x512xi1>, vector<16x512xf32>
    %23 = arith.truncf %22 : vector<16x512xf32> to vector<16x512xbf16>
    %c0_14 = arith.constant 0 : index
    %c0_15 = arith.constant 0 : index
    %24 = vector.load %arg6[%c0_14, %c0_15] : memref<512x256xbf16, #tpu.memory_space<vmem>>, vector<512x256xbf16>
    %cst_16 = arith.constant dense<0.000000e+00> : vector<16x256xf32>
    %25 = tpu.matmul %23, %24, %cst_16 {dimension_numbers = #tpu.dot_dimension_numbers<[1], [0], [0], [1], [0, 0, 1, 1], [], []>} : vector<16x512xbf16>, vector<512x256xbf16>, vector<16x256xf32> -> vector<16x256xf32>
    %c0_17 = arith.constant 0 : index
    %c0_18 = arith.constant 0 : index
    %26 = vector.load %arg7[%c0_17, %c0_18] : memref<1x256xf32, #tpu.memory_space<vmem>>, vector<1x256xf32>
    %27 = vector.broadcast %26 : vector<1x256xf32> to vector<16x256xf32>
    %28 = arith.addf %25, %27 : vector<16x256xf32>
    %cst_19 = arith.constant 0.000000e+00 : f32
    %29 = vector.broadcast %cst_19 : f32 to vector<16x256xf32>
    %30 = arith.cmpf oge, %28, %29 : vector<16x256xf32>
    %cst_20 = arith.constant 2.000000e-01 : f32
    %31 = vector.broadcast %cst_20 : f32 to vector<16x256xf32>
    %32 = arith.mulf %31, %28 : vector<16x256xf32>
    %33 = arith.select %30, %28, %32 : vector<16x256xi1>, vector<16x256xf32>
    %c0_21 = arith.constant 0 : index
    %c0_22 = arith.constant 0 : index
    %34 = vector.load %arg8[%c0_21, %c0_22] : memref<16x16xbf16, #tpu.memory_space<vmem>>, vector<16x16xbf16>
    %35 = arith.truncf %33 : vector<16x256xf32> to vector<16x256xbf16>
    %cst_23 = arith.constant dense<0.000000e+00> : vector<16x256xf32>
    %36 = tpu.matmul %34, %35, %cst_23 {dimension_numbers = #tpu.dot_dimension_numbers<[1], [0], [0], [1], [0, 0, 1, 1], [], []>} : vector<16x16xbf16>, vector<16x256xbf16>, vector<16x256xf32> -> vector<16x256xf32>
    %37 = vector.extract_strided_slice %36 {offsets = [0, 0], sizes = [8, 256], strides = [1, 1]} : vector<16x256xf32> to vector<8x256xf32>
    %38 = arith.truncf %37 : vector<8x256xf32> to vector<8x256xbf16>
    %c0_24 = arith.constant 0 : index
    %c0_25 = arith.constant 0 : index
    %c0_26 = arith.constant 0 : index
    %39 = vector.load %arg9[%c0_24, %c0_25, %c0_26] : memref<2x256x1024xbf16, #tpu.memory_space<vmem>>, vector<1x256x1024xbf16>
    %40 = vector.shape_cast %39 : vector<1x256x1024xbf16> to vector<256x1024xbf16>
    %cst_27 = arith.constant dense<0.000000e+00> : vector<8x1024xf32>
    %41 = tpu.matmul %38, %40, %cst_27 {dimension_numbers = #tpu.dot_dimension_numbers<[1], [0], [0], [1], [0, 0, 1, 1], [], []>} : vector<8x256xbf16>, vector<256x1024xbf16>, vector<8x1024xf32> -> vector<8x1024xf32>
    %42 = vector.extract_strided_slice %36 {offsets = [8, 0], sizes = [8, 256], strides = [1, 1]} : vector<16x256xf32> to vector<8x256xf32>
    %43 = arith.truncf %42 : vector<8x256xf32> to vector<8x256xbf16>
    %c1 = arith.constant 1 : index
    %c0_28 = arith.constant 0 : index
    %c0_29 = arith.constant 0 : index
    %44 = vector.load %arg9[%c1, %c0_28, %c0_29] : memref<2x256x1024xbf16, #tpu.memory_space<vmem>>, vector<1x256x1024xbf16>
    %45 = vector.shape_cast %44 : vector<1x256x1024xbf16> to vector<256x1024xbf16>
    %cst_30 = arith.constant dense<0.000000e+00> : vector<8x1024xf32>
    %46 = tpu.matmul %43, %45, %cst_30 {dimension_numbers = #tpu.dot_dimension_numbers<[1], [0], [0], [1], [0, 0, 1, 1], [], []>} : vector<8x256xbf16>, vector<256x1024xbf16>, vector<8x1024xf32> -> vector<8x1024xf32>
    %47 = arith.addf %41, %46 : vector<8x1024xf32>
    %c0_31 = arith.constant 0 : index
    %c0_32 = arith.constant 0 : index
    %48 = vector.load %arg10[%c0_31, %c0_32] : memref<1x1024xf32, #tpu.memory_space<vmem>>, vector<1x1024xf32>
    %49 = vector.broadcast %48 : vector<1x1024xf32> to vector<8x1024xf32>
    %50 = arith.addf %47, %49 : vector<8x1024xf32>
    %cst_33 = arith.constant 0.000000e+00 : f32
    %51 = vector.broadcast %cst_33 : f32 to vector<8x1024xf32>
    %52 = arith.cmpf oge, %50, %51 : vector<8x1024xf32>
    %cst_34 = arith.constant 2.000000e-01 : f32
    %53 = vector.broadcast %cst_34 : f32 to vector<8x1024xf32>
    %54 = arith.mulf %53, %50 : vector<8x1024xf32>
    %55 = arith.select %52, %50, %54 : vector<8x1024xi1>, vector<8x1024xf32>
    %56 = arith.truncf %55 : vector<8x1024xf32> to vector<8x1024xbf16>
    %c0_35 = arith.constant 0 : index
    %c0_36 = arith.constant 0 : index
    %57 = vector.load %arg11[%c0_35, %c0_36] : memref<1024x256xbf16, #tpu.memory_space<vmem>>, vector<1024x256xbf16>
    %cst_37 = arith.constant dense<0.000000e+00> : vector<8x256xf32>
    %58 = tpu.matmul %56, %57, %cst_37 {dimension_numbers = #tpu.dot_dimension_numbers<[1], [0], [0], [1], [0, 0, 1, 1], [], []>} : vector<8x1024xbf16>, vector<1024x256xbf16>, vector<8x256xf32> -> vector<8x256xf32>
    %c0_38 = arith.constant 0 : index
    %c0_39 = arith.constant 0 : index
    %59 = vector.load %arg12[%c0_38, %c0_39] : memref<1x256xf32, #tpu.memory_space<vmem>>, vector<1x256xf32>
    %60 = vector.broadcast %59 : vector<1x256xf32> to vector<8x256xf32>
    %61 = arith.addf %58, %60 : vector<8x256xf32>
    %cst_40 = arith.constant 0.000000e+00 : f32
    %62 = vector.broadcast %cst_40 : f32 to vector<8x256xf32>
    %63 = arith.cmpf oge, %61, %62 : vector<8x256xf32>
    %cst_41 = arith.constant 2.000000e-01 : f32
    %64 = vector.broadcast %cst_41 : f32 to vector<8x256xf32>
    %65 = arith.mulf %64, %61 : vector<8x256xf32>
    %66 = arith.select %63, %61, %65 : vector<8x256xi1>, vector<8x256xf32>
    %67 = arith.truncf %66 : vector<8x256xf32> to vector<8x256xbf16>
    %c0_42 = arith.constant 0 : index
    %c0_43 = arith.constant 0 : index
    %68 = vector.load %arg13[%c0_42, %c0_43] : memref<256x128xbf16, #tpu.memory_space<vmem>>, vector<256x128xbf16>
    %cst_44 = arith.constant dense<0.000000e+00> : vector<8x128xf32>
    %69 = tpu.matmul %67, %68, %cst_44 {dimension_numbers = #tpu.dot_dimension_numbers<[1], [0], [0], [1], [0, 0, 1, 1], [], []>} : vector<8x256xbf16>, vector<256x128xbf16>, vector<8x128xf32> -> vector<8x128xf32>
    %c0_45 = arith.constant 0 : index
    %c0_46 = arith.constant 0 : index
    %70 = vector.load %arg14[%c0_45, %c0_46] : memref<1x128xf32, #tpu.memory_space<vmem>>, vector<1x128xf32>
    %71 = vector.broadcast %70 : vector<1x128xf32> to vector<8x128xf32>
    %72 = arith.addf %69, %71 : vector<8x128xf32>
    %73 = vector.extract_strided_slice %66 {offsets = [0, 0], sizes = [2, 256], strides = [1, 1]} : vector<8x256xf32> to vector<2x256xf32>
    %c0_47 = arith.constant 0 : index
    %c0_48 = arith.constant 0 : index
    %74 = vector.load %arg15[%c0_47, %c0_48] : memref<2x256xf32, #tpu.memory_space<vmem>>, vector<2x256xf32>
    tpu.vector_store %arg15[%c0_47, %c0_48], %73 {strides = array<i32>} : memref<2x256xf32, #tpu.memory_space<vmem>>, vector<2x256xf32>,
    %75 = vector.extract_strided_slice %72 {offsets = [0, 0], sizes = [2, 128], strides = [1, 1]} : vector<8x128xf32> to vector<2x128xf32>
    %c0_49 = arith.constant 0 : index
    %c0_50 = arith.constant 0 : index
    %76 = vector.load %arg16[%c0_49, %c0_50] : memref<2x128xf32, #tpu.memory_space<vmem>>, vector<2x128xf32>
    tpu.vector_store %arg16[%c0_49, %c0_50], %75 {strides = array<i32>} : memref<2x128xf32, #tpu.memory_space<vmem>>, vector<2x128xf32>,
    return
  }
  func.func @transform_0(%arg0: i32) -> (i32, i32) {
    %c0_i32 = arith.constant 0 : i32
    %c0_i32_0 = arith.constant 0 : i32
    return %arg0, %c0_i32 : i32, i32
  }
  func.func @transform_1(%arg0: i32) -> (i32, i32) {
    %c0_i32 = arith.constant 0 : i32
    %c0_i32_0 = arith.constant 0 : i32
    %c0_i32_1 = arith.constant 0 : i32
    return %c0_i32, %c0_i32_0 : i32, i32
  }
  func.func @transform_2(%arg0: i32) -> (i32, i32) {
    %c0_i32 = arith.constant 0 : i32
    %c0_i32_0 = arith.constant 0 : i32
    %c0_i32_1 = arith.constant 0 : i32
    return %c0_i32, %c0_i32_0 : i32, i32
  }
  func.func @transform_3(%arg0: i32) -> (i32, i32) {
    %c0_i32 = arith.constant 0 : i32
    %c0_i32_0 = arith.constant 0 : i32
    %c0_i32_1 = arith.constant 0 : i32
    return %c0_i32, %c0_i32_0 : i32, i32
  }
  func.func @transform_4(%arg0: i32) -> (i32, i32) {
    %c0_i32 = arith.constant 0 : i32
    %c0_i32_0 = arith.constant 0 : i32
    %c0_i32_1 = arith.constant 0 : i32
    return %c0_i32, %c0_i32_0 : i32, i32
  }
  func.func @transform_5(%arg0: i32) -> (i32, i32) {
    %c0_i32 = arith.constant 0 : i32
    %c0_i32_0 = arith.constant 0 : i32
    %c0_i32_1 = arith.constant 0 : i32
    return %c0_i32, %c0_i32_0 : i32, i32
  }
  func.func @transform_6(%arg0: i32) -> (i32, i32) {
    %c0_i32 = arith.constant 0 : i32
    %c0_i32_0 = arith.constant 0 : i32
    %c0_i32_1 = arith.constant 0 : i32
    return %c0_i32, %c0_i32_0 : i32, i32
  }
  func.func @transform_7(%arg0: i32) -> (i32, i32) {
    %c0_i32 = arith.constant 0 : i32
    %c0_i32_0 = arith.constant 0 : i32
    %c0_i32_1 = arith.constant 0 : i32
    return %c0_i32, %c0_i32_0 : i32, i32
  }
  func.func @transform_8(%arg0: i32) -> (i32, i32, i32) {
    %c0_i32 = arith.constant 0 : i32
    %c0_i32_0 = arith.constant 0 : i32
    %c0_i32_1 = arith.constant 0 : i32
    %c0_i32_2 = arith.constant 0 : i32
    return %c0_i32, %c0_i32_0, %c0_i32_1 : i32, i32, i32
  }
  func.func @transform_9(%arg0: i32) -> (i32, i32) {
    %c0_i32 = arith.constant 0 : i32
    %c0_i32_0 = arith.constant 0 : i32
    %c0_i32_1 = arith.constant 0 : i32
    return %c0_i32, %c0_i32_0 : i32, i32
  }
  func.func @transform_10(%arg0: i32) -> (i32, i32) {
    %c0_i32 = arith.constant 0 : i32
    %c0_i32_0 = arith.constant 0 : i32
    %c0_i32_1 = arith.constant 0 : i32
    return %c0_i32, %c0_i32_0 : i32, i32
  }
  func.func @transform_11(%arg0: i32) -> (i32, i32) {
    %c0_i32 = arith.constant 0 : i32
    %c0_i32_0 = arith.constant 0 : i32
    %c0_i32_1 = arith.constant 0 : i32
    return %c0_i32, %c0_i32_0 : i32, i32
  }
  func.func @transform_12(%arg0: i32) -> (i32, i32) {
    %c0_i32 = arith.constant 0 : i32
    %c0_i32_0 = arith.constant 0 : i32
    %c0_i32_1 = arith.constant 0 : i32
    return %c0_i32, %c0_i32_0 : i32, i32
  }
  func.func @transform_13(%arg0: i32) -> (i32, i32) {
    %c0_i32 = arith.constant 0 : i32
    %c0_i32_0 = arith.constant 0 : i32
    %c0_i32_1 = arith.constant 0 : i32
    return %c0_i32, %c0_i32_0 : i32, i32
  }
  func.func @transform_14(%arg0: i32) -> (i32, i32) {
    %c0_i32 = arith.constant 0 : i32
    %c0_i32_0 = arith.constant 0 : i32
    return %arg0, %c0_i32 : i32, i32
  }
  func.func @transform_15(%arg0: i32) -> (i32, i32) {
    %c0_i32 = arith.constant 0 : i32
    %c0_i32_0 = arith.constant 0 : i32
    return %arg0, %c0_i32 : i32, i32
  }
}

</mosaic_0001>

<bundles_post_ra>
// kernel: forward.1
= control target key start
LH: loop header
LB: loop body
LE: loop exit
PB: predicated region body
PF: predicated region fallthrough
CT: control target
= control target key end

     0   :  { %21 = vsyncpa [#allocation3], 0  ;;  %s6502_s0 = inlined_call_operand.vmem [shape: f32[16,8], index: 0, kind: input, shape index: {}]   ;;  %s6503_s1 = inlined_call_operand.vmem [shape: bf16[8,512], index: 1, kind: input, shape index: {}]   ;;  %s6504_s2 = inlined_call_operand.vmem [shape: f32[1,512], index: 2, kind: input, shape index: {}]   ;;  %s6505_s3 = inlined_call_operand.hbm [shape: bf16[512,512], index: 3, kind: input, shape index: {}]   ;;  %s6506_s4 = inlined_call_operand.vmem [shape: f32[1,512], index: 4, kind: input, shape index: {}]   ;;  %s6507_s5 = inlined_call_operand.hbm [shape: bf16[512,256], index: 5, kind: input, shape index: {}]   ;;  %s6508_s6 = inlined_call_operand.vmem [shape: f32[1,256], index: 6, kind: input, shape index: {}]   ;;  %s6509_s7 = inlined_call_operand.vmem [shape: bf16[16,16], index: 7, kind: input, shape index: {}]   ;;  %s6510_s8 = inlined_call_operand.hbm [shape: bf16[2,256,1024], index: 8, kind: input, shape index: {}]   ;;  %s6511_s9 = inlined_call_operand.vmem [shape: f32[1,1024], index: 9, kind: input, shape index: {}]   ;;  %s6512_s10 = inlined_call_operand.hbm [shape: bf16[1024,256], index: 10, kind: input, shape index: {}]   ;;  %s6513_s11 = inlined_call_operand.vmem [shape: f32[1,256], index: 11, kind: input, shape index: {}]   ;;  %s6514_s12 = inlined_call_operand.hbm [shape: bf16[256,128], index: 12, kind: input, shape index: {}]   ;;  %s6515_s13 = inlined_call_operand.vmem [shape: f32[1,128], index: 13, kind: input, shape index: {}]   ;;  %s6516_s14 = inlined_call_operand.hbm [shape: f32[2,256], index: 14, kind: output, shape index: {0}]   ;;  %s6517_s15 = inlined_call_operand.hbm [shape: f32[2,128], index: 15, kind: output, shape index: {1}]  }
   0x1   :  { %22 = vsyncpa [#allocation6], 0 }
   0x2   :  { %23 = vsyncpa [#allocation9], 0 }
   0x3   :  { %24 = vsyncpa [#allocation4], 0 }
   0x4   :  { %25 = vsyncpa [#allocation13], 0  ;;  %s6243_s18 = smov [#allocation5]  }
   0x5   :  { %s51_s19 = sshll.u32 %s6243_s18, 4  ;;  %s52_s19 = int_to_ptr.vmem [resolvable:$true] %s51_s19 }
   0x6   :  { %s6101_s20 = scalar_lea.vmem %s52_s19, 8192  ;;  %p6106_p1 = scmp.lt.s32.totalorder %s52_s19, %s52_s19 }
   0x7   :  { %p6102_p0 = scmp.ne.s32.totalorder %s52_s19, %s6101_s20  ;;  %p6107_p2 = scmp.lt.s32.totalorder %s6101_s20, %s6101_s20 }
   0x9   :  { %p6108_p3 = por %p6107_p2, %p6106_p1 }
   0xb   :  { %p6109_p4 = pnand %p6108_p3, %p6102_p0 }
   0xd   :  { %6112 = shalt.err (!%p6109_p4)
}
   0xe   :  { %s6244_s21 = smov 128   ;;  %s6245_s22 = smov 8  }
   0xf   :  { %57 = dma.hbm_to_vmem [thread:$0]  %s6507_s5, 8192, %s52_s19, [#allocation6], %s6244_s21, %s6244_s21, %s6245_s22  }
  0x10   :  { %s6246_s25 = smov [#allocation8]   ;;  %s6247_s27 = smov [#allocation2]  }
  0x11   :  { %s81_s26 = sshll.u32 %s6246_s25, 4  ;;  %s37_s28 = sshll.u32 %s6247_s27, 4  ;;  %s82_s26 = int_to_ptr.vmem [resolvable:$true] %s81_s26  ;;  %s38_s28 = int_to_ptr.vmem [resolvable:$true] %s37_s28 }
  0x12   :  { %s6121_s29 = scalar_lea.vmem %s82_s26, 16384  ;;  %p6126_p6 = scmp.lt.s32.totalorder %s82_s26, %s82_s26 }
  0x13   :  { %p6122_p5 = scmp.ne.s32.totalorder %s82_s26, %s6121_s29  ;;  %p6127_p7 = scmp.lt.s32.totalorder %s6121_s29, %s6121_s29 }
  0x15   :  { %p6128_p8 = por %p6127_p7, %p6126_p6 }
  0x17   :  { %p6129_p9 = pnand %p6128_p8, %p6122_p5 }
  0x19   :  { %6132 = shalt.err (!%p6129_p9)
}
  0x1a   :  { %87 = dma.hbm_to_vmem [thread:$0]  %s6512_s10, 16384, %s82_s26, [#allocation9], %s6244_s21, %s6244_s21, %s6245_s22  }
  0x1b   :  { %s6141_s17 = scalar_lea.vmem %s38_s28, 16384  ;;  %p6146_p11 = scmp.lt.s32.totalorder %s38_s28, %s38_s28 }
  0x1c   :  { %p6142_p10 = scmp.ne.s32.totalorder %s38_s28, %s6141_s17  ;;  %p6147_p12 = scmp.lt.s32.totalorder %s6141_s17, %s6141_s17 }
  0x1e   :  { %p6148_p13 = por %p6147_p12, %p6146_p11 }
  0x20   :  { %p6149_p0 = pnand %p6148_p13, %p6142_p10 }
  0x22   :  { %6152 = shalt.err (!%p6149_p0)
}
  0x23   :  { %s6248_s5 = smov 256   ;;  %s6249_s18 = smov 16  }
  0x24   :  { %43 = dma.hbm_to_vmem [thread:$0]  %s6505_s3, 16384, %s38_s28, [#allocation3], %s6248_s5, %s6248_s5, %s6249_s18  }
  0x25   :  { %s6250_s23 = smov [#allocation7]  }
  0x26   :  { %s67_s24 = sshll.u32 %s6250_s23, 4  ;;  %s68_s24 = int_to_ptr.vmem [resolvable:$true] %s67_s24 }
  0x27   :  { %s6161_s25 = scalar_lea.vmem %s68_s24, 32768  ;;  %p6166_p2 = scmp.lt.s32.totalorder %s68_s24, %s68_s24 }
  0x28   :  { %p6162_p1 = scmp.ne.s32.totalorder %s68_s24, %s6161_s25  ;;  %p6167_p3 = scmp.lt.s32.totalorder %s6161_s25, %s6161_s25 }
  0x2a   :  { %p6168_p4 = por %p6167_p3, %p6166_p2 }
  0x2c   :  { %p6169_p5 = pnand %p6168_p4, %p6162_p1 }
  0x2e   :  { %6172 = shalt.err (!%p6169_p5)
}
  0x2f   :  { %s6251_s10 = smov 512   ;;  %s6252_s21 = smov 32  }
  0x30   :  { %73 = dma.hbm_to_vmem [thread:$0]  %s6510_s8, 32768, %s68_s24, [#allocation6], %s6251_s10, %s6251_s10, %s6252_s21  }
  0x31   :  { %s6253_s27 = smov [#allocation10]  }
  0x32   :  { %s95_s29 = sshll.u32 %s6253_s27, 4  ;;  %s96_s29 = int_to_ptr.vmem [resolvable:$true] %s95_s29 }
  0x33   :  { %s6181_s3 = scalar_lea.vmem %s96_s29, 2048  ;;  %p6186_p7 = scmp.lt.s32.totalorder %s96_s29, %s96_s29 }
  0x34   :  { %p6182_p6 = scmp.ne.s32.totalorder %s96_s29, %s6181_s3  ;;  %p6187_p8 = scmp.lt.s32.totalorder %s6181_s3, %s6181_s3 }
  0x36   :  { %p6188_p9 = por %p6187_p8, %p6186_p7 }
  0x38   :  { %p6189_p10 = pnand %p6188_p9, %p6182_p6 }
  0x3a   :  { %6192 = shalt.err (!%p6189_p10)
}
  0x3b   :  { %s6254_s28 = smov 64   ;;  %s6255_s30 = smov 4  }
  0x3c   :  { %101 = dma.hbm_to_vmem [thread:$0]  %s6514_s12, 2048, %s96_s29, [#allocation9], %s6254_s28, %s6254_s28, %s6255_s30  }
  0x3d   :  { %6233 = dma.done.wait [#allocation3], 16384  }
  0x3e   :  { %6234 = vsyncadd [#allocation3], 4294950912 }
  0x3f   :  { %6235 = dma.done.wait [#allocation6], 40960  }
  0x40   :  { %6236 = vsyncadd [#allocation6], 4294926336 }
  0x41   :  { %6237 = dma.done.wait [#allocation9], 18432  }
  0x42   :  { %6238 = vsyncadd [#allocation9], 4294948864  ;;  %v6256_v0 = vmov 0   ;;  %v123_v1 = vld [vmem:[%s6503_s1] sm:$0xff]  ;;  %vm161_vm0 = vcmask 1043456   ;;  %v121_v3 = vld [vmem:[%s6502_s0 + $0x8] sm:$0xff] }
  0x43   :  { %206 = vmatprep.mubr.bf16.mxu0 %v6256_v0  ;;  %v120_v2 = vld [vmem:[%s6502_s0] sm:$0xff]  ;;  %v4951_v4 = vcombine.high %v123_v1, %v123_v1  ;;  %v4950_v5 = vcombine.low %v123_v1, %v123_v1  ;;  %v124_v6 = vld [vmem:[%s6503_s1 + $0x8] sm:$0xff]  ;;  %vm157_vm1 = vcmask 64512  }
  0x44   :  { %v4953_v7 = vcombine.high %v124_v6, %v124_v6  ;;  %v4952_v8 = vcombine.low %v124_v6, %v124_v6  ;;  %v122_v10 = vpack.c.bf16 %v121_v3, %v120_v2  ;;  %v5598_v12 = vld [vmem:[#allocation2 + $0xe4] ss:$16 sps:$4 sm:$0xff]   ;;  %v5607_v14 = vld [vmem:[#allocation2 + $0x2e0] ss:$16 sps:$4 sm:$0xff]  }
  0x45   :  { %4954 = vmatprep.subr.msk.bf16.mxu0 %vm161_vm0, %v4951_v4  ;;  %v163_v9 = vsel %vm161_vm0, %v4950_v5, 0  ;;  %v5605_v13 = vld [vmem:[#allocation2 + $0x2e4] ss:$16 sps:$4 sm:$0xff]   ;;  %v5613_v16 = vld [vmem:[#allocation2 + $0x2c0] ss:$16 sps:$4 sm:$0xff]  }
  0x46   :  { %189 = vmatpush1.bf16.msra.mxu0 %v163_v9  ;;  %v169_v11 = vsel %vm161_vm0, %v4952_v8, 0  ;;  %v5611_v15 = vld [vmem:[#allocation2 + $0x2c4] ss:$16 sps:$4 sm:$0xff]   ;;  %1121 = vmatprep.subr.bf16.mxu1 %v5605_v13  ;;  %v5596_v18 = vld [vmem:[#allocation2 + $0xe0] ss:$16 sps:$4 sm:$0xff]  }
  0x47   :  { %4956 = vmatprep.subr.msk.bf16.mxu0 %vm161_vm0, %v4953_v7  ;;  %1122 = vmatpush1.bf16.msra.mxu1 %v5607_v14  ;;  %v5617_v17 = vld [vmem:[#allocation2 + $0x2a4] ss:$16 sps:$4 sm:$0xff]   ;;  %v5619_v20 = vld [vmem:[#allocation2 + $0x2a0] ss:$16 sps:$4 sm:$0xff]   ;;  %v5703_v14 = vld [vmem:[#allocation2 + $0x2ec] ss:$16 sps:$4 sm:$0xff]  }
  0x48   :  { %1123 = vmatprep.subr.bf16.mxu1 %v5611_v15  ;;  %v5601_v19 = vld [vmem:[#allocation2 + $0xc4] ss:$16 sps:$4 sm:$0xff]   ;;  %v5599_v22 = vld [vmem:[#allocation2 + $0xc0] ss:$16 sps:$4 sm:$0xff]   ;;  %v127_v15 = vlaneseq }
  0x49   :  { %4955 = vmatmul.mubr.msk.bf16.vlgmr.msra.gmra.mxu0 %vm157_vm1, %v122_v10  ;;  %v5623_v21 = vld [vmem:[#allocation2 + $0x284] ss:$16 sps:$4 sm:$0xff]   ;;  %v5625_v24 = vld [vmem:[#allocation2 + $0x280] ss:$16 sps:$4 sm:$0xff]  }
  0x4a   :  { %232 = vmatpush1.bf16.msra.mxu0 %v169_v11  ;;  %249 = vmatprep.mubr.bf16.mxu0 %v6256_v0  ;;  %v5604_v23 = vld [vmem:[#allocation2 + $0xa4] ss:$16 sps:$4 sm:$0xff]   ;;  %v5602_v26 = vld [vmem:[#allocation2 + $0xa0] ss:$16 sps:$4 sm:$0xff]  }
  0x4b   :  { %1078 = vmatprep.subr.bf16.mxu0 %v5598_v12  ;;  %1124 = vmatpush1.bf16.msra.mxu1 %v5613_v16  ;;  %v5629_v25 = vld [vmem:[#allocation2 + $0x264] ss:$16 sps:$4 sm:$0xff]   ;;  %v5631_v28 = vld [vmem:[#allocation2 + $0x260] ss:$16 sps:$4 sm:$0xff]   ;;  %v6370_v16 = vshrl.u32 %v127_v15, 7 }
  0x4c   :  { %1125 = vmatprep.subr.bf16.mxu1 %v5617_v17  ;;  %v5610_v27 = vld [vmem:[#allocation2 + $0x84] ss:$16 sps:$4 sm:$0xff]   ;;  %v5608_v30 = vld [vmem:[#allocation2 + $0x80] ss:$16 sps:$4 sm:$0xff]   ;;  %v5716_v15 = vld [vmem:[#allocation2 + $0x48] ss:$16 sps:$4 sm:$0xff]  }
  0x4d   :  { %v5635_v29 = vld [vmem:[#allocation2 + $0x244] ss:$16 sps:$4 sm:$0xff]   ;;  %v5637_v32 = vld [vmem:[#allocation2 + $0x240] ss:$16 sps:$4 sm:$0xff]   ;;  %v6373_v17 = vsub.s32 1, %v6370_v16 }
  0x4e   :  { %v5616_v31 = vld [vmem:[#allocation2 + $0x64] ss:$16 sps:$4 sm:$0xff]   ;;  %v5614_v34 = vld [vmem:[#allocation2 + $0x60] ss:$16 sps:$4 sm:$0xff]  }
  0x4f   :  { %1126 = vmatpush1.bf16.msra.mxu1 %v5619_v20  ;;  %v5641_v33 = vld [vmem:[#allocation2 + $0x224] ss:$16 sps:$4 sm:$0xff]   ;;  %v5643_v36 = vld [vmem:[#allocation2 + $0x220] ss:$16 sps:$4 sm:$0xff]  }
  0x50   :  { %1127 = vmatprep.subr.bf16.mxu1 %v5623_v21  ;;  %v5622_v35 = vld [vmem:[#allocation2 + $0x44] ss:$16 sps:$4 sm:$0xff]   ;;  %v5620_v37 = vld [vmem:[#allocation2 + $0x40] ss:$16 sps:$4 sm:$0xff]  }
  0x51   :  { %4957 = vmatmul.mubr.msk.bf16.vlgmr.msra.gmra.mxu0 %vm157_vm1, %v122_v10  ;;  %v5647_v38 = vld [vmem:[#allocation2 + $0x204] ss:$16 sps:$4 sm:$0xff]   ;;  %v5649_v40 = vld [vmem:[#allocation2 + $0x200] ss:$16 sps:$4 sm:$0xff]   ;;  %v5690_v10 = vld [vmem:[#allocation2 + $0xec] ss:$16 sps:$4 sm:$0xff]  }
  0x52   :  { %1079 = vmatpush1.bf16.msra.mxu0 %v5596_v18  ;;  %v5628_v39 = vld [vmem:[#allocation2 + $0x24] ss:$16 sps:$4 sm:$0xff]   ;;  %v5626_v42 = vld [vmem:[#allocation2 + $0x20] ss:$16 sps:$4 sm:$0xff]   ;;  %v6376_v18 = vsub.s32 0, %v6370_v16 }
  0x53   :  { %1080 = vmatprep.subr.bf16.mxu0 %v5601_v19  ;;  %1128 = vmatpush1.bf16.msra.mxu1 %v5625_v24  ;;  %v5653_v41 = vld [vmem:[#allocation2 + $0x3e4] ss:$16 sps:$4 sm:$0xff]   ;;  %v5655_v44 = vld [vmem:[#allocation2 + $0x3e0] ss:$16 sps:$4 sm:$0xff]   ;;  %v6384_v24 = vsub.s32 3, %v6370_v16 }
  0x54   :  { %1129 = vmatprep.subr.bf16.mxu1 %v5629_v25  ;;  %v5634_v43 = vld [vmem:[#allocation2 + $0x4] ss:$16 sps:$4 sm:$0xff]   ;;  %v5632_v46 = vld [vmem:[#allocation2] ss:$16 sps:$4 sm:$0xff]  }
  0x55   :  { %v5659_v45 = vld [vmem:[#allocation2 + $0x3c4] ss:$16 sps:$4 sm:$0xff]   ;;  %v5661_v48 = vld [vmem:[#allocation2 + $0x3c0] ss:$16 sps:$4 sm:$0xff]  }
  0x56   :  { %1081 = vmatpush1.bf16.msra.mxu0 %v5599_v22  ;;  %v5640_v47 = vld [vmem:[#allocation2 + $0x1e4] ss:$16 sps:$4 sm:$0xff]   ;;  %v5638_v50 = vld [vmem:[#allocation2 + $0x1e0] ss:$16 sps:$4 sm:$0xff]  }
  0x57   :  { %1082 = vmatprep.subr.bf16.mxu0 %v5604_v23  ;;  %1130 = vmatpush1.bf16.msra.mxu1 %v5631_v28  ;;  %v5665_v49 = vld [vmem:[#allocation2 + $0x3a4] ss:$16 sps:$4 sm:$0xff]   ;;  %v5667_v52 = vld [vmem:[#allocation2 + $0x3a0] ss:$16 sps:$4 sm:$0xff]   ;;  %v6387_v28 = vsub.s32 2, %v6370_v16 }
  0x58   :  { %1131 = vmatprep.subr.bf16.mxu1 %v5635_v29  ;;  %v5646_v51 = vld [vmem:[#allocation2 + $0x1c4] ss:$16 sps:$4 sm:$0xff]   ;;  %v5644_v53 = vld [vmem:[#allocation2 + $0x1c0] ss:$16 sps:$4 sm:$0xff]  }
  0x59   :  { %v5652_v54 = vld [vmem:[#allocation2 + $0x1a4] ss:$16 sps:$4 sm:$0xff]   ;;  %v5650_v55 = vld [vmem:[#allocation2 + $0x1a0] ss:$16 sps:$4 sm:$0xff]  }
  0x5a   :  { %1083 = vmatpush1.bf16.msra.mxu0 %v5602_v26  ;;  %v5658_v56 = vld [vmem:[#allocation2 + $0x184] ss:$16 sps:$4 sm:$0xff]   ;;  %v5656_v57 = vld [vmem:[#allocation2 + $0x180] ss:$16 sps:$4 sm:$0xff]  }
  0x5b   :  { %1084 = vmatprep.subr.bf16.mxu0 %v5610_v27  ;;  %1132 = vmatpush1.bf16.msra.mxu1 %v5637_v32  ;;  %v5664_v58 = vld [vmem:[#allocation2 + $0x164] ss:$16 sps:$4 sm:$0xff]   ;;  %v5662_v59 = vld [vmem:[#allocation2 + $0x160] ss:$16 sps:$4 sm:$0xff]  }
  0x5c   :  { %1133 = vmatprep.subr.bf16.mxu1 %v5641_v33  ;;  %v5670_v60 = vld [vmem:[#allocation2 + $0x144] ss:$16 sps:$4 sm:$0xff]   ;;  %v5668_v62 = vld [vmem:[#allocation2 + $0x140] ss:$16 sps:$4 sm:$0xff]  }
  0x5d   :  { %v5671_v61 = vld [vmem:[#allocation2 + $0x384] ss:$16 sps:$4 sm:$0xff]   ;;  %v5673_v63 = vld [vmem:[#allocation2 + $0x380] ss:$16 sps:$4 sm:$0xff]  }
  0x5e   :  { %1085 = vmatpush1.bf16.msra.mxu0 %v5608_v30  ;;  %v5676_v1 = vld [vmem:[#allocation2 + $0x124] ss:$16 sps:$4 sm:$0xff]   ;;  %v5674_v3 = vld [vmem:[#allocation2 + $0x120] ss:$16 sps:$4 sm:$0xff]  }
  0x5f   :  { %1086 = vmatprep.subr.bf16.mxu0 %v5616_v31  ;;  %1134 = vmatpush1.bf16.msra.mxu1 %v5643_v36  ;;  %v5677_v2 = vld [vmem:[#allocation2 + $0x364] ss:$16 sps:$4 sm:$0xff]   ;;  %v5679_v4 = vld [vmem:[#allocation2 + $0x360] ss:$16 sps:$4 sm:$0xff]  }
  0x60   :  { %1135 = vmatprep.subr.bf16.mxu1 %v5647_v38  ;;  %v5682_v5 = vld [vmem:[#allocation2 + $0x104] ss:$16 sps:$4 sm:$0xff]   ;;  %v5680_v7 = vld [vmem:[#allocation2 + $0x100] ss:$16 sps:$4 sm:$0xff]  }
  0x61   :  { %v5683_v6 = vld [vmem:[#allocation2 + $0x344] ss:$16 sps:$4 sm:$0xff]   ;;  %v5685_v8 = vld [vmem:[#allocation2 + $0x340] ss:$16 sps:$4 sm:$0xff]  }
  0x62   :  { %1087 = vmatpush1.bf16.msra.mxu0 %v5614_v34  ;;  %v5686_v9 = vld [vmem:[#allocation2 + $0x324] ss:$16 sps:$4 sm:$0xff]   ;;  %v5691_v11 = vld [vmem:[#allocation2 + $0x320] ss:$16 sps:$4 sm:$0xff]  }
  0x63   :  { %1088 = vmatprep.subr.bf16.mxu0 %v5622_v35  ;;  %1136 = vmatpush1.bf16.msra.mxu1 %v5649_v40  ;;  %v5692_v12 = vld [vmem:[#allocation2 + $0x304] ss:$16 sps:$4 sm:$0xff]   ;;  %v5697_v13 = vld [vmem:[#allocation2 + $0x300] ss:$16 sps:$4 sm:$0xff]  }
  0x64   :  { %1137 = vmatprep.subr.bf16.mxu1 %v5653_v41  ;;  %v125_v19 = vld [vmem:[%s6504_s2] sm:$0xf] }
  0x65   :  { %v134_v20 = vrot.slane %v125_v19, %v6373_v17  ;;  %v130_v21 = vrot.slane %v125_v19, %v6376_v18  ;;  %v142_v31 = vrot.slane %v125_v19, %v6384_v24  ;;  %v138_v36 = vrot.slane %v125_v19, %v6387_v28  ;;  %v5719_v19 = vld [vmem:[#allocation2 + $0x288] ss:$16 sps:$4 sm:$0xff]  }
  0x66   :  { %1089 = vmatpush1.bf16.msra.mxu0 %v5620_v37 }
  0x67   :  { %1090 = vmatprep.subr.bf16.mxu0 %v5628_v39  ;;  %1138 = vmatpush2.bf16.msra.mxu1 %v5655_v44 }
  0x68   :  { %1139 = vmatprep.subr.bf16.mxu1 %v5659_v45 }
  0x6a   :  { %1091 = vmatpush1.bf16.msra.mxu0 %v5626_v42 }
  0x6b   :  { %1092 = vmatprep.subr.bf16.mxu0 %v5634_v43  ;;  %1140 = vmatpush2.bf16.msra.mxu1 %v5661_v48  ;;  %v5688_v48 = vld [vmem:[#allocation2 + $0xe8] ss:$16 sps:$4 sm:$0xff]  }
  0x6c   :  { %1141 = vmatprep.subr.bf16.mxu1 %v5665_v49 }
  0x6e   :  { %1093 = vmatpush1.bf16.msra.mxu0 %v5632_v46 }
  0x6f   :  { %1094 = vmatprep.subr.bf16.mxu0 %v5640_v47  ;;  %1142 = vmatpush2.bf16.msra.mxu1 %v5667_v52 }
  0x70   :  { %1143 = vmatprep.subr.bf16.mxu1 %v5671_v61 }
  0x72   :  { %1095 = vmatpush2.bf16.msra.mxu0 %v5638_v50 }
  0x73   :  { %1096 = vmatprep.subr.bf16.mxu0 %v5646_v51  ;;  %1144 = vmatpush2.bf16.msra.mxu1 %v5673_v63  ;;  %v5696_v51 = vld [vmem:[#allocation2 + $0xcc] ss:$16 sps:$4 sm:$0xff]  }
  0x74   :  { %1145 = vmatprep.subr.bf16.mxu1 %v5677_v2  ;;  %v5701_v2 = vld [vmem:[#allocation2 + $0x2e8] ss:$16 sps:$4 sm:$0xff]  }
  0x76   :  { %1097 = vmatpush2.bf16.msra.mxu0 %v5644_v53 }
  0x77   :  { %1098 = vmatprep.subr.bf16.mxu0 %v5652_v54  ;;  %1146 = vmatpush2.bf16.msra.mxu1 %v5679_v4 }
  0x78   :  { %1147 = vmatprep.subr.bf16.mxu1 %v5683_v6  ;;  %v5709_v6 = vld [vmem:[#allocation2 + $0x2cc] ss:$16 sps:$4 sm:$0xff]  }
  0x7a   :  { %1099 = vmatpush2.bf16.msra.mxu0 %v5650_v55 }
  0x7b   :  { %1100 = vmatprep.subr.bf16.mxu0 %v5658_v56  ;;  %1148 = vmatpush2.bf16.msra.mxu1 %v5685_v8  ;;  %v5707_v8 = vld [vmem:[#allocation2 + $0x2c8] ss:$16 sps:$4 sm:$0xff]  }
  0x7c   :  { %1149 = vmatprep.subr.bf16.mxu1 %v5686_v9  ;;  %v5712_v9 = vld [vmem:[#allocation2 + $0x6c] ss:$16 sps:$4 sm:$0xff]  }
  0x7e   :  { %1101 = vmatpush2.bf16.msra.mxu0 %v5656_v57  ;;  %v5694_v57 = vld [vmem:[#allocation2 + $0xc8] ss:$16 sps:$4 sm:$0xff]  }
  0x7f   :  { %1102 = vmatprep.subr.bf16.mxu0 %v5664_v58  ;;  %1150 = vmatpush2.bf16.msra.mxu1 %v5691_v11  ;;  %v5710_v11 = vld [vmem:[#allocation2 + $0x68] ss:$16 sps:$4 sm:$0xff]  }
  0x80   :  { %1151 = vmatprep.subr.bf16.mxu1 %v5692_v12  ;;  %v5713_v12 = vld [vmem:[#allocation2 + $0x2a8] ss:$16 sps:$4 sm:$0xff]  }
  0x82   :  { %1103 = vmatpush2.bf16.msra.mxu0 %v5662_v59  ;;  %v5700_v59 = vld [vmem:[#allocation2 + $0xac] ss:$16 sps:$4 sm:$0xff]  }
  0x83   :  { %1104 = vmatprep.subr.bf16.mxu0 %v5670_v60  ;;  %1152 = vmatpush2.bf16.msra.mxu1 %v5697_v13  ;;  %v5718_v13 = vld [vmem:[#allocation2 + $0x4c] ss:$16 sps:$4 sm:$0xff]  }
  0x84   :  { %1207 = vmatprep.subr.bf16.mxu1 %v5703_v14  ;;  %v5721_v14 = vld [vmem:[#allocation2 + $0x28c] ss:$16 sps:$4 sm:$0xff]  }
  0x86   :  { %1105 = vmatpush2.bf16.msra.mxu0 %v5668_v62 }
  0x87   :  { %1106 = vmatprep.subr.bf16.mxu0 %v5676_v1  ;;  %v5698_v1 = vld [vmem:[#allocation2 + $0xa8] ss:$16 sps:$4 sm:$0xff]  }
  0x8a   :  { %1107 = vmatpush2.bf16.msra.mxu0 %v5674_v3 }
  0x8b   :  { %1108 = vmatprep.subr.bf16.mxu0 %v5682_v5  ;;  %v5706_v5 = vld [vmem:[#allocation2 + $0x8c] ss:$16 sps:$4 sm:$0xff]  }
  0x8e   :  { %1109 = vmatpush2.bf16.msra.mxu0 %v5680_v7  ;;  %v5704_v7 = vld [vmem:[#allocation2 + $0x88] ss:$16 sps:$4 sm:$0xff]  }
  0x8f   :  { %1164 = vmatprep.subr.bf16.mxu0 %v5690_v10  ;;  %v5715_v10 = vld [vmem:[#allocation2 + $0x2ac] ss:$16 sps:$4 sm:$0xff]  }
 0x109   :  { %v208_v22 = vpop.f32.mrf.mxu0 }
 0x10a   :  { %v209_v26 = vadd.f32 %v208_v22, %v130_v21  ;;  %v5722_v22 = vld [vmem:[#allocation2 + $0x28] ss:$16 sps:$4 sm:$0xff]  }
 0x10b   :  { %v210_v23 = vpop.f32.mrf.mxu0 }
 0x10c   :  { %v211_v25 = vadd.f32 %v210_v23, %v134_v20  ;;  %v268_v35 = vmul.f32 0.2, %v209_v26  ;;  %vm260_vm4 = vcmp.ge.f32.partialorder %v209_v26, 0.0  ;;  %v5725_v23 = vld [vmem:[#allocation2 + $0x268] ss:$16 sps:$4 sm:$0xff]  }
 0x10d   :  { %v212_v27 = vpop.f32.mrf.mxu0 }
 0x10e   :  { %v213_v29 = vadd.f32 %v212_v27, %v130_v21  ;;  %v269_v32 = vmul.f32 0.2, %v211_v25  ;;  %vm261_vm3 = vcmp.ge.f32.partialorder %v211_v25, 0.0  ;;  %v276_v44 = vsel %vm260_vm4, %v209_v26, %v268_v35  ;;  %v5727_v21 = vld [vmem:[#allocation2 + $0x26c] ss:$16 sps:$4 sm:$0xff]  }
 0x10f   :  { %v214_v30 = vpop.f32.mrf.mxu0  ;;  %v5733_v26 = vld [vmem:[#allocation2 + $0x24c] ss:$16 sps:$4 sm:$0xff]   ;;  %v5728_v27 = vld [vmem:[#allocation2 + $0x8] ss:$16 sps:$4 sm:$0xff]  }
 0x110   :  { %vm264_vm2 = vcmp.ge.f32.partialorder %v213_v29, 0.0  ;;  %v272_v33 = vmul.f32 0.2, %v213_v29  ;;  %v215_v34 = vadd.f32 %v214_v30, %v134_v20  ;;  %v277_v42 = vsel %vm261_vm3, %v211_v25, %v269_v32  ;;  %v5724_v20 = vld [vmem:[#allocation2 + $0x2c] ss:$16 sps:$4 sm:$0xff]  }
 0x111   :  { %v251_v37 = vpop.f32.mrf.mxu0  ;;  %v5730_v25 = vld [vmem:[#allocation2 + $0xc] ss:$16 sps:$4 sm:$0xff]   ;;  %v5734_v32 = vld [vmem:[#allocation2 + $0x1e8] ss:$16 sps:$4 sm:$0xff]  }
 0x112   :  { %vm265_vm5 = vcmp.ge.f32.partialorder %v215_v34, 0.0  ;;  %v273_v38 = vmul.f32 0.2, %v215_v34  ;;  %v280_v39 = vsel %vm264_vm2, %v213_v29, %v272_v33  ;;  %v252_v45 = vadd.f32 %v251_v37, %v138_v36  ;;  %v5731_v29 = vld [vmem:[#allocation2 + $0x248] ss:$16 sps:$4 sm:$0xff]  }
 0x113   :  { %v253_v40 = vpop.f32.mrf.mxu0  ;;  %v6391_v49 = vpack.c.bf16 %v280_v39, %v276_v44  ;;  %v5736_v30 = vld [vmem:[#allocation2 + $0x1ec] ss:$16 sps:$4 sm:$0xff]   ;;  %v5737_v33 = vld [vmem:[#allocation2 + $0x228] ss:$16 sps:$4 sm:$0xff]  }
 0x114   :  { %v254_v41 = vadd.f32 %v253_v40, %v142_v31  ;;  %v281_v43 = vsel %vm265_vm5, %v215_v34, %v273_v38  ;;  %v270_v56 = vmul.f32 0.2, %v252_v45  ;;  %vm262_vm8 = vcmp.ge.f32.partialorder %v252_v45, 0.0  ;;  %v5742_v34 = vld [vmem:[#allocation2 + $0x1cc] ss:$16 sps:$4 sm:$0xff]  }
 0x115   :  { %v255_v46 = vpop.f32.mrf.mxu0  ;;  %v285_v47 = vpack.c.bf16 %v281_v43, %v277_v42  ;;  %v5745_v35 = vld [vmem:[#allocation2 + $0x20c] ss:$16 sps:$4 sm:$0xff]   ;;  %v5743_v37 = vld [vmem:[#allocation2 + $0x208] ss:$16 sps:$4 sm:$0xff]  }
 0x116   :  { %v256_v50 = vadd.f32 %v255_v46, %v138_v36  ;;  %v271_v53 = vmul.f32 0.2, %v254_v41  ;;  %vm263_vm7 = vcmp.ge.f32.partialorder %v254_v41, 0.0  ;;  %v278_v3 = vsel %vm262_vm8, %v252_v45, %v270_v56  ;;  %v5740_v36 = vld [vmem:[#allocation2 + $0x1c8] ss:$16 sps:$4 sm:$0xff]  }
 0x117   :  { %v257_v52 = vpop.f32.mrf.mxu0  ;;  %1110 = vmatprep.mubr.bf16.mxu0 %v285_v47  ;;  %v5748_v38 = vld [vmem:[#allocation2 + $0x1ac] ss:$16 sps:$4 sm:$0xff]   ;;  %v5746_v40 = vld [vmem:[#allocation2 + $0x1a8] ss:$16 sps:$4 sm:$0xff]  }
 0x118   :  { %vm266_vm6 = vcmp.ge.f32.partialorder %v256_v50, 0.0  ;;  %v274_v54 = vmul.f32 0.2, %v256_v50  ;;  %v258_v55 = vadd.f32 %v257_v52, %v142_v31  ;;  %1111 = vmatmul.mubr.bf16.vlgmr.msra.gmra.mxu0 %v6391_v49  ;;  %v279_v61 = vsel %vm263_vm7, %v254_v41, %v271_v53  ;;  %v5739_v31 = vld [vmem:[#allocation2 + $0x22c] ss:$16 sps:$4 sm:$0xff]  }
 0x119   :  { %1165 = vmatpush1.bf16.msra.mxu0 %v5688_v48  ;;  %1196 = vmatprep.mubr.bf16.mxu0 %v285_v47  ;;  %v5751_v39 = vld [vmem:[#allocation2 + $0x3ec] ss:$16 sps:$4 sm:$0xff]   ;;  %v5749_v41 = vld [vmem:[#allocation2 + $0x3e8] ss:$16 sps:$4 sm:$0xff]  }
 0x11a   :  { %v275_v58 = vmul.f32 0.2, %v258_v55  ;;  %1166 = vmatprep.subr.bf16.mxu0 %v5696_v51  ;;  %vm267_vm9 = vcmp.ge.f32.partialorder %v258_v55, 0.0  ;;  %v282_v60 = vsel %vm266_vm6, %v256_v50, %v274_v54  ;;  %v5754_v42 = vld [vmem:[#allocation2 + $0x18c] ss:$16 sps:$4 sm:$0xff]   ;;  %vm1781_vm6 = vcmask 130048  }
 0x11b   :  { %v6394_v4 = vpack.c.bf16 %v282_v60, %v278_v3  ;;  %v5757_v43 = vld [vmem:[#allocation2 + $0x3cc] ss:$16 sps:$4 sm:$0xff]   ;;  %v5752_v44 = vld [vmem:[#allocation2 + $0x188] ss:$16 sps:$4 sm:$0xff]  }
 0x11c   :  { %v283_v62 = vsel %vm267_vm9, %v258_v55, %v275_v58  ;;  %v5755_v45 = vld [vmem:[#allocation2 + $0x3c8] ss:$16 sps:$4 sm:$0xff]   ;;  %v5760_v46 = vld [vmem:[#allocation2 + $0x16c] ss:$16 sps:$4 sm:$0xff]  }
 0x11d   :  { %1167 = vmatpush1.bf16.msra.mxu0 %v5694_v57  ;;  %v287_v63 = vpack.c.bf16 %v283_v62, %v279_v61  ;;  %v5763_v47 = vld [vmem:[#allocation2 + $0x3ac] ss:$16 sps:$4 sm:$0xff]   ;;  %v5758_v48 = vld [vmem:[#allocation2 + $0x168] ss:$16 sps:$4 sm:$0xff]  }
 0x11e   :  { %1168 = vmatprep.subr.bf16.mxu0 %v5700_v59  ;;  %v5761_v50 = vld [vmem:[#allocation2 + $0x3a8] ss:$16 sps:$4 sm:$0xff]   ;;  %v5766_v51 = vld [vmem:[#allocation2 + $0x14c] ss:$16 sps:$4 sm:$0xff]  }
 0x11f   :  { %1153 = vmatprep.mubr.bf16.mxu1 %v287_v63  ;;  %v5769_v52 = vld [vmem:[#allocation2 + $0x38c] ss:$16 sps:$4 sm:$0xff]   ;;  %v5764_v53 = vld [vmem:[#allocation2 + $0x148] ss:$16 sps:$4 sm:$0xff]  }
 0x120   :  { %1154 = vmatmul.mubr.bf16.vlgmr.msra.gmra.mxu1 %v6394_v4  ;;  %v5767_v54 = vld [vmem:[#allocation2 + $0x388] ss:$16 sps:$4 sm:$0xff]   ;;  %v5772_v55 = vld [vmem:[#allocation2 + $0x12c] ss:$16 sps:$4 sm:$0xff]  }
 0x121   :  { %1169 = vmatpush1.bf16.msra.mxu0 %v5698_v1  ;;  %1208 = vmatpush1.bf16.msra.mxu1 %v5701_v2  ;;  %v5775_v56 = vld [vmem:[#allocation2 + $0x36c] ss:$16 sps:$4 sm:$0xff]   ;;  %v5770_v57 = vld [vmem:[#allocation2 + $0x128] ss:$16 sps:$4 sm:$0xff]  }
 0x122   :  { %1239 = vmatprep.mubr.bf16.mxu1 %v287_v63  ;;  %1170 = vmatprep.subr.bf16.mxu0 %v5706_v5  ;;  %v5773_v58 = vld [vmem:[#allocation2 + $0x368] ss:$16 sps:$4 sm:$0xff]   ;;  %v5778_v59 = vld [vmem:[#allocation2 + $0x10c] ss:$16 sps:$4 sm:$0xff]  }
 0x123   :  { %1209 = vmatprep.subr.bf16.mxu1 %v5709_v6  ;;  %v5781_v60 = vld [vmem:[#allocation2 + $0x34c] ss:$16 sps:$4 sm:$0xff]   ;;  %v5776_v61 = vld [vmem:[#allocation2 + $0x108] ss:$16 sps:$4 sm:$0xff]  }
 0x124   :  { %v5779_v62 = vld [vmem:[#allocation2 + $0x348] ss:$16 sps:$4 sm:$0xff]   ;;  %v5784_v63 = vld [vmem:[#allocation2 + $0x32c] ss:$16 sps:$4 sm:$0xff]  }
 0x125   :  { %1171 = vmatpush1.bf16.msra.mxu0 %v5704_v7  ;;  %1210 = vmatpush1.bf16.msra.mxu1 %v5707_v8  ;;  %v5790_v1 = vld [vmem:[#allocation5 + $0x74] ss:$8 sps:$4 sm:$0xff]   ;;  %v5782_v2 = vld [vmem:[#allocation2 + $0x328] ss:$16 sps:$4 sm:$0xff]   ;;  %v5793_v6 = vld [vmem:[#allocation5 + $0x64] ss:$8 sps:$4 sm:$0xff]  }
 0x126   :  { %1172 = vmatprep.subr.bf16.mxu0 %v5712_v9  ;;  %1211 = vmatprep.subr.bf16.mxu1 %v5715_v10  ;;  %v5788_v3 = vld [vmem:[#allocation5 + $0x70] ss:$8 sps:$4 sm:$0xff]   ;;  %v5787_v5 = vld [vmem:[#allocation2 + $0x30c] ss:$16 sps:$4 sm:$0xff]   ;;  %v5791_v8 = vld [vmem:[#allocation5 + $0x60] ss:$8 sps:$4 sm:$0xff]  }
 0x127   :  { %v5785_v7 = vld [vmem:[#allocation2 + $0x308] ss:$16 sps:$4 sm:$0xff]   ;;  %v5796_v9 = vld [vmem:[#allocation5 + $0x54] ss:$8 sps:$4 sm:$0xff]  }
 0x128   :  { %v5794_v10 = vld [vmem:[#allocation5 + $0x50] ss:$8 sps:$4 sm:$0xff]  }
 0x129   :  { %1173 = vmatpush1.bf16.msra.mxu0 %v5710_v11  ;;  %1212 = vmatpush1.bf16.msra.mxu1 %v5713_v12  ;;  %v5799_v11 = vld [vmem:[#allocation5 + $0x44] ss:$8 sps:$4 sm:$0xff]   ;;  %v5797_v12 = vld [vmem:[#allocation5 + $0x40] ss:$8 sps:$4 sm:$0xff]  }
 0x12a   :  { %1174 = vmatprep.subr.bf16.mxu0 %v5718_v13  ;;  %1213 = vmatprep.subr.bf16.mxu1 %v5721_v14  ;;  %v5802_v13 = vld [vmem:[#allocation5 + $0x34] ss:$8 sps:$4 sm:$0xff]   ;;  %v5805_v14 = vld [vmem:[#allocation5 + $0x24] ss:$8 sps:$4 sm:$0xff]  }
 0x12d   :  { %1175 = vmatpush1.bf16.msra.mxu0 %v5716_v15  ;;  %1214 = vmatpush1.bf16.msra.mxu1 %v5719_v19  ;;  %v5803_v15 = vld [vmem:[#allocation5 + $0x20] ss:$8 sps:$4 sm:$0xff]   ;;  %v5808_v19 = vld [vmem:[#allocation5 + $0x14] ss:$8 sps:$4 sm:$0xff]  }
 0x12e   :  { %1176 = vmatprep.subr.bf16.mxu0 %v5724_v20  ;;  %1215 = vmatprep.subr.bf16.mxu1 %v5727_v21  ;;  %v5806_v20 = vld [vmem:[#allocation5 + $0x10] ss:$8 sps:$4 sm:$0xff]   ;;  %v5838_v21 = vld [vmem:[#allocation5 + $0x174] ss:$8 sps:$4 sm:$0xff]  }
 0x131   :  { %1177 = vmatpush1.bf16.msra.mxu0 %v5722_v22  ;;  %1216 = vmatpush1.bf16.msra.mxu1 %v5725_v23  ;;  %v5811_v22 = vld [vmem:[#allocation5 + $0x4] ss:$8 sps:$4 sm:$0xff]   ;;  %v5836_v23 = vld [vmem:[#allocation5 + $0x170] ss:$8 sps:$4 sm:$0xff]  }
 0x132   :  { %1178 = vmatprep.subr.bf16.mxu0 %v5730_v25  ;;  %1217 = vmatprep.subr.bf16.mxu1 %v5733_v26  ;;  %v5839_v25 = vld [vmem:[#allocation5 + $0x160] ss:$8 sps:$4 sm:$0xff]  }
 0x133   :  { %v5809_v26 = vld [vmem:[#allocation5] ss:$8 sps:$4 sm:$0xff]  }
 0x135   :  { %1179 = vmatpush1.bf16.msra.mxu0 %v5728_v27  ;;  %1218 = vmatpush1.bf16.msra.mxu1 %v5731_v29  ;;  %v5844_v27 = vld [vmem:[#allocation5 + $0x154] ss:$8 sps:$4 sm:$0xff]  }
 0x136   :  { %1180 = vmatprep.subr.bf16.mxu0 %v5736_v30  ;;  %1219 = vmatprep.subr.bf16.mxu1 %v5739_v31  ;;  %v5814_v29 = vld [vmem:[#allocation5 + $0xf4] ss:$8 sps:$4 sm:$0xff]   ;;  %v5842_v30 = vld [vmem:[#allocation5 + $0x150] ss:$8 sps:$4 sm:$0xff]  }
 0x137   :  { %v5812_v31 = vld [vmem:[#allocation5 + $0xf0] ss:$8 sps:$4 sm:$0xff]  }
 0x139   :  { %1181 = vmatpush2.bf16.msra.mxu0 %v5734_v32  ;;  %1220 = vmatpush1.bf16.msra.mxu1 %v5737_v33  ;;  %v5847_v32 = vld [vmem:[#allocation5 + $0x144] ss:$8 sps:$4 sm:$0xff]  }
 0x13a   :  { %1182 = vmatprep.subr.bf16.mxu0 %v5742_v34  ;;  %1221 = vmatprep.subr.bf16.mxu1 %v5745_v35  ;;  %v5817_v33 = vld [vmem:[#allocation5 + $0xe4] ss:$8 sps:$4 sm:$0xff]   ;;  %v5845_v34 = vld [vmem:[#allocation5 + $0x140] ss:$8 sps:$4 sm:$0xff]  }
 0x13b   :  { %v5815_v35 = vld [vmem:[#allocation5 + $0xe0] ss:$8 sps:$4 sm:$0xff]  }
 0x13d   :  { %1183 = vmatpush2.bf16.msra.mxu0 %v5740_v36  ;;  %1222 = vmatpush1.bf16.msra.mxu1 %v5743_v37  ;;  %v5850_v36 = vld [vmem:[#allocation5 + $0x134] ss:$8 sps:$4 sm:$0xff]  }
 0x13e   :  { %1184 = vmatprep.subr.bf16.mxu0 %v5748_v38  ;;  %1223 = vmatprep.subr.bf16.mxu1 %v5751_v39  ;;  %v5820_v37 = vld [vmem:[#allocation5 + $0xd4] ss:$8 sps:$4 sm:$0xff]   ;;  %v5848_v38 = vld [vmem:[#allocation5 + $0x130] ss:$8 sps:$4 sm:$0xff]  }
 0x13f   :  { %v5818_v39 = vld [vmem:[#allocation5 + $0xd0] ss:$8 sps:$4 sm:$0xff]  }
 0x141   :  { %1185 = vmatpush2.bf16.msra.mxu0 %v5746_v40  ;;  %1224 = vmatpush2.bf16.msra.mxu1 %v5749_v41  ;;  %v5853_v40 = vld [vmem:[#allocation5 + $0x124] ss:$8 sps:$4 sm:$0xff]  }
 0x142   :  { %1186 = vmatprep.subr.bf16.mxu0 %v5754_v42  ;;  %1225 = vmatprep.subr.bf16.mxu1 %v5757_v43  ;;  %v5823_v41 = vld [vmem:[#allocation5 + $0xc4] ss:$8 sps:$4 sm:$0xff]   ;;  %v5851_v42 = vld [vmem:[#allocation5 + $0x120] ss:$8 sps:$4 sm:$0xff]  }
 0x143   :  { %v5821_v43 = vld [vmem:[#allocation5 + $0xc0] ss:$8 sps:$4 sm:$0xff]  }
 0x145   :  { %1187 = vmatpush2.bf16.msra.mxu0 %v5752_v44  ;;  %1226 = vmatpush2.bf16.msra.mxu1 %v5755_v45  ;;  %v5856_v44 = vld [vmem:[#allocation5 + $0x114] ss:$8 sps:$4 sm:$0xff]  }
 0x146   :  { %1188 = vmatprep.subr.bf16.mxu0 %v5760_v46  ;;  %1227 = vmatprep.subr.bf16.mxu1 %v5763_v47  ;;  %v5826_v45 = vld [vmem:[#allocation5 + $0xb4] ss:$8 sps:$4 sm:$0xff]   ;;  %v5854_v46 = vld [vmem:[#allocation5 + $0x110] ss:$8 sps:$4 sm:$0xff]  }
 0x147   :  { %v5824_v47 = vld [vmem:[#allocation5 + $0xb0] ss:$8 sps:$4 sm:$0xff]  }
 0x149   :  { %1189 = vmatpush2.bf16.msra.mxu0 %v5758_v48  ;;  %1228 = vmatpush2.bf16.msra.mxu1 %v5761_v50  ;;  %v5859_v48 = vld [vmem:[#allocation5 + $0x104] ss:$8 sps:$4 sm:$0xff]  }
 0x14a   :  { %1190 = vmatprep.subr.bf16.mxu0 %v5766_v51  ;;  %1229 = vmatprep.subr.bf16.mxu1 %v5769_v52  ;;  %v5829_v50 = vld [vmem:[#allocation5 + $0xa4] ss:$8 sps:$4 sm:$0xff]   ;;  %v5857_v51 = vld [vmem:[#allocation5 + $0x100] ss:$8 sps:$4 sm:$0xff]  }
 0x14b   :  { %v5827_v52 = vld [vmem:[#allocation5 + $0xa0] ss:$8 sps:$4 sm:$0xff]  }
 0x14d   :  { %1191 = vmatpush2.bf16.msra.mxu0 %v5764_v53  ;;  %1230 = vmatpush2.bf16.msra.mxu1 %v5767_v54  ;;  %v5862_v53 = vld [vmem:[#allocation5 + $0x1f4] ss:$8 sps:$4 sm:$0xff]  }
 0x14e   :  { %1192 = vmatprep.subr.bf16.mxu0 %v5772_v55  ;;  %1231 = vmatprep.subr.bf16.mxu1 %v5775_v56  ;;  %v5832_v54 = vld [vmem:[#allocation5 + $0x94] ss:$8 sps:$4 sm:$0xff]   ;;  %v5860_v55 = vld [vmem:[#allocation5 + $0x1f0] ss:$8 sps:$4 sm:$0xff]  }
 0x14f   :  { %v5830_v56 = vld [vmem:[#allocation5 + $0x90] ss:$8 sps:$4 sm:$0xff]  }
 0x151   :  { %1193 = vmatpush2.bf16.msra.mxu0 %v5770_v57  ;;  %1232 = vmatpush2.bf16.msra.mxu1 %v5773_v58  ;;  %v5865_v57 = vld [vmem:[#allocation5 + $0x1e4] ss:$8 sps:$4 sm:$0xff]  }
 0x152   :  { %1194 = vmatprep.subr.bf16.mxu0 %v5778_v59  ;;  %1233 = vmatprep.subr.bf16.mxu1 %v5781_v60  ;;  %v5835_v58 = vld [vmem:[#allocation5 + $0x84] ss:$8 sps:$4 sm:$0xff]   ;;  %v5863_v59 = vld [vmem:[#allocation5 + $0x1e0] ss:$8 sps:$4 sm:$0xff]  }
 0x153   :  { %v5833_v60 = vld [vmem:[#allocation5 + $0x80] ss:$8 sps:$4 sm:$0xff]  }
 0x155   :  { %1195 = vmatpush2.bf16.msra.mxu0 %v5776_v61  ;;  %1234 = vmatpush2.bf16.msra.mxu1 %v5779_v62  ;;  %v5868_v61 = vld [vmem:[#allocation5 + $0x1d4] ss:$8 sps:$4 sm:$0xff]   ;;  %v5866_v62 = vld [vmem:[#allocation5 + $0x1d0] ss:$8 sps:$4 sm:$0xff]  }
 0x156   :  { %1235 = vmatprep.subr.bf16.mxu1 %v5784_v63  ;;  %1674 = vmatprep.subr.bf16.mxu0 %v5790_v1  ;;  %v5871_v63 = vld [vmem:[#allocation5 + $0x1c4] ss:$8 sps:$4 sm:$0xff]   ;;  %v5869_v1 = vld [vmem:[#allocation5 + $0x1c0] ss:$8 sps:$4 sm:$0xff]  }
 0x158   :  { %1197 = vmatmul.mubr.bf16.vlgmr.msra.gmra.mxu0 %v6391_v49  ;;  %v5800_v49 = vld [vmem:[#allocation5 + $0x30] ss:$8 sps:$4 sm:$0xff]  }
 0x159   :  { %1236 = vmatpush2.bf16.msra.mxu1 %v5782_v2  ;;  %1675 = vmatpush1.bf16.msra.mxu0 %v5788_v3  ;;  %v5874_v2 = vld [vmem:[#allocation5 + $0x1b4] ss:$8 sps:$4 sm:$0xff]   ;;  %v5872_v3 = vld [vmem:[#allocation5 + $0x1b0] ss:$8 sps:$4 sm:$0xff]  }
 0x15a   :  { %1237 = vmatprep.subr.bf16.mxu1 %v5787_v5  ;;  %1676 = vmatprep.subr.bf16.mxu0 %v5793_v6  ;;  %v5877_v5 = vld [vmem:[#allocation5 + $0x1a4] ss:$8 sps:$4 sm:$0xff]   ;;  %v5875_v6 = vld [vmem:[#allocation5 + $0x1a0] ss:$8 sps:$4 sm:$0xff]  }
 0x15d   :  { %1238 = vmatpush2.bf16.msra.mxu1 %v5785_v7  ;;  %1677 = vmatpush1.bf16.msra.mxu0 %v5791_v8  ;;  %v5880_v7 = vld [vmem:[#allocation5 + $0x194] ss:$8 sps:$4 sm:$0xff]   ;;  %v5878_v8 = vld [vmem:[#allocation5 + $0x190] ss:$8 sps:$4 sm:$0xff]  }
 0x15e   :  { %1678 = vmatprep.subr.bf16.mxu0 %v5796_v9  ;;  %1717 = vmatprep.subr.bf16.mxu1 %v5838_v21  ;;  %v5883_v9 = vld [vmem:[#allocation5 + $0x184] ss:$8 sps:$4 sm:$0xff]  }
 0x160   :  { %1240 = vmatmul.mubr.bf16.vlgmr.msra.gmra.mxu1 %v6394_v4  ;;  %v5841_v4 = vld [vmem:[#allocation5 + $0x164] ss:$8 sps:$4 sm:$0xff]  }
 0x161   :  { %1679 = vmatpush1.bf16.msra.mxu0 %v5794_v10  ;;  %1718 = vmatpush1.bf16.msra.mxu1 %v5836_v23  ;;  %v5881_v10 = vld [vmem:[#allocation5 + $0x180] ss:$8 sps:$4 sm:$0xff]  }
 0x162   :  { %1680 = vmatprep.subr.bf16.mxu0 %v5799_v11  ;;  %1719 = vmatprep.subr.bf16.mxu1 %v5841_v4 }
 0x165   :  { %1681 = vmatpush1.bf16.msra.mxu0 %v5797_v12  ;;  %1720 = vmatpush1.bf16.msra.mxu1 %v5839_v25 }
 0x166   :  { %1682 = vmatprep.subr.bf16.mxu0 %v5802_v13  ;;  %1721 = vmatprep.subr.bf16.mxu1 %v5844_v27  ;;  %v416_v13 = vld [vmem:[%s6506_s4] sm:$0xf] }
 0x169   :  { %1683 = vmatpush1.bf16.msra.mxu0 %v5800_v49  ;;  %1722 = vmatpush1.bf16.msra.mxu1 %v5842_v30  ;;  %v425_v49 = vrot.slane %v416_v13, %v6373_v17 }
 0x16a   :  { %1684 = vmatprep.subr.bf16.mxu0 %v5805_v14  ;;  %1723 = vmatprep.subr.bf16.mxu1 %v5847_v32  ;;  %v421_v14 = vrot.slane %v416_v13, %v6376_v18 }
 0x16d   :  { %1685 = vmatpush1.bf16.msra.mxu0 %v5803_v15  ;;  %1724 = vmatpush1.bf16.msra.mxu1 %v5845_v34 }
 0x16e   :  { %1686 = vmatprep.subr.bf16.mxu0 %v5808_v19  ;;  %1725 = vmatprep.subr.bf16.mxu1 %v5850_v36 }
 0x171   :  { %1687 = vmatpush1.bf16.msra.mxu0 %v5806_v20  ;;  %1726 = vmatpush1.bf16.msra.mxu1 %v5848_v38 }
 0x172   :  { %1688 = vmatprep.subr.bf16.mxu0 %v5811_v22  ;;  %1727 = vmatprep.subr.bf16.mxu1 %v5853_v40 }
 0x175   :  { %1689 = vmatpush1.bf16.msra.mxu0 %v5809_v26  ;;  %1728 = vmatpush1.bf16.msra.mxu1 %v5851_v42 }
 0x176   :  { %1690 = vmatprep.subr.bf16.mxu0 %v5814_v29  ;;  %1729 = vmatprep.subr.bf16.mxu1 %v5856_v44 }
 0x179   :  { %1691 = vmatpush2.bf16.msra.mxu0 %v5812_v31  ;;  %1730 = vmatpush1.bf16.msra.mxu1 %v5854_v46  ;;  %v429_v46 = vrot.slane %v416_v13, %v6387_v28 }
 0x17a   :  { %1692 = vmatprep.subr.bf16.mxu0 %v5817_v33  ;;  %1731 = vmatprep.subr.bf16.mxu1 %v5859_v48 }
 0x17d   :  { %1693 = vmatpush2.bf16.msra.mxu0 %v5815_v35  ;;  %1732 = vmatpush1.bf16.msra.mxu1 %v5857_v51 }
 0x17e   :  { %1694 = vmatprep.subr.bf16.mxu0 %v5820_v37  ;;  %1733 = vmatprep.subr.bf16.mxu1 %v5862_v53 }
 0x181   :  { %1695 = vmatpush2.bf16.msra.mxu0 %v5818_v39  ;;  %1734 = vmatpush2.bf16.msra.mxu1 %v5860_v55 }
 0x182   :  { %1696 = vmatprep.subr.bf16.mxu0 %v5823_v41  ;;  %1735 = vmatprep.subr.bf16.mxu1 %v5865_v57 }
 0x185   :  { %1697 = vmatpush2.bf16.msra.mxu0 %v5821_v43  ;;  %1736 = vmatpush2.bf16.msra.mxu1 %v5863_v59 }
 0x186   :  { %1698 = vmatprep.subr.bf16.mxu0 %v5826_v45  ;;  %1737 = vmatprep.subr.bf16.mxu1 %v5868_v61  ;;  %v433_v45 = vrot.slane %v416_v13, %v6384_v24  ;;  %v2009_v13 = vld [vmem:[#allocation7 + $0x580] sm:$0xff] }
 0x189   :  { %1699 = vmatpush2.bf16.msra.mxu0 %v5824_v47  ;;  %1738 = vmatpush2.bf16.msra.mxu1 %v5866_v62 }
 0x18a   :  { %1700 = vmatprep.subr.bf16.mxu0 %v5829_v50  ;;  %1739 = vmatprep.subr.bf16.mxu1 %v5871_v63 }
 0x18d   :  { %1701 = vmatpush2.bf16.msra.mxu0 %v5827_v52  ;;  %1740 = vmatpush2.bf16.msra.mxu1 %v5869_v1 }
 0x18e   :  { %1702 = vmatprep.subr.bf16.mxu0 %v5832_v54  ;;  %1741 = vmatprep.subr.bf16.mxu1 %v5874_v2 }
 0x191   :  { %1703 = vmatpush2.bf16.msra.mxu0 %v5830_v56  ;;  %1742 = vmatpush2.bf16.msra.mxu1 %v5872_v3 }
 0x192   :  { %1704 = vmatprep.subr.bf16.mxu0 %v5835_v58  ;;  %1743 = vmatprep.subr.bf16.mxu1 %v5877_v5 }
 0x195   :  { %1705 = vmatpush2.bf16.msra.mxu0 %v5833_v60  ;;  %1744 = vmatpush2.bf16.msra.mxu1 %v5875_v6 }
 0x196   :  { %1745 = vmatprep.subr.bf16.mxu1 %v5880_v7 }
 0x199   :  { %1746 = vmatpush2.bf16.msra.mxu1 %v5878_v8 }
 0x19a   :  { %1747 = vmatprep.subr.bf16.mxu1 %v5883_v9  ;;  %v2017_v9 = vld [vmem:[#allocation7 + $0x5c0] sm:$0xff] }
 0x19d   :  { %1748 = vmatpush2.bf16.msra.mxu1 %v5881_v10  ;;  %v2021_v10 = vld [vmem:[#allocation7 + $0x5e0] sm:$0xff] }
 0x1d8   :  { %v1112_v11 = vpop.f32.mrf.mxu0 }
 0x1d9   :  { %v1113_v21 = vadd.f32 %v1112_v11, %v421_v14  ;;  %v5208_v11 = vcombine.low %v2017_v9, %v2021_v10 }
 0x1da   :  { %v1114_v12 = vpop.f32.mrf.mxu0 }
 0x1db   :  { %v1115_v20 = vadd.f32 %v1114_v12, %v425_v49  ;;  %v5209_v12 = vcombine.high %v2017_v9, %v2021_v10 }
 0x1dc   :  { %v1116_v15 = vpop.f32.mrf.mxu0 }
 0x1dd   :  { %v1117_v4 = vadd.f32 %v1116_v15, %v421_v14  ;;  %2729 = vmatprep.subr.bf16.mxu1 %v5209_v12 }
 0x1de   :  { %v1118_v22 = vpop.f32.mrf.mxu0 }
 0x1df   :  { %v1119_v29 = vadd.f32 %v1118_v22, %v425_v49  ;;  %v2013_v49 = vld [vmem:[#allocation7 + $0x5a0] sm:$0xff] }
 0x1e0   :  { %v1155_v19 = vpop.f32.mrf.mxu1  ;;  %v5201_v14 = vcombine.high %v2009_v13, %v2013_v49  ;;  %v5200_v15 = vcombine.low %v2009_v13, %v2013_v49 }
 0x1e1   :  { %v1156_v26 = vadd.f32 %v1155_v19, %v1113_v21  ;;  %v2001_v19 = vld [vmem:[#allocation7 + $0x540] sm:$0xff] }
 0x1e2   :  { %v1157_v23 = vpop.f32.mrf.mxu1 }
 0x1e3   :  { %v1158_v25 = vadd.f32 %v1157_v23, %v1115_v20  ;;  %v1258_v35 = vmul.f32 0.2, %v1156_v26  ;;  %vm1250_vm12 = vcmp.ge.f32.partialorder %v1156_v26, 0.0  ;;  %v2005_v20 = vld [vmem:[#allocation7 + $0x560] sm:$0xff] }
 0x1e4   :  { %v1159_v27 = vpop.f32.mrf.mxu1  ;;  %v5193_v21 = vcombine.high %v2001_v19, %v2005_v20  ;;  %v5192_v22 = vcombine.low %v2001_v19, %v2005_v20  ;;  %v1993_v23 = vld [vmem:[#allocation7 + $0x500] sm:$0xff] }
 0x1e5   :  { %v1160_v30 = vadd.f32 %v1159_v27, %v1117_v4  ;;  %v1259_v32 = vmul.f32 0.2, %v1158_v25  ;;  %vm1251_vm11 = vcmp.ge.f32.partialorder %v1158_v25, 0.0  ;;  %v1266_v40 = vsel %vm1250_vm12, %v1156_v26, %v1258_v35  ;;  %v1997_v4 = vld [vmem:[#allocation7 + $0x520] sm:$0xff] }
 0x1e6   :  { %v1161_v31 = vpop.f32.mrf.mxu1  ;;  %v5184_v26 = vcombine.low %v1993_v23, %v1997_v4  ;;  %v1985_v27 = vld [vmem:[#allocation7 + $0x4c0] sm:$0xff] }
 0x1e7   :  { %vm1254_vm10 = vcmp.ge.f32.partialorder %v1160_v30, 0.0  ;;  %v1262_v33 = vmul.f32 0.2, %v1160_v30  ;;  %v1162_v34 = vadd.f32 %v1161_v31, %v1119_v29  ;;  %v1267_v38 = vsel %vm1251_vm11, %v1158_v25, %v1259_v32  ;;  %v1989_v29 = vld [vmem:[#allocation7 + $0x4e0] sm:$0xff] }
 0x1e8   :  { %v5185_v25 = vcombine.high %v1993_v23, %v1997_v4  ;;  %v5176_v31 = vcombine.low %v1985_v27, %v1989_v29  ;;  %v1977_v32 = vld [vmem:[#allocation7 + $0x480] sm:$0xff] }
 0x1e9   :  { %vm1255_vm13 = vcmp.ge.f32.partialorder %v1162_v34, 0.0  ;;  %v1263_v36 = vmul.f32 0.2, %v1162_v34  ;;  %v1270_v37 = vsel %vm1254_vm10, %v1160_v30, %v1262_v33  ;;  %v5177_v30 = vcombine.high %v1985_v27, %v1989_v29  ;;  %v1981_v33 = vld [vmem:[#allocation7 + $0x4a0] sm:$0xff] }
 0x1ea   :  { %v1274_v42 = vpack.c.bf16 %v1270_v37, %v1266_v40  ;;  %v5168_v35 = vcombine.low %v1977_v32, %v1981_v33  ;;  %v1973_v37 = vld [vmem:[#allocation7 + $0x460] sm:$0xff] }
 0x1eb   :  { %v1271_v39 = vsel %vm1255_vm13, %v1162_v34, %v1263_v36  ;;  %v5169_v34 = vcombine.high %v1977_v32, %v1981_v33  ;;  %v1969_v36 = vld [vmem:[#allocation7 + $0x440] sm:$0xff]  ;;  %v2018_v32 = vld [vmem:[#allocation7 + $0x5c8] sm:$0xff] }
 0x1ec   :  { %v1275_v41 = vpack.c.bf16 %v1271_v39, %v1267_v38  ;;  %v5161_v38 = vcombine.high %v1969_v36, %v1973_v37  ;;  %v5160_v39 = vcombine.low %v1969_v36, %v1973_v37  ;;  %v1961_v40 = vld [vmem:[#allocation7 + $0x400] sm:$0xff]  ;;  %v2022_v33 = vld [vmem:[#allocation7 + $0x5e8] sm:$0xff] }
 0x1ee   :  { %1706 = vmatprep.mubr.bf16.mxu0 %v1275_v41  ;;  %v1965_v41 = vld [vmem:[#allocation7 + $0x420] sm:$0xff] }
 0x1ef   :  { %1707 = vmatmul.mubr.bf16.vlgmr.msra.gmra.mxu0 %v1274_v42  ;;  %v5153_v42 = vcombine.high %v1961_v40, %v1965_v41 }
 0x1f0   :  { %1817 = vmatprep.mubr.bf16.mxu0 %v6256_v0 }
 0x218   :  { %v1198_v43 = vpop.f32.mrf.mxu0 }
 0x219   :  { %v1199_v51 = vadd.f32 %v1198_v43, %v429_v46  ;;  %v5152_v43 = vcombine.low %v1961_v40, %v1965_v41  ;;  %v2010_v41 = vld [vmem:[#allocation7 + $0x588] sm:$0xff] }
 0x21a   :  { %v1200_v44 = vpop.f32.mrf.mxu0 }
 0x21b   :  { %v1201_v50 = vadd.f32 %v1200_v44, %v433_v45  ;;  %v2081_v44 = vld [vmem:[#allocation7 + $0x7c0] sm:$0xff] }
 0x21c   :  { %v1202_v47 = vpop.f32.mrf.mxu0 }
 0x21d   :  { %v1203_v54 = vadd.f32 %v1202_v47, %v429_v46 }
 0x21e   :  { %v1204_v52 = vpop.f32.mrf.mxu0 }
 0x21f   :  { %v1205_v58 = vadd.f32 %v1204_v52, %v433_v45  ;;  %v2085_v45 = vld [vmem:[#allocation7 + $0x7e0] sm:$0xff] }
 0x220   :  { %v1241_v48 = vpop.f32.mrf.mxu1  ;;  %v5273_v46 = vcombine.high %v2081_v44, %v2085_v45  ;;  %v5272_v47 = vcombine.low %v2081_v44, %v2085_v45  ;;  %v5210_v44 = vcombine.low %v2018_v32, %v2022_v33 }
 0x221   :  { %v1242_v56 = vadd.f32 %v1241_v48, %v1199_v51  ;;  %v2073_v48 = vld [vmem:[#allocation7 + $0x780] sm:$0xff] }
 0x222   :  { %v1243_v53 = vpop.f32.mrf.mxu1 }
 0x223   :  { %v1244_v55 = vadd.f32 %v1243_v53, %v1201_v50  ;;  %v1260_v63 = vmul.f32 0.2, %v1242_v56  ;;  %vm1252_vm0 = vcmp.ge.f32.partialorder %v1242_v56, 0.0  ;;  %v2077_v50 = vld [vmem:[#allocation7 + $0x7a0] sm:$0xff] }
 0x224   :  { %v1245_v57 = vpop.f32.mrf.mxu1  ;;  %v5265_v51 = vcombine.high %v2073_v48, %v2077_v50  ;;  %v5264_v52 = vcombine.low %v2073_v48, %v2077_v50  ;;  %v2065_v53 = vld [vmem:[#allocation7 + $0x740] sm:$0xff] }
 0x225   :  { %v1246_v59 = vadd.f32 %v1245_v57, %v1203_v54  ;;  %v1261_v0 = vmul.f32 0.2, %v1244_v55  ;;  %vm1253_vm15 = vcmp.ge.f32.partialorder %v1244_v55, 0.0  ;;  %v1268_v6 = vsel %vm1252_vm0, %v1242_v56, %v1260_v63  ;;  %v2069_v54 = vld [vmem:[#allocation7 + $0x760] sm:$0xff] }
 0x226   :  { %v1247_v60 = vpop.f32.mrf.mxu1  ;;  %v5256_v56 = vcombine.low %v2065_v53, %v2069_v54  ;;  %v2057_v57 = vld [vmem:[#allocation7 + $0x700] sm:$0xff] }
 0x227   :  { %vm1256_vm14 = vcmp.ge.f32.partialorder %v1246_v59, 0.0  ;;  %v1264_v61 = vmul.f32 0.2, %v1246_v59  ;;  %v1248_v62 = vadd.f32 %v1247_v60, %v1205_v58  ;;  %v1269_v3 = vsel %vm1253_vm15, %v1244_v55, %v1261_v0  ;;  %v2061_v58 = vld [vmem:[#allocation7 + $0x720] sm:$0xff] }
 0x228   :  { %v5257_v55 = vcombine.high %v2065_v53, %v2069_v54  ;;  %v5248_v60 = vcombine.low %v2057_v57, %v2061_v58  ;;  %v2049_v0 = vld [vmem:[#allocation7 + $0x6c0] sm:$0xff] }
 0x229   :  { %vm1257_vm1 = vcmp.ge.f32.partialorder %v1248_v62, 0.0  ;;  %v1265_v1 = vmul.f32 0.2, %v1248_v62  ;;  %v1272_v2 = vsel %vm1256_vm14, %v1246_v59, %v1264_v61  ;;  %v5249_v59 = vcombine.high %v2057_v57, %v2061_v58  ;;  %v2053_v61 = vld [vmem:[#allocation7 + $0x6e0] sm:$0xff] }
 0x22a   :  { %v1276_v8 = vpack.c.bf16 %v1272_v2, %v1268_v6  ;;  %v5240_v63 = vcombine.low %v2049_v0, %v2053_v61  ;;  %v2045_v2 = vld [vmem:[#allocation7 + $0x6a0] sm:$0xff] }
 0x22b   :  { %v1273_v5 = vsel %vm1257_vm1, %v1248_v62, %v1265_v1  ;;  %v5241_v62 = vcombine.high %v2049_v0, %v2053_v61  ;;  %v2041_v1 = vld [vmem:[#allocation7 + $0x680] sm:$0xff] }
 0x22c   :  { %v1277_v7 = vpack.c.bf16 %v1273_v5, %v1269_v3  ;;  %v5233_v3 = vcombine.high %v2041_v1, %v2045_v2  ;;  %v5232_v5 = vcombine.low %v2041_v1, %v2045_v2 }
 0x22e   :  { %1749 = vmatprep.mubr.bf16.mxu1 %v1277_v7 }
 0x22f   :  { %1750 = vmatmul.mubr.bf16.vlgmr.msra.gmra.mxu1 %v1276_v8  ;;  %v1342_v8 = vld [vmem:[%s6508_s6] sm:$0x3] }
 0x230   :  { %2730 = vmatpush1.bf16.msra.mxu1 %v5208_v11  ;;  %v1351_v9 = vrot.slane %v1342_v8, %v6373_v17  ;;  %v1347_v10 = vrot.slane %v1342_v8, %v6376_v18  ;;  %v2082_v8 = vld [vmem:[#allocation7 + $0x7c8] sm:$0xff] }
 0x231   :  { %2731 = vmatprep.subr.bf16.mxu1 %v5201_v14 }
 0x234   :  { %2732 = vmatpush1.bf16.msra.mxu1 %v5200_v15 }
 0x235   :  { %2733 = vmatprep.subr.bf16.mxu1 %v5193_v21 }
 0x238   :  { %2734 = vmatpush1.bf16.msra.mxu1 %v5192_v22 }
 0x239   :  { %2735 = vmatprep.subr.bf16.mxu1 %v5185_v25 }
 0x23c   :  { %2736 = vmatpush1.bf16.msra.mxu1 %v5184_v26 }
 0x23d   :  { %2737 = vmatprep.subr.bf16.mxu1 %v5177_v30 }
 0x240   :  { %2738 = vmatpush1.bf16.msra.mxu1 %v5176_v31 }
 0x241   :  { %2739 = vmatprep.subr.bf16.mxu1 %v5169_v34 }
 0x244   :  { %2740 = vmatpush1.bf16.msra.mxu1 %v5168_v35 }
 0x245   :  { %2741 = vmatprep.subr.bf16.mxu1 %v5161_v38 }
 0x248   :  { %2742 = vmatpush1.bf16.msra.mxu1 %v5160_v39  ;;  %v5211_v39 = vcombine.high %v2018_v32, %v2022_v33  ;;  %v2046_v32 = vld [vmem:[#allocation7 + $0x6a8] sm:$0xff] }
 0x249   :  { %2743 = vmatprep.subr.bf16.mxu1 %v5153_v42  ;;  %v2014_v42 = vld [vmem:[#allocation7 + $0x5a8] sm:$0xff] }
 0x24a   :  { %v5203_v45 = vcombine.high %v2010_v41, %v2014_v42  ;;  %v5202_v48 = vcombine.low %v2010_v41, %v2014_v42 }
 0x24c   :  { %2744 = vmatpush1.bf16.msra.mxu1 %v5152_v43  ;;  %v5884_v43 = vld [vmem:[%s6509_s7] sm:$0xff]  }
 0x24d   :  { %2745 = vmatprep.subr.bf16.mxu1 %v5273_v46  ;;  %v2002_v46 = vld [vmem:[#allocation7 + $0x548] sm:$0xff] }
 0x250   :  { %2746 = vmatpush2.bf16.msra.mxu1 %v5272_v47  ;;  %v2006_v47 = vld [vmem:[#allocation7 + $0x568] sm:$0xff] }
 0x251   :  { %2747 = vmatprep.subr.bf16.mxu1 %v5265_v51  ;;  %v5195_v50 = vcombine.high %v2002_v46, %v2006_v47  ;;  %v1994_v51 = vld [vmem:[#allocation7 + $0x508] sm:$0xff]  ;;  %v5194_v53 = vcombine.low %v2002_v46, %v2006_v47 }
 0x252   :  { %v2026_v46 = vld [vmem:[#allocation7 + $0x608] sm:$0xff] }
 0x254   :  { %2748 = vmatpush2.bf16.msra.mxu1 %v5264_v52  ;;  %v1998_v52 = vld [vmem:[#allocation7 + $0x528] sm:$0xff] }
 0x255   :  { %2749 = vmatprep.subr.bf16.mxu1 %v5257_v55  ;;  %v5187_v54 = vcombine.high %v1994_v51, %v1998_v52  ;;  %v1986_v55 = vld [vmem:[#allocation7 + $0x4c8] sm:$0xff]  ;;  %v5186_v57 = vcombine.low %v1994_v51, %v1998_v52 }
 0x258   :  { %2750 = vmatpush2.bf16.msra.mxu1 %v5256_v56  ;;  %v1990_v56 = vld [vmem:[#allocation7 + $0x4e8] sm:$0xff] }
 0x259   :  { %2751 = vmatprep.subr.bf16.mxu1 %v5249_v59  ;;  %v5179_v58 = vcombine.high %v1986_v55, %v1990_v56  ;;  %v1978_v59 = vld [vmem:[#allocation7 + $0x488] sm:$0xff]  ;;  %v5178_v0 = vcombine.low %v1986_v55, %v1990_v56  ;;  %v2020_v55 = vld [vmem:[#allocation7 + $0x5d8] sm:$0xff] }
 0x25c   :  { %2752 = vmatpush2.bf16.msra.mxu1 %v5248_v60  ;;  %v1982_v60 = vld [vmem:[#allocation7 + $0x4a8] sm:$0xff] }
 0x25d   :  { %2753 = vmatprep.subr.bf16.mxu1 %v5241_v62  ;;  %v5171_v61 = vcombine.high %v1978_v59, %v1982_v60  ;;  %v1970_v62 = vld [vmem:[#allocation7 + $0x448] sm:$0xff]  ;;  %v5170_v1 = vcombine.low %v1978_v59, %v1982_v60 }
 0x260   :  { %2754 = vmatpush2.bf16.msra.mxu1 %v5240_v63  ;;  %v1974_v63 = vld [vmem:[#allocation7 + $0x468] sm:$0xff] }
 0x261   :  { %2755 = vmatprep.subr.bf16.mxu1 %v5233_v3  ;;  %v5163_v2 = vcombine.high %v1970_v62, %v1974_v63  ;;  %v1962_v3 = vld [vmem:[#allocation7 + $0x408] sm:$0xff] }
 0x264   :  { %2756 = vmatpush2.bf16.msra.mxu1 %v5232_v5  ;;  %v1966_v5 = vld [vmem:[#allocation7 + $0x428] sm:$0xff] }
 0x2af   :  { %v1708_v6 = vpop.f32.mrf.mxu0 }
 0x2b0   :  { %v1709_v49 = vadd.f32 %v1708_v6, %v1347_v10  ;;  %v5162_v6 = vcombine.low %v1970_v62, %v1974_v63  ;;  %v2011_v63 = vld [vmem:[#allocation7 + $0x590] sm:$0xff] }
 0x2b1   :  { %v1710_v7 = vpop.f32.mrf.mxu0 }
 0x2b2   :  { %v1711_v13 = vadd.f32 %v1710_v7, %v1351_v9  ;;  %v5155_v7 = vcombine.high %v1962_v3, %v1966_v5 }
 0x2b3   :  { %v1712_v11 = vpop.f32.mrf.mxu0 }
 0x2b4   :  { %v1713_v19 = vadd.f32 %v1712_v11, %v1347_v10  ;;  %v5154_v10 = vcombine.low %v1962_v3, %v1966_v5  ;;  %v2012_v3 = vld [vmem:[#allocation7 + $0x598] sm:$0xff] }
 0x2b5   :  { %v1714_v14 = vpop.f32.mrf.mxu0  ;;  %v2016_v5 = vld [vmem:[#allocation7 + $0x5b8] sm:$0xff] }
 0x2b6   :  { %v1715_v23 = vadd.f32 %v1714_v14, %v1351_v9  ;;  %v2086_v9 = vld [vmem:[#allocation7 + $0x7e8] sm:$0xff] }
 0x2b7   :  { %v5275_v11 = vcombine.high %v2082_v8, %v2086_v9 }
 0x2ef   :  { %v1751_v12 = vpop.f32.mrf.mxu1 }
 0x2f0   :  { %v1752_v21 = vadd.f32 %v1751_v12, %v1709_v49  ;;  %v2074_v12 = vld [vmem:[#allocation7 + $0x788] sm:$0xff]  ;;  %v5274_v49 = vcombine.low %v2082_v8, %v2086_v9  ;;  %v2003_v8 = vld [vmem:[#allocation7 + $0x550] sm:$0xff] }
 0x2f1   :  { %v1753_v15 = vpop.f32.mrf.mxu1 }
 0x2f2   :  { %v1754_v20 = vadd.f32 %v1753_v15, %v1711_v13  ;;  %v1764_v30 = vmul.f32 0.2, %v1752_v21  ;;  %vm1760_vm4 = vcmp.ge.f32.partialorder %v1752_v21, 0.0  ;;  %v2078_v13 = vld [vmem:[#allocation7 + $0x7a8] sm:$0xff] }
 0x2f3   :  { %v1755_v22 = vpop.f32.mrf.mxu1  ;;  %v5267_v14 = vcombine.high %v2074_v12, %v2078_v13  ;;  %v2066_v15 = vld [vmem:[#allocation7 + $0x748] sm:$0xff] }
 0x2f4   :  { %v1756_v4 = vadd.f32 %v1755_v22, %v1713_v19  ;;  %v1765_v26 = vmul.f32 0.2, %v1754_v20  ;;  %vm1761_vm3 = vcmp.ge.f32.partialorder %v1754_v20, 0.0  ;;  %v1768_v37 = vsel %vm1760_vm4, %v1752_v21, %v1764_v30  ;;  %v2070_v19 = vld [vmem:[#allocation7 + $0x768] sm:$0xff] }
 0x2f5   :  { %v1757_v25 = vpop.f32.mrf.mxu1  ;;  %v5259_v21 = vcombine.high %v2066_v15, %v2070_v19  ;;  %v2058_v22 = vld [vmem:[#allocation7 + $0x708] sm:$0xff] }
 0x2f6   :  { %vm1762_vm2 = vcmp.ge.f32.partialorder %v1756_v4, 0.0  ;;  %v1766_v27 = vmul.f32 0.2, %v1756_v4  ;;  %v1758_v29 = vadd.f32 %v1757_v25, %v1715_v23  ;;  %v1769_v35 = vsel %vm1761_vm3, %v1754_v20, %v1765_v26  ;;  %v2062_v23 = vld [vmem:[#allocation7 + $0x728] sm:$0xff] }
 0x2f7   :  { %v5266_v20 = vcombine.low %v2074_v12, %v2078_v13  ;;  %v5251_v25 = vcombine.high %v2058_v22, %v2062_v23  ;;  %v2050_v26 = vld [vmem:[#allocation7 + $0x6c8] sm:$0xff]  ;;  %v2004_v12 = vld [vmem:[#allocation7 + $0x558] sm:$0xff] }
 0x2f8   :  { %vm1763_vm5 = vcmp.ge.f32.partialorder %v1758_v29, 0.0  ;;  %v1767_v31 = vmul.f32 0.2, %v1758_v29  ;;  %v1770_v34 = vsel %vm1762_vm2, %v1756_v4, %v1766_v27  ;;  %v5258_v4 = vcombine.low %v2066_v15, %v2070_v19  ;;  %v2054_v27 = vld [vmem:[#allocation7 + $0x6e8] sm:$0xff]  ;;  %v2008_v13 = vld [vmem:[#allocation7 + $0x578] sm:$0xff] }
 0x2f9   :  { %v1774_v40 = vpack.c.bf16 %v1770_v34, %v1768_v37  ;;  %v5243_v30 = vcombine.high %v2050_v26, %v2054_v27  ;;  %v5242_v33 = vcombine.low %v2050_v26, %v2054_v27  ;;  %v2037_v37 = vld [vmem:[#allocation7 + $0x660] sm:$0xff]  ;;  %v5199_v19 = vcombine.high %v2004_v12, %v2008_v13 }
 0x2fa   :  { %v1771_v36 = vsel %vm1763_vm5, %v1758_v29, %v1767_v31  ;;  %v5250_v29 = vcombine.low %v2058_v22, %v2062_v23  ;;  %v2042_v31 = vld [vmem:[#allocation7 + $0x688] sm:$0xff]  ;;  %v1996_v22 = vld [vmem:[#allocation7 + $0x518] sm:$0xff] }
 0x2fb   :  { %v1775_v38 = vpack.c.bf16 %v1771_v36, %v1769_v35  ;;  %v5235_v34 = vcombine.high %v2042_v31, %v2046_v32  ;;  %v5234_v35 = vcombine.low %v2042_v31, %v2046_v32  ;;  %v2033_v36 = vld [vmem:[#allocation7 + $0x640] sm:$0xff]  ;;  %v2000_v23 = vld [vmem:[#allocation7 + $0x538] sm:$0xff] }
 0x2fc   :  { %v5224_v41 = vcombine.low %v2033_v36, %v2037_v37  ;;  %v5191_v27 = vcombine.high %v1996_v22, %v2000_v23  ;;  %v1988_v31 = vld [vmem:[#allocation7 + $0x4d8] sm:$0xff] }
 0x2fd   :  { %1799 = vmatprep.subr.bf16.mxu0 %v1775_v38  ;;  %v2034_v38 = vld [vmem:[#allocation7 + $0x648] sm:$0xff]  ;;  %v1992_v32 = vld [vmem:[#allocation7 + $0x4f8] sm:$0xff] }
 0x2fe   :  { %1800 = vmatpush1.bf16.msra.mxu0 %v1774_v40  ;;  %v2038_v40 = vld [vmem:[#allocation7 + $0x668] sm:$0xff] }
 0x2ff   :  { %2770 = vmatprep.subr.bf16.mxu0 %v5211_v39  ;;  %v5225_v39 = vcombine.high %v2033_v36, %v2037_v37  ;;  %v5226_v42 = vcombine.low %v2034_v38, %v2038_v40  ;;  %v5183_v36 = vcombine.high %v1988_v31, %v1992_v32  ;;  %v1979_v37 = vld [vmem:[#allocation7 + $0x490] sm:$0xff] }
 0x301   :  { %5151 = vmatmul.mubr.msk.bf16.vlgmr.msra.gmra.mxu0 %vm1781_vm6, %v5884_v43  ;;  %v5227_v43 = vcombine.high %v2034_v38, %v2038_v40  ;;  %2757 = vmatprep.subr.bf16.mxu1 %v5225_v39  ;;  %v1983_v38 = vld [vmem:[#allocation7 + $0x4b0] sm:$0xff]  ;;  %v1980_v39 = vld [vmem:[#allocation7 + $0x498] sm:$0xff] }
 0x302   :  { %2771 = vmatpush1.bf16.msra.mxu0 %v5210_v44  ;;  %2758 = vmatpush2.bf16.msra.mxu1 %v5224_v41  ;;  %v2025_v44 = vld [vmem:[#allocation7 + $0x600] sm:$0xff]  ;;  %v1984_v40 = vld [vmem:[#allocation7 + $0x4b8] sm:$0xff] }
 0x303   :  { %2772 = vmatprep.subr.bf16.mxu0 %v5203_v45  ;;  %v2029_v45 = vld [vmem:[#allocation7 + $0x620] sm:$0xff] }
 0x304   :  { %v5217_v47 = vcombine.high %v2025_v44, %v2029_v45 }
 0x306   :  { %2773 = vmatpush1.bf16.msra.mxu0 %v5202_v48  ;;  %v2030_v48 = vld [vmem:[#allocation7 + $0x628] sm:$0xff]  ;;  %2759 = vmatprep.subr.bf16.mxu1 %v5217_v47  ;;  %v1972_v47 = vld [vmem:[#allocation7 + $0x458] sm:$0xff] }
 0x307   :  { %2774 = vmatprep.subr.bf16.mxu0 %v5195_v50  ;;  %v5216_v50 = vcombine.low %v2025_v44, %v2029_v45  ;;  %v5218_v51 = vcombine.low %v2026_v46, %v2030_v48  ;;  %v5219_v52 = vcombine.high %v2026_v46, %v2030_v48  ;;  %v5175_v44 = vcombine.high %v1980_v39, %v1984_v40  ;;  %v1971_v45 = vld [vmem:[#allocation7 + $0x450] sm:$0xff]  ;;  %v1976_v48 = vld [vmem:[#allocation7 + $0x478] sm:$0xff] }
 0x308   :  { %v1975_v46 = vld [vmem:[#allocation7 + $0x470] sm:$0xff] }
 0x309   :  { %2760 = vmatpush2.bf16.msra.mxu1 %v5216_v50  ;;  %v5172_v50 = vcombine.low %v1979_v37, %v1983_v38 }
 0x30a   :  { %2775 = vmatpush1.bf16.msra.mxu0 %v5194_v53  ;;  %v2019_v53 = vld [vmem:[#allocation7 + $0x5d0] sm:$0xff] }
 0x30b   :  { %2776 = vmatprep.subr.bf16.mxu0 %v5187_v54  ;;  %v2023_v54 = vld [vmem:[#allocation7 + $0x5f0] sm:$0xff] }
 0x30c   :  { %v5213_v56 = vcombine.high %v2019_v53, %v2023_v54 }
 0x30e   :  { %2777 = vmatpush1.bf16.msra.mxu0 %v5186_v57  ;;  %v2024_v57 = vld [vmem:[#allocation7 + $0x5f8] sm:$0xff]  ;;  %2811 = vmatprep.subr.bf16.mxu1 %v5213_v56 }
 0x30f   :  { %2778 = vmatprep.subr.bf16.mxu0 %v5179_v58  ;;  %v5212_v58 = vcombine.low %v2019_v53, %v2023_v54  ;;  %v5214_v59 = vcombine.low %v2020_v55, %v2024_v57  ;;  %v5215_v60 = vcombine.high %v2020_v55, %v2024_v57  ;;  %v5167_v53 = vcombine.high %v1972_v47, %v1976_v48  ;;  %v1963_v54 = vld [vmem:[#allocation7 + $0x410] sm:$0xff]  ;;  %v1964_v56 = vld [vmem:[#allocation7 + $0x418] sm:$0xff] }
 0x310   :  { %v1967_v55 = vld [vmem:[#allocation7 + $0x430] sm:$0xff]  ;;  %v1968_v57 = vld [vmem:[#allocation7 + $0x438] sm:$0xff] }
 0x312   :  { %2779 = vmatpush1.bf16.msra.mxu0 %v5178_v0 }
 0x313   :  { %2780 = vmatprep.subr.bf16.mxu0 %v5171_v61 }
 0x316   :  { %2781 = vmatpush1.bf16.msra.mxu0 %v5170_v1 }
 0x317   :  { %2782 = vmatprep.subr.bf16.mxu0 %v5163_v2  ;;  %v2015_v2 = vld [vmem:[#allocation7 + $0x5b0] sm:$0xff] }
 0x318   :  { %v5205_v9 = vcombine.high %v2011_v63, %v2015_v2 }
 0x31a   :  { %2783 = vmatpush1.bf16.msra.mxu0 %v5162_v6 }
 0x31b   :  { %2784 = vmatprep.subr.bf16.mxu0 %v5155_v7 }
 0x31e   :  { %2785 = vmatpush1.bf16.msra.mxu0 %v5154_v10  ;;  %v5207_v10 = vcombine.high %v2012_v3, %v2016_v5 }
 0x31f   :  { %2786 = vmatprep.subr.bf16.mxu0 %v5275_v11  ;;  %v2007_v11 = vld [vmem:[#allocation7 + $0x570] sm:$0xff] }
 0x320   :  { %v5197_v15 = vcombine.high %v2003_v8, %v2007_v11 }
 0x322   :  { %2787 = vmatpush2.bf16.msra.mxu0 %v5274_v49  ;;  %v5204_v49 = vcombine.low %v2011_v63, %v2015_v2  ;;  %v2083_v63 = vld [vmem:[#allocation7 + $0x7d0] sm:$0xff]  ;;  %v2084_v2 = vld [vmem:[#allocation7 + $0x7d8] sm:$0xff] }
 0x323   :  { %2788 = vmatprep.subr.bf16.mxu0 %v5267_v14  ;;  %v5206_v14 = vcombine.low %v2012_v3, %v2016_v5  ;;  %v2088_v3 = vld [vmem:[#allocation7 + $0x7f8] sm:$0xff]  ;;  %v5156_v5 = vcombine.low %v1963_v54, %v1967_v55 }
 0x326   :  { %2789 = vmatpush2.bf16.msra.mxu0 %v5266_v20  ;;  %v1995_v20 = vld [vmem:[#allocation7 + $0x510] sm:$0xff] }
 0x327   :  { %2790 = vmatprep.subr.bf16.mxu0 %v5259_v21  ;;  %v1999_v21 = vld [vmem:[#allocation7 + $0x530] sm:$0xff] }
 0x328   :  { %v5189_v26 = vcombine.high %v1995_v20, %v1999_v21 }
 0x32a   :  { %2791 = vmatpush2.bf16.msra.mxu0 %v5258_v4  ;;  %v5196_v4 = vcombine.low %v2003_v8, %v2007_v11  ;;  %v2079_v11 = vld [vmem:[#allocation7 + $0x7b0] sm:$0xff] }
 0x32b   :  { %2792 = vmatprep.subr.bf16.mxu0 %v5251_v25  ;;  %v5198_v25 = vcombine.low %v2004_v12, %v2008_v13  ;;  %v2076_v12 = vld [vmem:[#allocation7 + $0x798] sm:$0xff] }
 0x32c   :  { %v2080_v13 = vld [vmem:[#allocation7 + $0x7b8] sm:$0xff] }
 0x32e   :  { %2793 = vmatpush2.bf16.msra.mxu0 %v5250_v29  ;;  %v1987_v29 = vld [vmem:[#allocation7 + $0x4d0] sm:$0xff] }
 0x32f   :  { %2794 = vmatprep.subr.bf16.mxu0 %v5243_v30  ;;  %v1991_v30 = vld [vmem:[#allocation7 + $0x4f0] sm:$0xff] }
 0x330   :  { %v5180_v41 = vcombine.low %v1987_v29, %v1991_v30 }
 0x332   :  { %2795 = vmatpush2.bf16.msra.mxu0 %v5242_v33  ;;  %v5188_v33 = vcombine.low %v1995_v20, %v1999_v21  ;;  %v2067_v20 = vld [vmem:[#allocation7 + $0x750] sm:$0xff] }
 0x333   :  { %2796 = vmatprep.subr.bf16.mxu0 %v5235_v34  ;;  %v5190_v34 = vcombine.low %v1996_v22, %v2000_v23  ;;  %v2071_v21 = vld [vmem:[#allocation7 + $0x770] sm:$0xff]  ;;  %v2068_v22 = vld [vmem:[#allocation7 + $0x758] sm:$0xff] }
 0x334   :  { %v2072_v23 = vld [vmem:[#allocation7 + $0x778] sm:$0xff] }
 0x336   :  { %2797 = vmatpush2.bf16.msra.mxu0 %v5234_v35  ;;  %v5181_v35 = vcombine.high %v1987_v29, %v1991_v30  ;;  %v2059_v29 = vld [vmem:[#allocation7 + $0x710] sm:$0xff] }
 0x337   :  { %2798 = vmatprep.subr.bf16.mxu0 %v5227_v43  ;;  %v5173_v43 = vcombine.high %v1979_v37, %v1983_v38  ;;  %v2063_v30 = vld [vmem:[#allocation7 + $0x730] sm:$0xff] }
 0x338   :  { %v2051_v37 = vld [vmem:[#allocation7 + $0x6d0] sm:$0xff] }
 0x339   :  { %v2055_v38 = vld [vmem:[#allocation7 + $0x6f0] sm:$0xff] }
 0x33a   :  { %2799 = vmatpush2.bf16.msra.mxu0 %v5226_v42  ;;  %v5182_v42 = vcombine.low %v1988_v31, %v1992_v32  ;;  %v2060_v31 = vld [vmem:[#allocation7 + $0x718] sm:$0xff] }
 0x33b   :  { %2800 = vmatprep.subr.bf16.mxu0 %v5219_v52  ;;  %v5165_v52 = vcombine.high %v1971_v45, %v1975_v46  ;;  %v2064_v32 = vld [vmem:[#allocation7 + $0x738] sm:$0xff] }
 0x33e   :  { %2801 = vmatpush2.bf16.msra.mxu0 %v5218_v51  ;;  %v5174_v51 = vcombine.low %v1980_v39, %v1984_v40  ;;  %v2052_v39 = vld [vmem:[#allocation7 + $0x6d8] sm:$0xff] }
 0x33f   :  { %2852 = vmatprep.subr.bf16.mxu0 %v5215_v60  ;;  %v5157_v60 = vcombine.high %v1963_v54, %v1967_v55  ;;  %v2056_v40 = vld [vmem:[#allocation7 + $0x6f8] sm:$0xff]  ;;  %v2035_v54 = vld [vmem:[#allocation7 + $0x650] sm:$0xff] }
 0x340   :  { %v2039_v55 = vld [vmem:[#allocation7 + $0x670] sm:$0xff] }
 0x3c1   :  { %v6415_v0 = vpop.f32.mrf.mxu0 }
 0x3c3   :  { %v6417_v61 = vpop.f32.mrf.mxu0 }
 0x3c5   :  { %v1823_v62 = vpop.f32.mrf.mxu0 }
 0x3c6   :  { %v6419_v7 = vpack.c.bf16 %v1823_v62, %v1823_v62  ;;  %v5159_v62 = vcombine.high %v1964_v56, %v1968_v57 }
 0x3c7   :  { %v1825_v1 = vpop.f32.mrf.mxu0 }
 0x3c8   :  { %v1959_v6 = vpack.c.bf16 %v1825_v1, %v1825_v1  ;;  %v2087_v1 = vld [vmem:[#allocation7 + $0x7f0] sm:$0xff] }
 0x3c9   :  { %v5277_v8 = vcombine.high %v2083_v63, %v2087_v1 }
 0x3ca   :  { %2761 = vmatprep.mubr.bf16.mxu1 %v1959_v6  ;;  %2802 = vmatprep.mubr.bf16.mxu0 %v1959_v6 }
 0x3cb   :  { %2762 = vmatmul.mubr.bf16.vlgmr.msra.gmra.mxu1 %v6419_v7  ;;  %2803 = vmatmul.mubr.bf16.vlgmr.msra.gmra.mxu0 %v6419_v7 }
 0x3cc   :  { %2812 = vmatpush1.bf16.msra.mxu1 %v5212_v58  ;;  %2853 = vmatpush1.bf16.msra.mxu0 %v5214_v59  ;;  %v5164_v58 = vcombine.low %v1971_v45, %v1975_v46  ;;  %v5166_v59 = vcombine.low %v1972_v47, %v1976_v48  ;;  %v2043_v45 = vld [vmem:[#allocation7 + $0x690] sm:$0xff]  ;;  %v2044_v47 = vld [vmem:[#allocation7 + $0x698] sm:$0xff] }
 0x3cd   :  { %2843 = vmatprep.mubr.bf16.mxu1 %v1959_v6  ;;  %2884 = vmatprep.mubr.bf16.mxu0 %v1959_v6  ;;  %v5158_v6 = vcombine.low %v1964_v56, %v1968_v57  ;;  %v2047_v46 = vld [vmem:[#allocation7 + $0x6b0] sm:$0xff]  ;;  %v2048_v48 = vld [vmem:[#allocation7 + $0x6b8] sm:$0xff] }
 0x3ce   :  { %2813 = vmatprep.subr.bf16.mxu1 %v5205_v9  ;;  %2854 = vmatprep.subr.bf16.mxu0 %v5207_v10  ;;  %v5279_v9 = vcombine.high %v2084_v2, %v2088_v3  ;;  %v2075_v10 = vld [vmem:[#allocation7 + $0x790] sm:$0xff]  ;;  %v2036_v56 = vld [vmem:[#allocation7 + $0x658] sm:$0xff] }
 0x3cf   :  { %v2040_v57 = vld [vmem:[#allocation7 + $0x678] sm:$0xff] }
 0x3d0   :  { %2814 = vmatpush1.bf16.msra.mxu1 %v5204_v49  ;;  %2855 = vmatpush1.bf16.msra.mxu0 %v5206_v14  ;;  %v5276_v49 = vcombine.low %v2083_v63, %v2087_v1  ;;  %v5278_v14 = vcombine.low %v2084_v2, %v2088_v3  ;;  %v2027_v63 = vld [vmem:[#allocation7 + $0x610] sm:$0xff]  ;;  %v2028_v2 = vld [vmem:[#allocation7 + $0x618] sm:$0xff] }
 0x3d1   :  { %2815 = vmatprep.subr.bf16.mxu1 %v5197_v15  ;;  %2856 = vmatprep.subr.bf16.mxu0 %v5199_v19  ;;  %v5269_v15 = vcombine.high %v2075_v10, %v2079_v11  ;;  %v5271_v19 = vcombine.high %v2076_v12, %v2080_v13  ;;  %v2031_v1 = vld [vmem:[#allocation7 + $0x630] sm:$0xff]  ;;  %v2032_v3 = vld [vmem:[#allocation7 + $0x638] sm:$0xff] }
 0x3d4   :  { %2816 = vmatpush1.bf16.msra.mxu1 %v5196_v4  ;;  %2857 = vmatpush1.bf16.msra.mxu0 %v5198_v25  ;;  %v5268_v4 = vcombine.low %v2075_v10, %v2079_v11  ;;  %v5270_v25 = vcombine.low %v2076_v12, %v2080_v13  ;;  %v1886_v10 = vld [vmem:[#allocation7 + $0x1c0] sm:$0xff]  ;;  %v1887_v12 = vld [vmem:[#allocation7 + $0x1c8] sm:$0xff] }
 0x3d5   :  { %2817 = vmatprep.subr.bf16.mxu1 %v5189_v26  ;;  %2858 = vmatprep.subr.bf16.mxu0 %v5191_v27  ;;  %v5261_v26 = vcombine.high %v2067_v20, %v2071_v21  ;;  %v5263_v27 = vcombine.high %v2068_v22, %v2072_v23  ;;  %v1890_v11 = vld [vmem:[#allocation7 + $0x1e0] sm:$0xff]  ;;  %v1891_v13 = vld [vmem:[#allocation7 + $0x1e8] sm:$0xff] }
 0x3d8   :  { %2818 = vmatpush1.bf16.msra.mxu1 %v5188_v33  ;;  %2859 = vmatpush1.bf16.msra.mxu0 %v5190_v34  ;;  %v5260_v33 = vcombine.low %v2067_v20, %v2071_v21  ;;  %v5262_v34 = vcombine.low %v2068_v22, %v2072_v23  ;;  %v1878_v20 = vld [vmem:[#allocation7 + $0x180] sm:$0xff]  ;;  %v1879_v22 = vld [vmem:[#allocation7 + $0x188] sm:$0xff] }
 0x3d9   :  { %2819 = vmatprep.subr.bf16.mxu1 %v5181_v35  ;;  %2860 = vmatprep.subr.bf16.mxu0 %v5183_v36  ;;  %v5253_v35 = vcombine.high %v2059_v29, %v2063_v30  ;;  %v5255_v36 = vcombine.high %v2060_v31, %v2064_v32  ;;  %v1882_v21 = vld [vmem:[#allocation7 + $0x1a0] sm:$0xff]  ;;  %v1883_v23 = vld [vmem:[#allocation7 + $0x1a8] sm:$0xff] }
 0x3dc   :  { %2820 = vmatpush1.bf16.msra.mxu1 %v5180_v41  ;;  %2861 = vmatpush1.bf16.msra.mxu0 %v5182_v42  ;;  %v5252_v41 = vcombine.low %v2059_v29, %v2063_v30  ;;  %v5254_v42 = vcombine.low %v2060_v31, %v2064_v32  ;;  %v5331_v29 = vcombine.high %v1879_v22, %v1883_v23  ;;  %v1870_v30 = vld [vmem:[#allocation7 + $0x140] sm:$0xff]  ;;  %v1871_v32 = vld [vmem:[#allocation7 + $0x148] sm:$0xff] }
 0x3dd   :  { %2821 = vmatprep.subr.bf16.mxu1 %v5173_v43  ;;  %2862 = vmatprep.subr.bf16.mxu0 %v5175_v44  ;;  %v5245_v43 = vcombine.high %v2051_v37, %v2055_v38  ;;  %v5247_v44 = vcombine.high %v2052_v39, %v2056_v40  ;;  %v1874_v31 = vld [vmem:[#allocation7 + $0x160] sm:$0xff] }
 0x3e0   :  { %2822 = vmatpush1.bf16.msra.mxu1 %v5172_v50  ;;  %2863 = vmatpush1.bf16.msra.mxu0 %v5174_v51  ;;  %v5244_v50 = vcombine.low %v2051_v37, %v2055_v38  ;;  %v5246_v51 = vcombine.low %v2052_v39, %v2056_v40  ;;  %v1862_v37 = vld [vmem:[#allocation7 + $0x100] sm:$0xff]  ;;  %v1863_v39 = vld [vmem:[#allocation7 + $0x108] sm:$0xff] }
 0x3e1   :  { %2823 = vmatprep.subr.bf16.mxu1 %v5165_v52  ;;  %2864 = vmatprep.subr.bf16.mxu0 %v5167_v53  ;;  %v5237_v52 = vcombine.high %v2043_v45, %v2047_v46  ;;  %v5239_v53 = vcombine.high %v2044_v47, %v2048_v48  ;;  %v1866_v38 = vld [vmem:[#allocation7 + $0x120] sm:$0xff]  ;;  %v1867_v40 = vld [vmem:[#allocation7 + $0x128] sm:$0xff] }
 0x3e4   :  { %2824 = vmatpush1.bf16.msra.mxu1 %v5164_v58  ;;  %2865 = vmatpush1.bf16.msra.mxu0 %v5166_v59  ;;  %v5236_v58 = vcombine.low %v2043_v45, %v2047_v46  ;;  %v5238_v59 = vcombine.low %v2044_v47, %v2048_v48  ;;  %v1858_v45 = vld [vmem:[#allocation7 + $0xe0] sm:$0xff]  ;;  %v1855_v46 = vld [vmem:[#allocation7 + $0xc8] sm:$0xff]  ;;  %v5312_v48 = vcombine.low %v1862_v37, %v1866_v38 }
 0x3e5   :  { %2825 = vmatprep.subr.bf16.mxu1 %v5157_v60  ;;  %2866 = vmatprep.subr.bf16.mxu0 %v5159_v62  ;;  %v5229_v60 = vcombine.high %v2035_v54, %v2039_v55  ;;  %v5231_v62 = vcombine.high %v2036_v56, %v2040_v57  ;;  %v1859_v47 = vld [vmem:[#allocation7 + $0xe8] sm:$0xff] }
 0x3e8   :  { %2826 = vmatpush1.bf16.msra.mxu1 %v5156_v5  ;;  %2867 = vmatpush1.bf16.msra.mxu0 %v5158_v6  ;;  %v5228_v5 = vcombine.low %v2035_v54, %v2039_v55  ;;  %v5230_v6 = vcombine.low %v2036_v56, %v2040_v57  ;;  %v1850_v54 = vld [vmem:[#allocation7 + $0xa0] sm:$0xff]  ;;  %v1847_v55 = vld [vmem:[#allocation7 + $0x88] sm:$0xff] }
 0x3e9   :  { %2827 = vmatprep.subr.bf16.mxu1 %v5277_v8  ;;  %2868 = vmatprep.subr.bf16.mxu0 %v5279_v9  ;;  %v5221_v8 = vcombine.high %v2027_v63, %v2031_v1  ;;  %v5223_v9 = vcombine.high %v2028_v2, %v2032_v3  ;;  %v1851_v56 = vld [vmem:[#allocation7 + $0xa8] sm:$0xff] }
 0x3ec   :  { %2828 = vmatpush2.bf16.msra.mxu1 %v5276_v49  ;;  %2869 = vmatpush2.bf16.msra.mxu0 %v5278_v14  ;;  %v5220_v49 = vcombine.low %v2027_v63, %v2031_v1  ;;  %v5222_v14 = vcombine.low %v2028_v2, %v2032_v3  ;;  %v1842_v63 = vld [vmem:[#allocation7 + $0x60] sm:$0xff]  ;;  %v1839_v1 = vld [vmem:[#allocation7 + $0x48] sm:$0xff] }
 0x3ed   :  { %2829 = vmatprep.subr.bf16.mxu1 %v5269_v15  ;;  %2870 = vmatprep.subr.bf16.mxu0 %v5271_v19  ;;  %v5337_v15 = vcombine.high %v1886_v10, %v1890_v11  ;;  %v5339_v19 = vcombine.high %v1887_v12, %v1891_v13  ;;  %v1843_v2 = vld [vmem:[#allocation7 + $0x68] sm:$0xff] }
 0x3f0   :  { %2830 = vmatpush2.bf16.msra.mxu1 %v5268_v4  ;;  %2871 = vmatpush2.bf16.msra.mxu0 %v5270_v25  ;;  %v5336_v4 = vcombine.low %v1886_v10, %v1890_v11  ;;  %v5338_v25 = vcombine.low %v1887_v12, %v1891_v13  ;;  %v1834_v10 = vld [vmem:[#allocation7 + $0x20] sm:$0xff]  ;;  %v1831_v11 = vld [vmem:[#allocation7 + $0x8] sm:$0xff] }
 0x3f1   :  { %2831 = vmatprep.subr.bf16.mxu1 %v5261_v26  ;;  %2872 = vmatprep.subr.bf16.mxu0 %v5263_v27  ;;  %v6425_v26 = vpack.c.bf16 %v6417_v61, %v6417_v61  ;;  %v5329_v27 = vcombine.high %v1878_v20, %v1882_v21  ;;  %v5321_v61 = vcombine.high %v1870_v30, %v1874_v31  ;;  %v1835_v12 = vld [vmem:[#allocation7 + $0x28] sm:$0xff] }
 0x3f4   :  { %2832 = vmatpush2.bf16.msra.mxu1 %v5260_v33  ;;  %2873 = vmatpush2.bf16.msra.mxu0 %v5262_v34  ;;  %v1875_v33 = vld [vmem:[#allocation7 + $0x168] sm:$0xff]  ;;  %v5328_v34 = vcombine.low %v1878_v20, %v1882_v21  ;;  %v1954_v20 = vld [vmem:[#allocation7 + $0x3e0] sm:$0xff] }
 0x3f5   :  { %2833 = vmatprep.subr.bf16.mxu1 %v5253_v35  ;;  %2874 = vmatprep.subr.bf16.mxu0 %v5255_v36  ;;  %v5330_v35 = vcombine.low %v1879_v22, %v1883_v23  ;;  %v5323_v36 = vcombine.high %v1871_v32, %v1875_v33  ;;  %v1951_v21 = vld [vmem:[#allocation7 + $0x3c8] sm:$0xff] }
 0x3f6   :  { %v1955_v22 = vld [vmem:[#allocation7 + $0x3e8] sm:$0xff] }
 0x3f8   :  { %2834 = vmatpush2.bf16.msra.mxu1 %v5252_v41  ;;  %2875 = vmatpush2.bf16.msra.mxu0 %v5254_v42  ;;  %v5322_v41 = vcombine.low %v1871_v32, %v1875_v33  ;;  %v5313_v42 = vcombine.high %v1862_v37, %v1866_v38  ;;  %v1947_v32 = vld [vmem:[#allocation7 + $0x3a8] sm:$0xff]  ;;  %v1938_v37 = vld [vmem:[#allocation7 + $0x360] sm:$0xff] }
 0x3f9   :  { %2835 = vmatprep.subr.bf16.mxu1 %v5245_v43  ;;  %2876 = vmatprep.subr.bf16.mxu0 %v5247_v44  ;;  %v5315_v43 = vcombine.high %v1863_v39, %v1867_v40  ;;  %v1854_v44 = vld [vmem:[#allocation7 + $0xc0] sm:$0xff]  ;;  %v1935_v38 = vld [vmem:[#allocation7 + $0x348] sm:$0xff] }
 0x3fa   :  { %v5304_v57 = vcombine.low %v1854_v44, %v1858_v45 }
 0x3fc   :  { %2836 = vmatpush2.bf16.msra.mxu1 %v5244_v50  ;;  %2877 = vmatpush2.bf16.msra.mxu0 %v5246_v51  ;;  %v5314_v50 = vcombine.low %v1863_v39, %v1867_v40  ;;  %v5305_v51 = vcombine.high %v1854_v44, %v1858_v45  ;;  %v1939_v39 = vld [vmem:[#allocation7 + $0x368] sm:$0xff]  ;;  %v1930_v44 = vld [vmem:[#allocation7 + $0x320] sm:$0xff] }
 0x3fd   :  { %2837 = vmatprep.subr.bf16.mxu1 %v5237_v52  ;;  %2878 = vmatprep.subr.bf16.mxu0 %v5239_v53  ;;  %v5307_v52 = vcombine.high %v1855_v46, %v1859_v47  ;;  %v1846_v53 = vld [vmem:[#allocation7 + $0x80] sm:$0xff]  ;;  %v1927_v45 = vld [vmem:[#allocation7 + $0x308] sm:$0xff] }
 0x3fe   :  { %v5296_v3 = vcombine.low %v1846_v53, %v1850_v54 }
 0x400   :  { %2838 = vmatpush2.bf16.msra.mxu1 %v5236_v58  ;;  %2879 = vmatpush2.bf16.msra.mxu0 %v5238_v59  ;;  %v5306_v58 = vcombine.low %v1855_v46, %v1859_v47  ;;  %v5297_v59 = vcombine.high %v1846_v53, %v1850_v54  ;;  %v1931_v46 = vld [vmem:[#allocation7 + $0x328] sm:$0xff]  ;;  %v1922_v53 = vld [vmem:[#allocation7 + $0x2e0] sm:$0xff] }
 0x401   :  { %2839 = vmatprep.subr.bf16.mxu1 %v5229_v60  ;;  %2880 = vmatprep.subr.bf16.mxu0 %v5231_v62  ;;  %v5299_v60 = vcombine.high %v1847_v55, %v1851_v56  ;;  %v1838_v62 = vld [vmem:[#allocation7 + $0x40] sm:$0xff]  ;;  %v1919_v54 = vld [vmem:[#allocation7 + $0x2c8] sm:$0xff] }
 0x402   :  { %v5288_v13 = vcombine.low %v1838_v62, %v1842_v63 }
 0x404   :  { %2840 = vmatpush2.bf16.msra.mxu1 %v5228_v5  ;;  %2881 = vmatpush2.bf16.msra.mxu0 %v5230_v6  ;;  %v5298_v5 = vcombine.low %v1847_v55, %v1851_v56  ;;  %v5289_v6 = vcombine.high %v1838_v62, %v1842_v63  ;;  %v1923_v55 = vld [vmem:[#allocation7 + $0x2e8] sm:$0xff]  ;;  %v1914_v62 = vld [vmem:[#allocation7 + $0x2a0] sm:$0xff] }
 0x405   :  { %2841 = vmatprep.subr.bf16.mxu1 %v5221_v8  ;;  %2882 = vmatprep.subr.bf16.mxu0 %v5223_v9  ;;  %v5291_v8 = vcombine.high %v1839_v1, %v1843_v2  ;;  %v1830_v9 = vld [vmem:[#allocation7] sm:$0xff]  ;;  %v1911_v63 = vld [vmem:[#allocation7 + $0x288] sm:$0xff] }
 0x406   :  { %v5280_v23 = vcombine.low %v1830_v9, %v1834_v10 }
 0x408   :  { %2842 = vmatpush2.bf16.msra.mxu1 %v5220_v49  ;;  %2883 = vmatpush2.bf16.msra.mxu0 %v5222_v14  ;;  %v5290_v49 = vcombine.low %v1839_v1, %v1843_v2  ;;  %v5281_v14 = vcombine.high %v1830_v9, %v1834_v10  ;;  %v1915_v1 = vld [vmem:[#allocation7 + $0x2a8] sm:$0xff]  ;;  %v1906_v9 = vld [vmem:[#allocation7 + $0x260] sm:$0xff] }
 0x409   :  { %3533 = vmatprep.subr.bf16.mxu1 %v5337_v15  ;;  %3574 = vmatprep.subr.bf16.mxu0 %v5339_v19  ;;  %v5283_v15 = vcombine.high %v1831_v11, %v1835_v12  ;;  %v1950_v19 = vld [vmem:[#allocation7 + $0x3c0] sm:$0xff]  ;;  %v1903_v10 = vld [vmem:[#allocation7 + $0x248] sm:$0xff] }
 0x40a   :  { %v5400_v33 = vcombine.low %v1950_v19, %v1954_v20 }
 0x40b   :  { %2844 = vmatmul.mubr.bf16.vlgmr.msra.gmra.mxu1 %v6419_v7  ;;  %2885 = vmatmul.mubr.bf16.vlgmr.msra.gmra.mxu0 %v6419_v7  ;;  %v5320_v7 = vcombine.low %v1870_v30, %v1874_v31  ;;  %v1946_v30 = vld [vmem:[#allocation7 + $0x3a0] sm:$0xff]  ;;  %v1943_v31 = vld [vmem:[#allocation7 + $0x388] sm:$0xff] }
 0x40c   :  { %3534 = vmatpush1.bf16.msra.mxu1 %v5336_v4  ;;  %3565 = vmatprep.mubr.bf16.mxu1 %v6425_v26  ;;  %v5282_v4 = vcombine.low %v1831_v11, %v1835_v12  ;;  %v1907_v11 = vld [vmem:[#allocation7 + $0x268] sm:$0xff] }
 0x40d   :  { %3575 = vmatpush1.bf16.msra.mxu0 %v5338_v25  ;;  %3606 = vmatprep.mubr.bf16.mxu0 %v6425_v26  ;;  %v5401_v25 = vcombine.high %v1950_v19, %v1954_v20  ;;  %v1898_v19 = vld [vmem:[#allocation7 + $0x220] sm:$0xff]  ;;  %v1895_v20 = vld [vmem:[#allocation7 + $0x208] sm:$0xff] }
 0x40e   :  { %3535 = vmatprep.subr.bf16.mxu1 %v5329_v27  ;;  %3576 = vmatprep.subr.bf16.mxu0 %v5331_v29  ;;  %v5403_v27 = vcombine.high %v1951_v21, %v1955_v22  ;;  %v1942_v29 = vld [vmem:[#allocation7 + $0x380] sm:$0xff] }
 0x40f   :  { %v5392_v40 = vcombine.low %v1942_v29, %v1946_v30 }
 0x410   :  { %3536 = vmatpush1.bf16.msra.mxu1 %v5328_v34  ;;  %v5402_v34 = vcombine.low %v1951_v21, %v1955_v22  ;;  %v1899_v21 = vld [vmem:[#allocation7 + $0x228] sm:$0xff] }
 0x411   :  { %3577 = vmatpush1.bf16.msra.mxu0 %v5330_v35  ;;  %3537 = vmatprep.subr.bf16.mxu1 %v5321_v61  ;;  %v5393_v35 = vcombine.high %v1942_v29, %v1946_v30  ;;  %v5395_v61 = vcombine.high %v1943_v31, %v1947_v32  ;;  %v1892_v29 = vld [vmem:[#allocation7 + $0x1f0] sm:$0xff]  ;;  %v1889_v30 = vld [vmem:[#allocation7 + $0x1d8] sm:$0xff] }
 0x412   :  { %3578 = vmatprep.subr.bf16.mxu0 %v5323_v36  ;;  %v1934_v36 = vld [vmem:[#allocation7 + $0x340] sm:$0xff] }
 0x413   :  { %v5384_v47 = vcombine.low %v1934_v36, %v1938_v37 }
 0x414   :  { %3538 = vmatpush1.bf16.msra.mxu1 %v5320_v7  ;;  %v5394_v7 = vcombine.low %v1943_v31, %v1947_v32  ;;  %v1893_v31 = vld [vmem:[#allocation7 + $0x1f8] sm:$0xff] }
 0x415   :  { %3579 = vmatpush1.bf16.msra.mxu0 %v5322_v41  ;;  %3539 = vmatprep.subr.bf16.mxu1 %v5313_v42  ;;  %v5385_v41 = vcombine.high %v1934_v36, %v1938_v37  ;;  %v5387_v42 = vcombine.high %v1935_v38, %v1939_v39  ;;  %v1884_v36 = vld [vmem:[#allocation7 + $0x1b0] sm:$0xff] }
 0x416   :  { %3580 = vmatprep.subr.bf16.mxu0 %v5315_v43  ;;  %v1926_v43 = vld [vmem:[#allocation7 + $0x300] sm:$0xff] }
 0x417   :  { %v5376_v56 = vcombine.low %v1926_v43, %v1930_v44 }
 0x418   :  { %3540 = vmatpush1.bf16.msra.mxu1 %v5312_v48  ;;  %v5386_v48 = vcombine.low %v1935_v38, %v1939_v39  ;;  %v1881_v38 = vld [vmem:[#allocation7 + $0x198] sm:$0xff] }
 0x419   :  { %3581 = vmatpush1.bf16.msra.mxu0 %v5314_v50  ;;  %3541 = vmatprep.subr.bf16.mxu1 %v5305_v51  ;;  %v5377_v50 = vcombine.high %v1926_v43, %v1930_v44  ;;  %v5379_v51 = vcombine.high %v1927_v45, %v1931_v46  ;;  %v1885_v39 = vld [vmem:[#allocation7 + $0x1b8] sm:$0xff]  ;;  %v1876_v43 = vld [vmem:[#allocation7 + $0x170] sm:$0xff] }
 0x41a   :  { %3582 = vmatprep.subr.bf16.mxu0 %v5307_v52  ;;  %v1918_v52 = vld [vmem:[#allocation7 + $0x2c0] sm:$0xff]  ;;  %v5335_v44 = vcombine.high %v1881_v38, %v1885_v39 }
 0x41b   :  { %v5368_v2 = vcombine.low %v1918_v52, %v1922_v53 }
 0x41c   :  { %3542 = vmatpush1.bf16.msra.mxu1 %v5304_v57  ;;  %v5378_v57 = vcombine.low %v1927_v45, %v1931_v46  ;;  %v1873_v45 = vld [vmem:[#allocation7 + $0x158] sm:$0xff] }
 0x41d   :  { %3583 = vmatpush1.bf16.msra.mxu0 %v5306_v58  ;;  %3543 = vmatprep.subr.bf16.mxu1 %v5297_v59  ;;  %v5369_v58 = vcombine.high %v1918_v52, %v1922_v53  ;;  %v5371_v59 = vcombine.high %v1919_v54, %v1923_v55  ;;  %v1877_v46 = vld [vmem:[#allocation7 + $0x178] sm:$0xff]  ;;  %v1868_v52 = vld [vmem:[#allocation7 + $0x130] sm:$0xff] }
 0x41e   :  { %3584 = vmatprep.subr.bf16.mxu0 %v5299_v60  ;;  %v1910_v60 = vld [vmem:[#allocation7 + $0x280] sm:$0xff]  ;;  %v1865_v53 = vld [vmem:[#allocation7 + $0x118] sm:$0xff] }
 0x41f   :  { %v5360_v12 = vcombine.low %v1910_v60, %v1914_v62 }
 0x420   :  { %3544 = vmatpush1.bf16.msra.mxu1 %v5296_v3  ;;  %v5370_v3 = vcombine.low %v1919_v54, %v1923_v55  ;;  %v1869_v54 = vld [vmem:[#allocation7 + $0x138] sm:$0xff] }
 0x421   :  { %3585 = vmatpush1.bf16.msra.mxu0 %v5298_v5  ;;  %3545 = vmatprep.subr.bf16.mxu1 %v5289_v6  ;;  %v5361_v5 = vcombine.high %v1910_v60, %v1914_v62  ;;  %v5363_v6 = vcombine.high %v1911_v63, %v1915_v1  ;;  %v1860_v60 = vld [vmem:[#allocation7 + $0xf0] sm:$0xff]  ;;  %v1857_v62 = vld [vmem:[#allocation7 + $0xd8] sm:$0xff] }
 0x422   :  { %3586 = vmatprep.subr.bf16.mxu0 %v5291_v8  ;;  %v1902_v8 = vld [vmem:[#allocation7 + $0x240] sm:$0xff] }
 0x423   :  { %v5352_v22 = vcombine.low %v1902_v8, %v1906_v9 }
 0x424   :  { %3546 = vmatpush1.bf16.msra.mxu1 %v5288_v13  ;;  %v5362_v13 = vcombine.low %v1911_v63, %v1915_v1  ;;  %v1861_v63 = vld [vmem:[#allocation7 + $0xf8] sm:$0xff]  ;;  %v5318_v1 = vcombine.low %v1865_v53, %v1869_v54 }
 0x425   :  { %3587 = vmatpush1.bf16.msra.mxu0 %v5290_v49  ;;  %3547 = vmatprep.subr.bf16.mxu1 %v5281_v14  ;;  %v5353_v49 = vcombine.high %v1902_v8, %v1906_v9  ;;  %v5355_v14 = vcombine.high %v1903_v10, %v1907_v11  ;;  %v1849_v8 = vld [vmem:[#allocation7 + $0x98] sm:$0xff] }
 0x426   :  { %3588 = vmatprep.subr.bf16.mxu0 %v5283_v15  ;;  %v1894_v15 = vld [vmem:[#allocation7 + $0x200] sm:$0xff]  ;;  %v1853_v9 = vld [vmem:[#allocation7 + $0xb8] sm:$0xff] }
 0x427   :  { %v5344_v32 = vcombine.low %v1894_v15, %v1898_v19 }
 0x428   :  { %3548 = vmatpush1.bf16.msra.mxu1 %v5280_v23  ;;  %v5354_v23 = vcombine.low %v1903_v10, %v1907_v11  ;;  %v5310_v11 = vcombine.low %v1857_v62, %v1861_v63 }
 0x429   :  { %3589 = vmatpush1.bf16.msra.mxu0 %v5282_v4  ;;  %3549 = vmatprep.subr.bf16.mxu1 %v5401_v25  ;;  %v5345_v4 = vcombine.high %v1894_v15, %v1898_v19  ;;  %v5347_v25 = vcombine.high %v1895_v20, %v1899_v21  ;;  %v1841_v15 = vld [vmem:[#allocation7 + $0x58] sm:$0xff] }
 0x42a   :  { %3590 = vmatprep.subr.bf16.mxu0 %v5403_v27  ;;  %v1888_v27 = vld [vmem:[#allocation7 + $0x1d0] sm:$0xff]  ;;  %v1845_v19 = vld [vmem:[#allocation7 + $0x78] sm:$0xff] }
 0x42b   :  { %v5340_v37 = vcombine.low %v1888_v27, %v1892_v29 }
 0x42c   :  { %3550 = vmatpush2.bf16.msra.mxu1 %v5400_v33  ;;  %v5346_v33 = vcombine.low %v1895_v20, %v1899_v21  ;;  %v5302_v21 = vcombine.low %v1849_v8, %v1853_v9 }
 0x42d   :  { %3591 = vmatpush2.bf16.msra.mxu0 %v5402_v34  ;;  %3551 = vmatprep.subr.bf16.mxu1 %v5393_v35  ;;  %v5341_v34 = vcombine.high %v1888_v27, %v1892_v29  ;;  %v5343_v35 = vcombine.high %v1889_v30, %v1893_v31  ;;  %v1833_v27 = vld [vmem:[#allocation7 + $0x18] sm:$0xff] }
 0x42e   :  { %3592 = vmatprep.subr.bf16.mxu0 %v5395_v61  ;;  %v1880_v61 = vld [vmem:[#allocation7 + $0x190] sm:$0xff]  ;;  %v1837_v29 = vld [vmem:[#allocation7 + $0x38] sm:$0xff] }
 0x430   :  { %3552 = vmatpush2.bf16.msra.mxu1 %v5392_v40  ;;  %v6433_v40 = vpack.c.bf16 %v6415_v0, %v6415_v0  ;;  %v5334_v0 = vcombine.low %v1881_v38, %v1885_v39  ;;  %v5286_v38 = vcombine.low %v1833_v27, %v1837_v29 }
 0x431   :  { %3593 = vmatpush2.bf16.msra.mxu0 %v5394_v7  ;;  %3553 = vmatprep.subr.bf16.mxu1 %v5385_v41  ;;  %v5342_v7 = vcombine.low %v1889_v30, %v1893_v31  ;;  %v5333_v41 = vcombine.high %v1880_v61, %v1884_v36  ;;  %v5294_v31 = vcombine.low %v1841_v15, %v1845_v19 }
 0x432   :  { %3594 = vmatprep.subr.bf16.mxu0 %v5387_v42  ;;  %v1872_v42 = vld [vmem:[#allocation7 + $0x150] sm:$0xff] }
 0x433   :  { %v5324_v55 = vcombine.low %v1872_v42, %v1876_v43 }
 0x434   :  { %3554 = vmatpush2.bf16.msra.mxu1 %v5384_v47  ;;  %v5332_v47 = vcombine.low %v1880_v61, %v1884_v36  ;;  %v1953_v61 = vld [vmem:[#allocation7 + $0x3d8] sm:$0xff] }
 0x435   :  { %3595 = vmatpush2.bf16.msra.mxu0 %v5386_v48  ;;  %3555 = vmatprep.subr.bf16.mxu1 %v5377_v50  ;;  %v5325_v48 = vcombine.high %v1872_v42, %v1876_v43  ;;  %v5327_v50 = vcombine.high %v1873_v45, %v1877_v46  ;;  %v1957_v36 = vld [vmem:[#allocation7 + $0x3f8] sm:$0xff]  ;;  %v1948_v42 = vld [vmem:[#allocation7 + $0x3b0] sm:$0xff] }
 0x436   :  { %3596 = vmatprep.subr.bf16.mxu0 %v5379_v51  ;;  %v1864_v51 = vld [vmem:[#allocation7 + $0x110] sm:$0xff]  ;;  %v1945_v43 = vld [vmem:[#allocation7 + $0x398] sm:$0xff] }
 0x438   :  { %3556 = vmatpush2.bf16.msra.mxu1 %v5376_v56  ;;  %v5326_v56 = vcombine.low %v1873_v45, %v1877_v46  ;;  %v5406_v46 = vcombine.low %v1953_v61, %v1957_v36 }
 0x439   :  { %3597 = vmatpush2.bf16.msra.mxu0 %v5378_v57  ;;  %3557 = vmatprep.subr.bf16.mxu1 %v5369_v58  ;;  %v5317_v57 = vcombine.high %v1864_v51, %v1868_v52  ;;  %v5319_v58 = vcombine.high %v1865_v53, %v1869_v54 }
 0x43a   :  { %3598 = vmatprep.subr.bf16.mxu0 %v5371_v59  ;;  %v1856_v59 = vld [vmem:[#allocation7 + $0xd0] sm:$0xff] }
 0x43b   :  { %v5308_v10 = vcombine.low %v1856_v59, %v1860_v60 }
 0x43c   :  { %3558 = vmatpush2.bf16.msra.mxu1 %v5368_v2  ;;  %v5309_v2 = vcombine.high %v1856_v59, %v1860_v60  ;;  %v1929_v59 = vld [vmem:[#allocation7 + $0x318] sm:$0xff] }
 0x43d   :  { %3599 = vmatpush2.bf16.msra.mxu0 %v5370_v3  ;;  %3559 = vmatprep.subr.bf16.mxu1 %v5361_v5  ;;  %v5311_v3 = vcombine.high %v1857_v62, %v1861_v63  ;;  %v1848_v5 = vld [vmem:[#allocation7 + $0x90] sm:$0xff]  ;;  %v1933_v60 = vld [vmem:[#allocation7 + $0x338] sm:$0xff] }
 0x43e   :  { %3600 = vmatprep.subr.bf16.mxu0 %v5363_v6  ;;  %v1852_v6 = vld [vmem:[#allocation7 + $0xb0] sm:$0xff] }
 0x43f   :  { %v5300_v20 = vcombine.low %v1848_v5, %v1852_v6 }
 0x440   :  { %3560 = vmatpush2.bf16.msra.mxu1 %v5360_v12  ;;  %v5301_v12 = vcombine.high %v1848_v5, %v1852_v6  ;;  %v1921_v5 = vld [vmem:[#allocation7 + $0x2d8] sm:$0xff] }
 0x441   :  { %3601 = vmatpush2.bf16.msra.mxu0 %v5362_v13  ;;  %3561 = vmatprep.subr.bf16.mxu1 %v5353_v49  ;;  %v5303_v13 = vcombine.high %v1849_v8, %v1853_v9  ;;  %v1840_v49 = vld [vmem:[#allocation7 + $0x50] sm:$0xff]  ;;  %v1925_v6 = vld [vmem:[#allocation7 + $0x2f8] sm:$0xff]  ;;  %v5382_v9 = vcombine.low %v1929_v59, %v1933_v60 }
 0x442   :  { %3602 = vmatprep.subr.bf16.mxu0 %v5355_v14  ;;  %v1844_v14 = vld [vmem:[#allocation7 + $0x70] sm:$0xff] }
 0x443   :  { %v5292_v30 = vcombine.low %v1840_v49, %v1844_v14 }
 0x444   :  { %3562 = vmatpush2.bf16.msra.mxu1 %v5352_v22  ;;  %v5293_v22 = vcombine.high %v1840_v49, %v1844_v14  ;;  %v1913_v49 = vld [vmem:[#allocation7 + $0x298] sm:$0xff] }
 0x445   :  { %3603 = vmatpush2.bf16.msra.mxu0 %v5354_v23  ;;  %3563 = vmatprep.subr.bf16.mxu1 %v5345_v4  ;;  %v5295_v23 = vcombine.high %v1841_v15, %v1845_v19  ;;  %v1832_v4 = vld [vmem:[#allocation7 + $0x10] sm:$0xff]  ;;  %v1917_v14 = vld [vmem:[#allocation7 + $0x2b8] sm:$0xff]  ;;  %v5374_v19 = vcombine.low %v1921_v5, %v1925_v6 }
 0x446   :  { %3604 = vmatprep.subr.bf16.mxu0 %v5347_v25  ;;  %v1836_v25 = vld [vmem:[#allocation7 + $0x30] sm:$0xff] }
 0x448   :  { %3564 = vmatpush2.bf16.msra.mxu1 %v5344_v32  ;;  %v5285_v32 = vcombine.high %v1832_v4, %v1836_v25 }
 0x449   :  { %3605 = vmatpush2.bf16.msra.mxu0 %v5346_v33  ;;  %3615 = vmatprep.subr.bf16.mxu1 %v5341_v34  ;;  %v5287_v33 = vcombine.high %v1833_v27, %v1837_v29  ;;  %v1952_v34 = vld [vmem:[#allocation7 + $0x3d0] sm:$0xff]  ;;  %v5366_v29 = vcombine.low %v1913_v49, %v1917_v14 }
 0x44a   :  { %3656 = vmatprep.subr.bf16.mxu0 %v5343_v35  ;;  %v1956_v35 = vld [vmem:[#allocation7 + $0x3f0] sm:$0xff] }
 0x44b   :  { %3566 = vmatmul.mubr.bf16.vlgmr.msra.gmra.mxu1 %v6433_v40  ;;  %v5405_v39 = vcombine.high %v1952_v34, %v1956_v35  ;;  %v5404_v45 = vcombine.low %v1952_v34, %v1956_v35  ;;  %v1897_v34 = vld [vmem:[#allocation7 + $0x218] sm:$0xff] }
 0x44c   :  { %3607 = vmatmul.mubr.bf16.vlgmr.msra.gmra.mxu0 %v6433_v40  ;;  %3616 = vmatpush1.bf16.msra.mxu1 %v5340_v37  ;;  %v5284_v37 = vcombine.low %v1832_v4, %v1836_v25  ;;  %v1905_v4 = vld [vmem:[#allocation7 + $0x258] sm:$0xff] }
 0x44d   :  { %3647 = vmatprep.mubr.bf16.mxu1 %v6425_v26  ;;  %3657 = vmatpush1.bf16.msra.mxu0 %v5342_v7  ;;  %v5407_v7 = vcombine.high %v1953_v61, %v1957_v36  ;;  %v1909_v25 = vld [vmem:[#allocation7 + $0x278] sm:$0xff] }
 0x44e   :  { %3688 = vmatprep.mubr.bf16.mxu0 %v6425_v26  ;;  %3617 = vmatprep.subr.bf16.mxu1 %v5333_v41  ;;  %v5316_v26 = vcombine.low %v1864_v51, %v1868_v52  ;;  %v1944_v41 = vld [vmem:[#allocation7 + $0x390] sm:$0xff]  ;;  %v1937_v51 = vld [vmem:[#allocation7 + $0x358] sm:$0xff]  ;;  %v5358_v36 = vcombine.low %v1905_v4, %v1909_v25 }
 0x44f   :  { %3658 = vmatprep.subr.bf16.mxu0 %v5335_v44  ;;  %v1949_v44 = vld [vmem:[#allocation7 + $0x3b8] sm:$0xff]  ;;  %v5396_v53 = vcombine.low %v1944_v41, %v1948_v42 }
 0x450   :  { %3618 = vmatpush1.bf16.msra.mxu1 %v5332_v47  ;;  %v5397_v47 = vcombine.high %v1944_v41, %v1948_v42  ;;  %v1941_v52 = vld [vmem:[#allocation7 + $0x378] sm:$0xff]  ;;  %v5398_v54 = vcombine.low %v1945_v43, %v1949_v44 }
 0x451   :  { %3659 = vmatpush1.bf16.msra.mxu0 %v5334_v0  ;;  %3619 = vmatprep.subr.bf16.mxu1 %v5325_v48  ;;  %v5399_v0 = vcombine.high %v1945_v43, %v1949_v44  ;;  %v1936_v48 = vld [vmem:[#allocation7 + $0x350] sm:$0xff]  ;;  %v5390_v63 = vcombine.low %v1937_v51, %v1941_v52  ;;  %v1901_v35 = vld [vmem:[#allocation7 + $0x238] sm:$0xff] }
 0x452   :  { %3660 = vmatprep.subr.bf16.mxu0 %v5327_v50  ;;  %v1940_v50 = vld [vmem:[#allocation7 + $0x370] sm:$0xff] }
 0x453   :  { %v5388_v62 = vcombine.low %v1936_v48, %v1940_v50  ;;  %v5887_v41 = vld [vmem:[#allocation8 + $0x74] ss:$8 sps:$4 sm:$0xff]   ;;  %v5885_v43 = vld [vmem:[#allocation8 + $0x70] ss:$8 sps:$4 sm:$0xff]  }
 0x454   :  { %3620 = vmatpush1.bf16.msra.mxu1 %v5324_v55  ;;  %v5389_v55 = vcombine.high %v1936_v48, %v1940_v50  ;;  %v5890_v42 = vld [vmem:[#allocation8 + $0x174] ss:$8 sps:$4 sm:$0xff]   ;;  %v5888_v44 = vld [vmem:[#allocation8 + $0x170] ss:$8 sps:$4 sm:$0xff]   ;;  %v5891_v48 = vld [vmem:[#allocation8 + $0x60] ss:$8 sps:$4 sm:$0xff]  }
 0x455   :  { %3661 = vmatpush1.bf16.msra.mxu0 %v5326_v56  ;;  %3621 = vmatprep.subr.bf16.mxu1 %v5317_v57  ;;  %v5391_v56 = vcombine.high %v1937_v51, %v1941_v52  ;;  %v1928_v57 = vld [vmem:[#allocation7 + $0x310] sm:$0xff]  ;;  %v5894_v52 = vld [vmem:[#allocation8 + $0x160] ss:$8 sps:$4 sm:$0xff]  }
 0x456   :  { %3662 = vmatprep.subr.bf16.mxu0 %v5319_v58  ;;  %v1932_v58 = vld [vmem:[#allocation7 + $0x330] sm:$0xff] }
 0x457   :  { %v5380_v8 = vcombine.low %v1928_v57, %v1932_v58 }
 0x458   :  { %3622 = vmatpush1.bf16.msra.mxu1 %v5316_v26  ;;  %v5381_v26 = vcombine.high %v1928_v57, %v1932_v58  ;;  %v5897_v57 = vld [vmem:[#allocation8 + $0x50] ss:$8 sps:$4 sm:$0xff]  }
 0x459   :  { %3663 = vmatpush1.bf16.msra.mxu0 %v5318_v1  ;;  %3623 = vmatprep.subr.bf16.mxu1 %v5309_v2  ;;  %v5383_v1 = vcombine.high %v1929_v59, %v1933_v60  ;;  %v1920_v2 = vld [vmem:[#allocation7 + $0x2d0] sm:$0xff]  ;;  %v5905_v60 = vld [vmem:[#allocation8 + $0x44] ss:$8 sps:$4 sm:$0xff]  }
 0x45a   :  { %3664 = vmatprep.subr.bf16.mxu0 %v5311_v3  ;;  %v1924_v3 = vld [vmem:[#allocation7 + $0x2f0] sm:$0xff] }
 0x45b   :  { %v5372_v15 = vcombine.low %v1920_v2, %v1924_v3 }
 0x45c   :  { %3624 = vmatpush1.bf16.msra.mxu1 %v5308_v10  ;;  %v5373_v10 = vcombine.high %v1920_v2, %v1924_v3  ;;  %v5914_v2 = vld [vmem:[#allocation8 + $0x134] ss:$8 sps:$4 sm:$0xff]   ;;  %v5909_v3 = vld [vmem:[#allocation8 + $0x30] ss:$8 sps:$4 sm:$0xff]  }
 0x45d   :  { %3665 = vmatpush1.bf16.msra.mxu0 %v5310_v11  ;;  %3625 = vmatprep.subr.bf16.mxu1 %v5301_v12  ;;  %v5375_v11 = vcombine.high %v1921_v5, %v1925_v6  ;;  %v1912_v12 = vld [vmem:[#allocation7 + $0x290] sm:$0xff]  ;;  %v5917_v6 = vld [vmem:[#allocation8 + $0x24] ss:$8 sps:$4 sm:$0xff]  }
 0x45e   :  { %3666 = vmatprep.subr.bf16.mxu0 %v5303_v13  ;;  %v1916_v13 = vld [vmem:[#allocation7 + $0x2b0] sm:$0xff] }
 0x45f   :  { %v5364_v27 = vcombine.low %v1912_v12, %v1916_v13  ;;  %v5912_v5 = vld [vmem:[#allocation8 + $0x130] ss:$8 sps:$4 sm:$0xff]  }
 0x460   :  { %3626 = vmatpush1.bf16.msra.mxu1 %v5300_v20  ;;  %v5365_v20 = vcombine.high %v1912_v12, %v1916_v13  ;;  %v5926_v12 = vld [vmem:[#allocation8 + $0x114] ss:$8 sps:$4 sm:$0xff]   ;;  %v5921_v13 = vld [vmem:[#allocation8 + $0x10] ss:$8 sps:$4 sm:$0xff]  }
 0x461   :  { %3667 = vmatpush1.bf16.msra.mxu0 %v5302_v21  ;;  %3627 = vmatprep.subr.bf16.mxu1 %v5293_v22  ;;  %v5367_v21 = vcombine.high %v1913_v49, %v1917_v14  ;;  %v1904_v22 = vld [vmem:[#allocation7 + $0x250] sm:$0xff]  ;;  %v5929_v14 = vld [vmem:[#allocation8 + $0x4] ss:$8 sps:$4 sm:$0xff]  }
 0x462   :  { %3668 = vmatprep.subr.bf16.mxu0 %v5295_v23  ;;  %v1908_v23 = vld [vmem:[#allocation7 + $0x270] sm:$0xff] }
 0x463   :  { %v5356_v61 = vcombine.low %v1904_v22, %v1908_v23  ;;  %v5924_v49 = vld [vmem:[#allocation8 + $0x110] ss:$8 sps:$4 sm:$0xff]  }
 0x464   :  { %3628 = vmatpush1.bf16.msra.mxu1 %v5292_v30  ;;  %v5357_v30 = vcombine.high %v1904_v22, %v1908_v23  ;;  %v5938_v22 = vld [vmem:[#allocation8 + $0x1f4] ss:$8 sps:$4 sm:$0xff]   ;;  %v5933_v23 = vld [vmem:[#allocation8 + $0xf0] ss:$8 sps:$4 sm:$0xff]  }
 0x465   :  { %3669 = vmatpush1.bf16.msra.mxu0 %v5294_v31  ;;  %3629 = vmatprep.subr.bf16.mxu1 %v5285_v32  ;;  %v5359_v31 = vcombine.high %v1905_v4, %v1909_v25  ;;  %v1896_v32 = vld [vmem:[#allocation7 + $0x210] sm:$0xff]  ;;  %v5941_v25 = vld [vmem:[#allocation8 + $0xe4] ss:$8 sps:$4 sm:$0xff]  }
 0x466   :  { %3670 = vmatprep.subr.bf16.mxu0 %v5287_v33  ;;  %v1900_v33 = vld [vmem:[#allocation7 + $0x230] sm:$0xff] }
 0x467   :  { %v5936_v4 = vld [vmem:[#allocation8 + $0x1f0] ss:$8 sps:$4 sm:$0xff]  }
 0x468   :  { %3630 = vmatpush1.bf16.msra.mxu1 %v5284_v37  ;;  %v5349_v37 = vcombine.high %v1896_v32, %v1900_v33 }
 0x469   :  { %3671 = vmatpush1.bf16.msra.mxu0 %v5286_v38  ;;  %3631 = vmatprep.subr.bf16.mxu1 %v5405_v39  ;;  %v5351_v38 = vcombine.high %v1897_v34, %v1901_v35  ;;  %v5348_v39 = vcombine.low %v1896_v32, %v1900_v33  ;;  %v5950_v32 = vld [vmem:[#allocation8 + $0x1d4] ss:$8 sps:$4 sm:$0xff]   ;;  %v5945_v33 = vld [vmem:[#allocation8 + $0xd0] ss:$8 sps:$4 sm:$0xff]  }
 0x46a   :  { %3672 = vmatprep.subr.bf16.mxu0 %v5407_v7  ;;  %v5350_v7 = vcombine.low %v1897_v34, %v1901_v35  ;;  %v5948_v34 = vld [vmem:[#allocation8 + $0x1d0] ss:$8 sps:$4 sm:$0xff]   ;;  %v5953_v35 = vld [vmem:[#allocation8 + $0xc4] ss:$8 sps:$4 sm:$0xff]  }
 0x46c   :  { %3632 = vmatpush2.bf16.msra.mxu1 %v5404_v45  ;;  %v5893_v45 = vld [vmem:[#allocation8 + $0x64] ss:$8 sps:$4 sm:$0xff]  }
 0x46d   :  { %3673 = vmatpush2.bf16.msra.mxu0 %v5406_v46  ;;  %3633 = vmatprep.subr.bf16.mxu1 %v5397_v47  ;;  %v5896_v46 = vld [vmem:[#allocation8 + $0x164] ss:$8 sps:$4 sm:$0xff]  }
 0x46e   :  { %3674 = vmatprep.subr.bf16.mxu0 %v5399_v0 }
 0x470   :  { %3634 = vmatpush2.bf16.msra.mxu1 %v5396_v53  ;;  %v5899_v53 = vld [vmem:[#allocation8 + $0x54] ss:$8 sps:$4 sm:$0xff]  }
 0x471   :  { %3675 = vmatpush2.bf16.msra.mxu0 %v5398_v54  ;;  %3635 = vmatprep.subr.bf16.mxu1 %v5389_v55  ;;  %v5902_v54 = vld [vmem:[#allocation8 + $0x154] ss:$8 sps:$4 sm:$0xff]  }
 0x472   :  { %3676 = vmatprep.subr.bf16.mxu0 %v5391_v56 }
 0x474   :  { %3636 = vmatpush2.bf16.msra.mxu1 %v5388_v62  ;;  %v5908_v62 = vld [vmem:[#allocation8 + $0x144] ss:$8 sps:$4 sm:$0xff]  }
 0x475   :  { %3677 = vmatpush2.bf16.msra.mxu0 %v5390_v63  ;;  %3637 = vmatprep.subr.bf16.mxu1 %v5381_v26  ;;  %v5903_v63 = vld [vmem:[#allocation8 + $0x40] ss:$8 sps:$4 sm:$0xff]  }
 0x476   :  { %3678 = vmatprep.subr.bf16.mxu0 %v5383_v1  ;;  %v5906_v26 = vld [vmem:[#allocation8 + $0x140] ss:$8 sps:$4 sm:$0xff]   ;;  %v5911_v1 = vld [vmem:[#allocation8 + $0x34] ss:$8 sps:$4 sm:$0xff]  }
 0x478   :  { %3638 = vmatpush2.bf16.msra.mxu1 %v5380_v8  ;;  %v5920_v8 = vld [vmem:[#allocation8 + $0x124] ss:$8 sps:$4 sm:$0xff]  }
 0x479   :  { %3679 = vmatpush2.bf16.msra.mxu0 %v5382_v9  ;;  %3639 = vmatprep.subr.bf16.mxu1 %v5373_v10  ;;  %v5915_v9 = vld [vmem:[#allocation8 + $0x20] ss:$8 sps:$4 sm:$0xff]  }
 0x47a   :  { %3680 = vmatprep.subr.bf16.mxu0 %v5375_v11  ;;  %v5918_v10 = vld [vmem:[#allocation8 + $0x120] ss:$8 sps:$4 sm:$0xff]   ;;  %v5923_v11 = vld [vmem:[#allocation8 + $0x14] ss:$8 sps:$4 sm:$0xff]  }
 0x47c   :  { %3640 = vmatpush2.bf16.msra.mxu1 %v5372_v15  ;;  %v5932_v15 = vld [vmem:[#allocation8 + $0x104] ss:$8 sps:$4 sm:$0xff]  }
 0x47d   :  { %3681 = vmatpush2.bf16.msra.mxu0 %v5374_v19  ;;  %3641 = vmatprep.subr.bf16.mxu1 %v5365_v20  ;;  %v5927_v19 = vld [vmem:[#allocation8] ss:$8 sps:$4 sm:$0xff]  }
 0x47e   :  { %3682 = vmatprep.subr.bf16.mxu0 %v5367_v21  ;;  %v5930_v20 = vld [vmem:[#allocation8 + $0x100] ss:$8 sps:$4 sm:$0xff]   ;;  %v5935_v21 = vld [vmem:[#allocation8 + $0xf4] ss:$8 sps:$4 sm:$0xff]  }
 0x480   :  { %3642 = vmatpush2.bf16.msra.mxu1 %v5364_v27  ;;  %v5944_v27 = vld [vmem:[#allocation8 + $0x1e4] ss:$8 sps:$4 sm:$0xff]  }
 0x481   :  { %3683 = vmatpush2.bf16.msra.mxu0 %v5366_v29  ;;  %3643 = vmatprep.subr.bf16.mxu1 %v5357_v30  ;;  %v5939_v29 = vld [vmem:[#allocation8 + $0xe0] ss:$8 sps:$4 sm:$0xff]  }
 0x482   :  { %3684 = vmatprep.subr.bf16.mxu0 %v5359_v31  ;;  %v5942_v30 = vld [vmem:[#allocation8 + $0x1e0] ss:$8 sps:$4 sm:$0xff]   ;;  %v5947_v31 = vld [vmem:[#allocation8 + $0xd4] ss:$8 sps:$4 sm:$0xff]  }
 0x484   :  { %3644 = vmatpush2.bf16.msra.mxu1 %v5356_v61  ;;  %v5956_v61 = vld [vmem:[#allocation8 + $0x1c4] ss:$8 sps:$4 sm:$0xff]  }
 0x485   :  { %3685 = vmatpush2.bf16.msra.mxu0 %v5358_v36  ;;  %3645 = vmatprep.subr.bf16.mxu1 %v5349_v37  ;;  %v5951_v36 = vld [vmem:[#allocation8 + $0xc0] ss:$8 sps:$4 sm:$0xff]  }
 0x486   :  { %3686 = vmatprep.subr.bf16.mxu0 %v5351_v38  ;;  %v5954_v37 = vld [vmem:[#allocation8 + $0x1c0] ss:$8 sps:$4 sm:$0xff]   ;;  %v5959_v38 = vld [vmem:[#allocation8 + $0xb4] ss:$8 sps:$4 sm:$0xff]  }
 0x488   :  { %3646 = vmatpush2.bf16.msra.mxu1 %v5348_v39  ;;  %v5962_v39 = vld [vmem:[#allocation8 + $0x1b4] ss:$8 sps:$4 sm:$0xff]  }
 0x489   :  { %3687 = vmatpush2.bf16.msra.mxu0 %v5350_v7  ;;  %4559 = vmatprep.subr.bf16.mxu1 %v5887_v41  ;;  %v5957_v7 = vld [vmem:[#allocation8 + $0xb0] ss:$8 sps:$4 sm:$0xff]  }
 0x48a   :  { %4600 = vmatprep.subr.bf16.mxu0 %v5890_v42  ;;  %v5960_v41 = vld [vmem:[#allocation8 + $0x1b0] ss:$8 sps:$4 sm:$0xff]   ;;  %v5965_v42 = vld [vmem:[#allocation8 + $0xa4] ss:$8 sps:$4 sm:$0xff]  }
 0x48b   :  { %3648 = vmatmul.mubr.bf16.vlgmr.msra.gmra.mxu1 %v6433_v40  ;;  %v6440_v47 = vpop.f32.mrf.mxu1  ;;  %v6442_v0 = vpop.f32.mrf.mxu0 }
 0x48c   :  { %3689 = vmatmul.mubr.bf16.vlgmr.msra.gmra.mxu0 %v6433_v40  ;;  %4560 = vmatpush1.bf16.msra.mxu1 %v5885_v43  ;;  %v5900_v40 = vld [vmem:[#allocation8 + $0x150] ss:$8 sps:$4 sm:$0xff]   ;;  %v5968_v43 = vld [vmem:[#allocation8 + $0x1a4] ss:$8 sps:$4 sm:$0xff]  }
 0x48d   :  { %v6445_v50 = vpop.f32.mrf.mxu1  ;;  %v6447_v51 = vpop.f32.mrf.mxu0  ;;  %4601 = vmatpush1.bf16.msra.mxu0 %v5888_v44  ;;  %4561 = vmatprep.subr.bf16.mxu1 %v5893_v45  ;;  %v5963_v44 = vld [vmem:[#allocation8 + $0xa0] ss:$8 sps:$4 sm:$0xff]  }
 0x48e   :  { %4602 = vmatprep.subr.bf16.mxu0 %v5896_v46  ;;  %v5966_v45 = vld [vmem:[#allocation8 + $0x1a0] ss:$8 sps:$4 sm:$0xff]   ;;  %v5971_v46 = vld [vmem:[#allocation8 + $0x94] ss:$8 sps:$4 sm:$0xff]  }
 0x48f   :  { %v2767_v55 = vpop.f32.mrf.mxu1  ;;  %v2808_v56 = vpop.f32.mrf.mxu0 }
 0x490   :  { %4562 = vmatpush1.bf16.msra.mxu1 %v5891_v48  ;;  %v5974_v48 = vld [vmem:[#allocation8 + $0x194] ss:$8 sps:$4 sm:$0xff]   ;;  %v5980_v55 = vld [vmem:[#allocation8 + $0x184] ss:$8 sps:$4 sm:$0xff]   ;;  %v5975_v56 = vld [vmem:[#allocation8 + $0x80] ss:$8 sps:$4 sm:$0xff]  }
 0x491   :  { %v2768_v58 = vpop.f32.mrf.mxu1  ;;  %v2809_v59 = vpop.f32.mrf.mxu0  ;;  %4603 = vmatpush1.bf16.msra.mxu0 %v5894_v52  ;;  %4563 = vmatprep.subr.bf16.mxu1 %v5899_v53  ;;  %v5969_v52 = vld [vmem:[#allocation8 + $0x90] ss:$8 sps:$4 sm:$0xff]  }
 0x492   :  { %4604 = vmatprep.subr.bf16.mxu0 %v5902_v54  ;;  %v5972_v53 = vld [vmem:[#allocation8 + $0x190] ss:$8 sps:$4 sm:$0xff]   ;;  %v5977_v54 = vld [vmem:[#allocation8 + $0x84] ss:$8 sps:$4 sm:$0xff]   ;;  %v5983_v58 = vld [vmem:[#allocation8 + $0x274] ss:$8 sps:$4 sm:$0xff]  }
 0x493   :  { %v5986_v59 = vld [vmem:[#allocation8 + $0x374] ss:$8 sps:$4 sm:$0xff]  }
 0x494   :  { %4564 = vmatpush1.bf16.msra.mxu1 %v5897_v57  ;;  %v5978_v57 = vld [vmem:[#allocation8 + $0x180] ss:$8 sps:$4 sm:$0xff]  }
 0x495   :  { %4605 = vmatpush1.bf16.msra.mxu0 %v5900_v40  ;;  %4565 = vmatprep.subr.bf16.mxu1 %v5905_v60 }
 0x496   :  { %4606 = vmatprep.subr.bf16.mxu0 %v5908_v62 }
 0x498   :  { %4566 = vmatpush1.bf16.msra.mxu1 %v5903_v63 }
 0x499   :  { %4607 = vmatpush1.bf16.msra.mxu0 %v5906_v26  ;;  %4567 = vmatprep.subr.bf16.mxu1 %v5911_v1 }
 0x49a   :  { %4608 = vmatprep.subr.bf16.mxu0 %v5914_v2 }
 0x49c   :  { %4568 = vmatpush1.bf16.msra.mxu1 %v5909_v3 }
 0x49d   :  { %4609 = vmatpush1.bf16.msra.mxu0 %v5912_v5  ;;  %4569 = vmatprep.subr.bf16.mxu1 %v5917_v6  ;;  %v6460_v5 = vld [vmem:[%s6511_s9] sm:$0xff] }
 0x49e   :  { %4610 = vmatprep.subr.bf16.mxu0 %v5920_v8  ;;  %v3702_v6 = vrot.slane %v6460_v5, %v6376_v18 }
 0x4a0   :  { %4570 = vmatpush1.bf16.msra.mxu1 %v5915_v9  ;;  %v3710_v9 = vrot.slane %v6460_v5, %v6387_v28 }
 0x4a1   :  { %4611 = vmatpush1.bf16.msra.mxu0 %v5918_v10  ;;  %4571 = vmatprep.subr.bf16.mxu1 %v5923_v11 }
 0x4a2   :  { %4612 = vmatprep.subr.bf16.mxu0 %v5926_v12  ;;  %v3706_v12 = vrot.slane %v6460_v5, %v6373_v17 }
 0x4a4   :  { %4572 = vmatpush1.bf16.msra.mxu1 %v5921_v13 }
 0x4a5   :  { %4613 = vmatpush1.bf16.msra.mxu0 %v5924_v49  ;;  %4573 = vmatprep.subr.bf16.mxu1 %v5929_v14  ;;  %v3714_v14 = vrot.slane %v6460_v5, %v6384_v24 }
 0x4a6   :  { %4614 = vmatprep.subr.bf16.mxu0 %v5932_v15 }
 0x4a8   :  { %4574 = vmatpush1.bf16.msra.mxu1 %v5927_v19 }
 0x4a9   :  { %4615 = vmatpush1.bf16.msra.mxu0 %v5930_v20  ;;  %4575 = vmatprep.subr.bf16.mxu1 %v5935_v21 }
 0x4aa   :  { %4616 = vmatprep.subr.bf16.mxu0 %v5938_v22 }
 0x4ac   :  { %4576 = vmatpush2.bf16.msra.mxu1 %v5933_v23 }
 0x4ad   :  { %4617 = vmatpush2.bf16.msra.mxu0 %v5936_v4  ;;  %4577 = vmatprep.subr.bf16.mxu1 %v5941_v25 }
 0x4ae   :  { %4618 = vmatprep.subr.bf16.mxu0 %v5944_v27 }
 0x4b0   :  { %4578 = vmatpush2.bf16.msra.mxu1 %v5939_v29 }
 0x4b1   :  { %4619 = vmatpush2.bf16.msra.mxu0 %v5942_v30  ;;  %4579 = vmatprep.subr.bf16.mxu1 %v5947_v31 }
 0x4b2   :  { %4620 = vmatprep.subr.bf16.mxu0 %v5950_v32 }
 0x4b4   :  { %4580 = vmatpush2.bf16.msra.mxu1 %v5945_v33 }
 0x4b5   :  { %4621 = vmatpush2.bf16.msra.mxu0 %v5948_v34  ;;  %4581 = vmatprep.subr.bf16.mxu1 %v5953_v35 }
 0x4b6   :  { %4622 = vmatprep.subr.bf16.mxu0 %v5956_v61 }
 0x4b8   :  { %4582 = vmatpush2.bf16.msra.mxu1 %v5951_v36  ;;  %v5984_v36 = vld [vmem:[#allocation8 + $0x370] ss:$8 sps:$4 sm:$0xff]  }
 0x4b9   :  { %4623 = vmatpush2.bf16.msra.mxu0 %v5954_v37  ;;  %4583 = vmatprep.subr.bf16.mxu1 %v5959_v38  ;;  %v5989_v37 = vld [vmem:[#allocation8 + $0x264] ss:$8 sps:$4 sm:$0xff]  }
 0x4ba   :  { %4624 = vmatprep.subr.bf16.mxu0 %v5962_v39  ;;  %v5992_v39 = vld [vmem:[#allocation8 + $0x364] ss:$8 sps:$4 sm:$0xff]  }
 0x4bc   :  { %4584 = vmatpush2.bf16.msra.mxu1 %v5957_v7  ;;  %v5987_v7 = vld [vmem:[#allocation8 + $0x260] ss:$8 sps:$4 sm:$0xff]  }
 0x4bd   :  { %4625 = vmatpush2.bf16.msra.mxu0 %v5960_v41  ;;  %4585 = vmatprep.subr.bf16.mxu1 %v5965_v42  ;;  %v5990_v41 = vld [vmem:[#allocation8 + $0x360] ss:$8 sps:$4 sm:$0xff]   ;;  %v5995_v42 = vld [vmem:[#allocation8 + $0x254] ss:$8 sps:$4 sm:$0xff]  }
 0x4be   :  { %4626 = vmatprep.subr.bf16.mxu0 %v5968_v43  ;;  %v5998_v43 = vld [vmem:[#allocation8 + $0x354] ss:$8 sps:$4 sm:$0xff]  }
 0x4c0   :  { %4586 = vmatpush2.bf16.msra.mxu1 %v5963_v44  ;;  %v5993_v44 = vld [vmem:[#allocation8 + $0x250] ss:$8 sps:$4 sm:$0xff]  }
 0x4c1   :  { %4627 = vmatpush2.bf16.msra.mxu0 %v5966_v45  ;;  %4587 = vmatprep.subr.bf16.mxu1 %v5971_v46  ;;  %v5996_v45 = vld [vmem:[#allocation8 + $0x350] ss:$8 sps:$4 sm:$0xff]   ;;  %v6001_v46 = vld [vmem:[#allocation8 + $0x244] ss:$8 sps:$4 sm:$0xff]  }
 0x4c2   :  { %4628 = vmatprep.subr.bf16.mxu0 %v5974_v48  ;;  %v6004_v48 = vld [vmem:[#allocation8 + $0x344] ss:$8 sps:$4 sm:$0xff]  }
 0x4c4   :  { %4588 = vmatpush2.bf16.msra.mxu1 %v5969_v52  ;;  %v5999_v52 = vld [vmem:[#allocation8 + $0x240] ss:$8 sps:$4 sm:$0xff]  }
 0x4c5   :  { %4629 = vmatpush2.bf16.msra.mxu0 %v5972_v53  ;;  %4589 = vmatprep.subr.bf16.mxu1 %v5977_v54  ;;  %v6002_v53 = vld [vmem:[#allocation8 + $0x340] ss:$8 sps:$4 sm:$0xff]   ;;  %v6007_v54 = vld [vmem:[#allocation8 + $0x234] ss:$8 sps:$4 sm:$0xff]  }
 0x4c6   :  { %4630 = vmatprep.subr.bf16.mxu0 %v5980_v55  ;;  %v6010_v55 = vld [vmem:[#allocation8 + $0x334] ss:$8 sps:$4 sm:$0xff]  }
 0x4c8   :  { %4590 = vmatpush2.bf16.msra.mxu1 %v5975_v56  ;;  %v6005_v56 = vld [vmem:[#allocation8 + $0x230] ss:$8 sps:$4 sm:$0xff]  }
 0x4c9   :  { %4631 = vmatpush2.bf16.msra.mxu0 %v5978_v57  ;;  %4641 = vmatprep.subr.bf16.mxu1 %v5983_v58  ;;  %v6008_v57 = vld [vmem:[#allocation8 + $0x330] ss:$8 sps:$4 sm:$0xff]   ;;  %v6013_v58 = vld [vmem:[#allocation8 + $0x224] ss:$8 sps:$4 sm:$0xff]  }
 0x4ca   :  { %4682 = vmatprep.subr.bf16.mxu0 %v5986_v59  ;;  %v6016_v59 = vld [vmem:[#allocation8 + $0x324] ss:$8 sps:$4 sm:$0xff]  }
 0x4cb   :  { %v6449_v40 = vpop.f32.mrf.mxu1  ;;  %v6451_v60 = vpop.f32.mrf.mxu0 }
 0x4cd   :  { %v6453_v62 = vpop.f32.mrf.mxu1  ;;  %v6455_v63 = vpop.f32.mrf.mxu0 }
 0x4cf   :  { %v2849_v26 = vpop.f32.mrf.mxu1  ;;  %v2890_v1 = vpop.f32.mrf.mxu0 }
 0x4d0   :  { %v6011_v26 = vld [vmem:[#allocation8 + $0x220] ss:$8 sps:$4 sm:$0xff]  }
 0x4d1   :  { %v2850_v2 = vpop.f32.mrf.mxu1  ;;  %v2891_v3 = vpop.f32.mrf.mxu0  ;;  %v6014_v1 = vld [vmem:[#allocation8 + $0x320] ss:$8 sps:$4 sm:$0xff]  }
 0x4d2   :  { %v6019_v2 = vld [vmem:[#allocation8 + $0x214] ss:$8 sps:$4 sm:$0xff]  }
 0x4d3   :  { %v6022_v3 = vld [vmem:[#allocation8 + $0x314] ss:$8 sps:$4 sm:$0xff]  }
 0x50b   :  { %v3567_v8 = vpop.f32.mrf.mxu1 }
 0x50c   :  { %v3568_v10 = vadd.f32 %v3567_v8, %v6440_v47  ;;  %v3608_v11 = vpop.f32.mrf.mxu0  ;;  %v6020_v8 = vld [vmem:[#allocation8 + $0x310] ss:$8 sps:$4 sm:$0xff]  }
 0x50d   :  { %v3609_v13 = vadd.f32 %v3608_v11, %v6442_v0  ;;  %v3569_v49 = vpop.f32.mrf.mxu1  ;;  %v6023_v11 = vld [vmem:[#allocation8 + $0x200] ss:$8 sps:$4 sm:$0xff]  }
 0x50e   :  { %v3739_v15 = vadd.f32 %v3702_v6, %v3568_v10  ;;  %v3570_v19 = vadd.f32 %v3569_v49, %v6445_v50  ;;  %v3610_v20 = vpop.f32.mrf.mxu0  ;;  %v6017_v6 = vld [vmem:[#allocation8 + $0x210] ss:$8 sps:$4 sm:$0xff]   ;;  %v6028_v10 = vld [vmem:[#allocation8 + $0x304] ss:$8 sps:$4 sm:$0xff]   ;;  %v6034_v49 = vld [vmem:[#allocation8 + $0x3f4] ss:$8 sps:$4 sm:$0xff]  }
 0x50f   :  { %v3741_v21 = vadd.f32 %v3710_v9, %v3609_v13  ;;  %v3611_v22 = vadd.f32 %v3610_v20, %v6447_v51  ;;  %v3571_v28 = vpop.f32.mrf.mxu1  ;;  %v5981_v51 = vld [vmem:[#allocation8 + $0x270] ss:$8 sps:$4 sm:$0xff]   ;;  %v6025_v9 = vld [vmem:[#allocation8 + $0x204] ss:$8 sps:$4 sm:$0xff]   ;;  %v6031_v13 = vld [vmem:[#allocation8 + $0x2f4] ss:$8 sps:$4 sm:$0xff]  }
 0x510   :  { %vm3747_vm7 = vcmp.ge.f32.partialorder %v3739_v15, 0.0  ;;  %v3755_v47 = vmul.f32 0.2, %v3739_v15  ;;  %v3740_v23 = vadd.f32 %v3706_v12, %v3570_v19  ;;  %v3612_v4 = vpop.f32.mrf.mxu0  ;;  %v6026_v12 = vld [vmem:[#allocation8 + $0x300] ss:$8 sps:$4 sm:$0xff]  }
 0x511   :  { %vm3749_vm8 = vcmp.ge.f32.partialorder %v3741_v21, 0.0  ;;  %v3757_v25 = vmul.f32 0.2, %v3741_v21  ;;  %v3742_v27 = vadd.f32 %v3714_v14, %v3611_v22  ;;  %v3572_v0 = vpop.f32.mrf.mxu1  ;;  %v6029_v14 = vld [vmem:[#allocation8 + $0x2f0] ss:$8 sps:$4 sm:$0xff]  }
 0x512   :  { %v3756_v29 = vmul.f32 0.2, %v3740_v23  ;;  %v3613_v30 = vpop.f32.mrf.mxu0  ;;  %vm3748_vm9 = vcmp.ge.f32.partialorder %v3740_v23, 0.0  ;;  %v3763_v24 = vsel %vm3747_vm7, %v3739_v15, %v3755_v47  ;;  %v6032_v15 = vld [vmem:[#allocation8 + $0x3f0] ss:$8 sps:$4 sm:$0xff]  }
 0x513   :  { %v3758_v31 = vmul.f32 0.2, %v3742_v27  ;;  %vm3750_vm10 = vcmp.ge.f32.partialorder %v3742_v27, 0.0  ;;  %v3765_v50 = vsel %vm3749_vm8, %v3741_v21, %v3757_v25  ;;  %v3771_v35 = vpack.c.bf16 %v3763_v24, %v3763_v24  ;;  %v6037_v19 = vld [vmem:[#allocation8 + $0x2e4] ss:$8 sps:$4 sm:$0xff]  }
 0x514   :  { %v3764_v32 = vsel %vm3748_vm9, %v3740_v23, %v3756_v29  ;;  %v3773_v38 = vpack.c.bf16 %v3765_v50, %v3765_v50  ;;  %v6040_v20 = vld [vmem:[#allocation8 + $0x3e4] ss:$8 sps:$4 sm:$0xff]   ;;  %v6035_v21 = vld [vmem:[#allocation8 + $0x2e0] ss:$8 sps:$4 sm:$0xff]   ;;  %v6043_v28 = vld [vmem:[#allocation8 + $0x2d4] ss:$8 sps:$4 sm:$0xff]  }
 0x515   :  { %v3772_v33 = vpack.c.bf16 %v3764_v32, %v3764_v32  ;;  %v3766_v34 = vsel %vm3750_vm10, %v3742_v27, %v3758_v31  ;;  %v6038_v22 = vld [vmem:[#allocation8 + $0x3e0] ss:$8 sps:$4 sm:$0xff]   ;;  %v6046_v47 = vld [vmem:[#allocation8 + $0x3d4] ss:$8 sps:$4 sm:$0xff]   ;;  %v6041_v23 = vld [vmem:[#allocation8 + $0x2d0] ss:$8 sps:$4 sm:$0xff]  }
 0x516   :  { %v3774_v61 = vpack.c.bf16 %v3766_v34, %v3766_v34  ;;  %v6044_v4 = vld [vmem:[#allocation8 + $0x3d0] ss:$8 sps:$4 sm:$0xff]   ;;  %v6049_v25 = vld [vmem:[#allocation8 + $0x2c4] ss:$8 sps:$4 sm:$0xff]   ;;  %v6047_v0 = vld [vmem:[#allocation8 + $0x2c0] ss:$8 sps:$4 sm:$0xff]  }
 0x517   :  { %4591 = vmatprep.mubr.bf16.mxu1 %v3772_v33  ;;  %v6052_v27 = vld [vmem:[#allocation8 + $0x3c4] ss:$8 sps:$4 sm:$0xff]   ;;  %v6050_v29 = vld [vmem:[#allocation8 + $0x3c0] ss:$8 sps:$4 sm:$0xff]   ;;  %v6055_v30 = vld [vmem:[#allocation8 + $0x2b4] ss:$8 sps:$4 sm:$0xff]  }
 0x518   :  { %4632 = vmatprep.mubr.bf16.mxu0 %v3774_v61  ;;  %4592 = vmatmul.mubr.bf16.vlgmr.msra.gmra.mxu1 %v3771_v35  ;;  %v6058_v24 = vld [vmem:[#allocation8 + $0x3b4] ss:$8 sps:$4 sm:$0xff]   ;;  %v6053_v31 = vld [vmem:[#allocation8 + $0x2b0] ss:$8 sps:$4 sm:$0xff]   ;;  %v3717_v32 = vsub.s32 4, %v6370_v16  ;;  %v3725_v34 = vsub.s32 6, %v6370_v16 }
 0x519   :  { %4633 = vmatmul.mubr.bf16.vlgmr.msra.gmra.mxu0 %v3773_v38  ;;  %4642 = vmatpush1.bf16.msra.mxu1 %v5981_v51  ;;  %v6056_v50 = vld [vmem:[#allocation8 + $0x3b0] ss:$8 sps:$4 sm:$0xff]   ;;  %v6061_v33 = vld [vmem:[#allocation8 + $0x2a4] ss:$8 sps:$4 sm:$0xff]   ;;  %v3721_v35 = vsub.s32 5, %v6370_v16 }
 0x51a   :  { %4683 = vmatpush1.bf16.msra.mxu0 %v5984_v36  ;;  %4643 = vmatprep.subr.bf16.mxu1 %v5989_v37  ;;  %v6064_v51 = vld [vmem:[#allocation8 + $0x3a4] ss:$8 sps:$4 sm:$0xff]   ;;  %v6059_v61 = vld [vmem:[#allocation8 + $0x2a0] ss:$8 sps:$4 sm:$0xff]   ;;  %v3729_v36 = vsub.s32 7, %v6370_v16  ;;  %v3718_v37 = vrot.slane %v6460_v5, %v3717_v32 }
 0x51b   :  { %4684 = vmatprep.subr.bf16.mxu0 %v5992_v39  ;;  %v6062_v38 = vld [vmem:[#allocation8 + $0x3a0] ss:$8 sps:$4 sm:$0xff]   ;;  %v6067_v39 = vld [vmem:[#allocation8 + $0x294] ss:$8 sps:$4 sm:$0xff]  }
 0x51c   :  { %v3730_v16 = vrot.slane %v6460_v5, %v3729_v36  ;;  %v6091_v32 = vld [vmem:[#allocation10 + $0x40] sm:$0xff]  }
 0x51d   :  { %4644 = vmatpush1.bf16.msra.mxu1 %v5987_v7 }
 0x51e   :  { %4685 = vmatpush1.bf16.msra.mxu0 %v5990_v41  ;;  %4645 = vmatprep.subr.bf16.mxu1 %v5995_v42  ;;  %v3726_v41 = vrot.slane %v6460_v5, %v3725_v34  ;;  %v6070_v42 = vld [vmem:[#allocation8 + $0x394] ss:$8 sps:$4 sm:$0xff]  }
 0x51f   :  { %4686 = vmatprep.subr.bf16.mxu0 %v5998_v43 }
 0x521   :  { %4646 = vmatpush1.bf16.msra.mxu1 %v5993_v44 }
 0x522   :  { %4687 = vmatpush1.bf16.msra.mxu0 %v5996_v45  ;;  %4647 = vmatprep.subr.bf16.mxu1 %v6001_v46  ;;  %v3722_v45 = vrot.slane %v6460_v5, %v3721_v35 }
 0x523   :  { %4688 = vmatprep.subr.bf16.mxu0 %v6004_v48 }
 0x525   :  { %4648 = vmatpush1.bf16.msra.mxu1 %v5999_v52  ;;  %v6065_v52 = vld [vmem:[#allocation8 + $0x290] ss:$8 sps:$4 sm:$0xff]  }
 0x526   :  { %4689 = vmatpush1.bf16.msra.mxu0 %v6002_v53  ;;  %4649 = vmatprep.subr.bf16.mxu1 %v6007_v54 }
 0x527   :  { %4690 = vmatprep.subr.bf16.mxu0 %v6010_v55 }
 0x529   :  { %4650 = vmatpush1.bf16.msra.mxu1 %v6005_v56  ;;  %v6068_v56 = vld [vmem:[#allocation8 + $0x390] ss:$8 sps:$4 sm:$0xff]  }
 0x52a   :  { %4691 = vmatpush1.bf16.msra.mxu0 %v6008_v57  ;;  %4651 = vmatprep.subr.bf16.mxu1 %v6013_v58  ;;  %v6073_v57 = vld [vmem:[#allocation8 + $0x284] ss:$8 sps:$4 sm:$0xff]  }
 0x52b   :  { %4692 = vmatprep.subr.bf16.mxu0 %v6016_v59 }
 0x52d   :  { %4652 = vmatpush1.bf16.msra.mxu1 %v6011_v26  ;;  %v6076_v26 = vld [vmem:[#allocation8 + $0x384] ss:$8 sps:$4 sm:$0xff]  }
 0x52e   :  { %4693 = vmatpush1.bf16.msra.mxu0 %v6014_v1  ;;  %4653 = vmatprep.subr.bf16.mxu1 %v6019_v2 }
 0x52f   :  { %4694 = vmatprep.subr.bf16.mxu0 %v6022_v3 }
 0x531   :  { %4654 = vmatpush1.bf16.msra.mxu1 %v6017_v6 }
 0x532   :  { %4695 = vmatpush1.bf16.msra.mxu0 %v6020_v8  ;;  %4655 = vmatprep.subr.bf16.mxu1 %v6025_v9 }
 0x533   :  { %4696 = vmatprep.subr.bf16.mxu0 %v6028_v10  ;;  %v6074_v10 = vld [vmem:[#allocation8 + $0x380] ss:$8 sps:$4 sm:$0xff]  }
 0x535   :  { %4656 = vmatpush1.bf16.msra.mxu1 %v6023_v11 }
 0x536   :  { %4697 = vmatpush1.bf16.msra.mxu0 %v6026_v12  ;;  %4657 = vmatprep.subr.bf16.mxu1 %v6031_v13 }
 0x537   :  { %4698 = vmatprep.subr.bf16.mxu0 %v6034_v49 }
 0x539   :  { %4658 = vmatpush2.bf16.msra.mxu1 %v6029_v14 }
 0x53a   :  { %4699 = vmatpush2.bf16.msra.mxu0 %v6032_v15  ;;  %4659 = vmatprep.subr.bf16.mxu1 %v6037_v19 }
 0x53b   :  { %4700 = vmatprep.subr.bf16.mxu0 %v6040_v20 }
 0x53d   :  { %4660 = vmatpush2.bf16.msra.mxu1 %v6035_v21  ;;  %v6077_v21 = vld [vmem:[#allocation10 + $0x78] sm:$0xff]  }
 0x53e   :  { %4701 = vmatpush2.bf16.msra.mxu0 %v6038_v22  ;;  %4661 = vmatprep.subr.bf16.mxu1 %v6043_v28  ;;  %v6078_v22 = vld [vmem:[#allocation10 + $0x38] sm:$0xff]   ;;  %v6079_v28 = vld [vmem:[#allocation10 + $0x70] sm:$0xff]  }
 0x53f   :  { %4702 = vmatprep.subr.bf16.mxu0 %v6046_v47  ;;  %v6080_v47 = vld [vmem:[#allocation10 + $0x30] sm:$0xff]  }
 0x541   :  { %4662 = vmatpush2.bf16.msra.mxu1 %v6041_v23  ;;  %v6081_v23 = vld [vmem:[#allocation10 + $0x68] sm:$0xff]  }
 0x542   :  { %4703 = vmatpush2.bf16.msra.mxu0 %v6044_v4  ;;  %4663 = vmatprep.subr.bf16.mxu1 %v6049_v25  ;;  %v6082_v4 = vld [vmem:[#allocation10 + $0x28] sm:$0xff]   ;;  %v6083_v25 = vld [vmem:[#allocation10 + $0x60] sm:$0xff]  }
 0x543   :  { %4704 = vmatprep.subr.bf16.mxu0 %v6052_v27  ;;  %v6084_v27 = vld [vmem:[#allocation10 + $0x20] sm:$0xff]  }
 0x545   :  { %4664 = vmatpush2.bf16.msra.mxu1 %v6047_v0  ;;  %v6085_v0 = vld [vmem:[#allocation10 + $0x58] sm:$0xff]  }
 0x546   :  { %4705 = vmatpush2.bf16.msra.mxu0 %v6050_v29  ;;  %4665 = vmatprep.subr.bf16.mxu1 %v6055_v30  ;;  %v6086_v29 = vld [vmem:[#allocation10 + $0x18] sm:$0xff]   ;;  %v6087_v30 = vld [vmem:[#allocation10 + $0x50] sm:$0xff]  }
 0x547   :  { %4706 = vmatprep.subr.bf16.mxu0 %v6058_v24  ;;  %v6088_v24 = vld [vmem:[#allocation10 + $0x10] sm:$0xff]  }
 0x549   :  { %4666 = vmatpush2.bf16.msra.mxu1 %v6053_v31  ;;  %v6089_v31 = vld [vmem:[#allocation10 + $0x48] sm:$0xff]  }
 0x54a   :  { %4707 = vmatpush2.bf16.msra.mxu0 %v6056_v50  ;;  %4667 = vmatprep.subr.bf16.mxu1 %v6061_v33  ;;  %v6090_v50 = vld [vmem:[#allocation10 + $0x8] sm:$0xff]   ;;  %v6092_v33 = vld [vmem:[#allocation10] sm:$0xff]  }
 0x54b   :  { %v3649_v7 = vpop.f32.mrf.mxu1  ;;  %4708 = vmatprep.subr.bf16.mxu0 %v6064_v51 }
 0x54c   :  { %v3650_v43 = vadd.f32 %v3649_v7, %v6449_v40  ;;  %v3690_v44 = vpop.f32.mrf.mxu0  ;;  %v3907_v7 = vld [vmem:[%s6513_s11] sm:$0x3]  ;;  %s6257_s11 = smov [#allocation11]  }
 0x54d   :  { %v3691_v46 = vadd.f32 %v3690_v44, %v6451_v60  ;;  %v3651_v48 = vpop.f32.mrf.mxu1  ;;  %4668 = vmatpush2.bf16.msra.mxu1 %v6059_v61  ;;  %s4925_s27 = sshll.u32 %s6257_s11, 4  ;;  %s4926_s27 = int_to_ptr.vmem [resolvable:$true] %s4925_s27 }
 0x54e   :  { %v3743_v53 = vadd.f32 %v3718_v37, %v3650_v43  ;;  %v3652_v54 = vadd.f32 %v3651_v48, %v6453_v62  ;;  %v3692_v55 = vpop.f32.mrf.mxu0  ;;  %4709 = vmatpush2.bf16.msra.mxu0 %v6062_v38  ;;  %4669 = vmatprep.subr.bf16.mxu1 %v6067_v39  ;;  %v6071_v62 = vld [vmem:[#allocation8 + $0x280] ss:$8 sps:$4 sm:$0xff]   ;;  %s6193_s29 = scalar_lea.vmem %s4926_s27, 64  ;;  %p6198_p12 = scmp.lt.s32.totalorder %s4926_s27, %s4926_s27 }
 0x54f   :  { %v3745_v58 = vadd.f32 %v3726_v41, %v3691_v46  ;;  %v3693_v40 = vadd.f32 %v3692_v55, %v6455_v63  ;;  %v3653_v59 = vpop.f32.mrf.mxu1  ;;  %4710 = vmatprep.subr.bf16.mxu0 %v6070_v42  ;;  %v3912_v41 = vrot.slane %v3907_v7, %v6376_v18  ;;  %v3916_v42 = vrot.slane %v3907_v7, %v6373_v17  ;;  %p6194_p11 = scmp.ne.s32.totalorder %s4926_s27, %s6193_s29  ;;  %p6199_p13 = scmp.lt.s32.totalorder %s6193_s29, %s6193_s29 }
 0x550   :  { %vm3751_vm11 = vcmp.ge.f32.partialorder %v3743_v53, 0.0  ;;  %v3759_v60 = vmul.f32 0.2, %v3743_v53  ;;  %v3744_v1 = vadd.f32 %v3722_v45, %v3652_v54  ;;  %v3694_v5 = vpop.f32.mrf.mxu0 }
 0x551   :  { %vm3753_vm12 = vcmp.ge.f32.partialorder %v3745_v58, 0.0  ;;  %v3761_v2 = vmul.f32 0.2, %v3745_v58  ;;  %v3746_v3 = vadd.f32 %v3730_v16, %v3693_v40  ;;  %v3654_v6 = vpop.f32.mrf.mxu1  ;;  %4670 = vmatpush2.bf16.msra.mxu1 %v6065_v52  ;;  %p6200_p0 = por %p6199_p13, %p6198_p12 }
 0x552   :  { %v3760_v8 = vmul.f32 0.2, %v3744_v1  ;;  %v3695_v9 = vpop.f32.mrf.mxu0  ;;  %4711 = vmatpush2.bf16.msra.mxu0 %v6068_v56  ;;  %4671 = vmatprep.subr.bf16.mxu1 %v6073_v57  ;;  %vm3752_vm13 = vcmp.ge.f32.partialorder %v3744_v1, 0.0  ;;  %v3767_v63 = vsel %vm3751_vm11, %v3743_v53, %v3759_v60 }
 0x553   :  { %v3762_v11 = vmul.f32 0.2, %v3746_v3  ;;  %4712 = vmatprep.subr.bf16.mxu0 %v6076_v26  ;;  %vm3754_vm14 = vcmp.ge.f32.partialorder %v3746_v3, 0.0  ;;  %v3769_v12 = vsel %vm3753_vm12, %v3745_v58, %v3761_v2  ;;  %v3775_v15 = vpack.c.bf16 %v3767_v63, %v3767_v63  ;;  %p6201_p1 = pnand %p6200_p0, %p6194_p11 }
 0x554   :  { %v3768_v13 = vsel %vm3752_vm13, %v3744_v1, %v3760_v8  ;;  %v3777_v20 = vpack.c.bf16 %v3769_v12, %v3769_v12 }
 0x555   :  { %4672 = vmatpush2.bf16.msra.mxu1 %v6071_v62  ;;  %v3776_v49 = vpack.c.bf16 %v3768_v13, %v3768_v13  ;;  %v3770_v14 = vsel %vm3754_vm14, %v3746_v3, %v3762_v11 }
 0x556   :  { %4713 = vmatpush2.bf16.msra.mxu0 %v6074_v10  ;;  %v3778_v19 = vpack.c.bf16 %v3770_v14, %v3770_v14  ;;  %5554 = vmatprep.subr.bf16.mxu1 %v6077_v21 }
 0x557   :  { %4673 = vmatprep.mubr.bf16.mxu1 %v3776_v49 }
 0x558   :  { %4714 = vmatprep.mubr.bf16.mxu0 %v3778_v19  ;;  %4674 = vmatmul.mubr.bf16.vlgmr.msra.gmra.mxu1 %v3775_v15 }
 0x559   :  { %4715 = vmatmul.mubr.bf16.vlgmr.msra.gmra.mxu0 %v3777_v20  ;;  %5555 = vmatpush3.bf16.msra.mxu1 %v6078_v22 }
 0x55a   :  { %5556 = vmatprep.subr.bf16.mxu1 %v6079_v28 }
 0x55d   :  { %5557 = vmatpush3.bf16.msra.mxu1 %v6080_v47 }
 0x55e   :  { %5558 = vmatprep.subr.bf16.mxu1 %v6081_v23 }
 0x561   :  { %5559 = vmatpush3.bf16.msra.mxu1 %v6082_v4 }
 0x562   :  { %5560 = vmatprep.subr.bf16.mxu1 %v6083_v25 }
 0x565   :  { %5561 = vmatpush3.bf16.msra.mxu1 %v6084_v27 }
 0x566   :  { %5562 = vmatprep.subr.bf16.mxu1 %v6085_v0 }
 0x569   :  { %5563 = vmatpush3.bf16.msra.mxu1 %v6086_v29 }
 0x56a   :  { %5564 = vmatprep.subr.bf16.mxu1 %v6087_v30 }
 0x56d   :  { %5565 = vmatpush3.bf16.msra.mxu1 %v6088_v24 }
 0x56e   :  { %5566 = vmatprep.subr.bf16.mxu1 %v6089_v31 }
 0x571   :  { %5567 = vmatpush3.bf16.msra.mxu1 %v6090_v50 }
 0x572   :  { %5568 = vmatprep.subr.bf16.mxu1 %v6091_v32 }
 0x575   :  { %5569 = vmatpush3.bf16.msra.mxu1 %v6092_v33 }
 0x5d8   :  { %v4593_v34 = vpop.f32.mrf.mxu1 }
 0x5d9   :  { %v4634_v51 = vpop.f32.mrf.mxu0  ;;  %v4594_v43 = vadd.f32 %v4593_v34, %v3912_v41 }
 0x5da   :  { %v4595_v35 = vpop.f32.mrf.mxu1 }
 0x5db   :  { %v4636_v61 = vpop.f32.mrf.mxu0  ;;  %v4596_v44 = vadd.f32 %v4595_v35, %v3916_v42  ;;  %v4635_v45 = vadd.f32 %v4634_v51, %v4594_v43 }
 0x5dc   :  { %v4597_v36 = vpop.f32.mrf.mxu1 }
 0x5dd   :  { %v4638_v37 = vpop.f32.mrf.mxu0  ;;  %v4637_v48 = vadd.f32 %v4636_v61, %v4596_v44 }
 0x5de   :  { %v4598_v38 = vpop.f32.mrf.mxu1 }
 0x5df   :  { %v4639_v39 = vpop.f32.mrf.mxu0 }
 0x618   :  { %v4675_v46 = vpop.f32.mrf.mxu1 }
 0x619   :  { %v4676_v16 = vadd.f32 %v4675_v46, %v4635_v45  ;;  %v4716_v52 = vpop.f32.mrf.mxu0 }
 0x61a   :  { %v4677_v53 = vpop.f32.mrf.mxu1 }
 0x61b   :  { %v4717_v54 = vadd.f32 %v4716_v52, %v4676_v16  ;;  %v4678_v55 = vadd.f32 %v4677_v53, %v4637_v48  ;;  %v4718_v56 = vpop.f32.mrf.mxu0 }
 0x61c   :  { %v4679_v57 = vpop.f32.mrf.mxu1 }
 0x61d   :  { %vm4723_vm15 = vcmp.ge.f32.partialorder %v4717_v54, 0.0  ;;  %v4725_v58 = vmul.f32 0.2, %v4717_v54  ;;  %v4719_v40 = vadd.f32 %v4718_v56, %v4678_v55  ;;  %v4720_v59 = vpop.f32.mrf.mxu0 }
 0x61e   :  { %v4680_v26 = vpop.f32.mrf.mxu1 }
 0x61f   :  { %vm4724_vm0 = vcmp.ge.f32.partialorder %v4719_v40, 0.0  ;;  %v4726_v18 = vmul.f32 0.2, %v4719_v40  ;;  %v4721_v17 = vpop.f32.mrf.mxu0  ;;  %v4727_v60 = vsel %vm4723_vm15, %v4717_v54, %v4725_v58 }
 0x620   :  { %v4729_v3 = vpack.c.bf16 %v4727_v60, %v4727_v60 }
 0x621   :  { %v4728_v1 = vsel %vm4724_vm0, %v4719_v40, %v4726_v18 }
 0x622   :  { %v4730_v5 = vpack.c.bf16 %v4728_v1, %v4728_v1  ;;  %v4908_v2 = vcombine.low %v4727_v60, %v4728_v1 }
 0x624   :  { %4898 = vmatprep.mubr.bf16.mxu1 %v4730_v5  ;;  %5553 = vst.sshfl [vmem:[#allocation11] sm:$0x33 pattern:$0x76325410] %v4908_v2 }
 0x625   :  { %4899 = vmatmul.mubr.bf16.vlgmr.msra.gmra.mxu1 %v4729_v3 }
 0x626   :  { %6204 = shalt.err (!%p6201_p1)
}
 0x627   :  { %4928 = dma.vmem_to_hbm [thread:$0]  %s4926_s27, 64, %s6516_s14, [#allocation4]   ;;  %v5536_v62 = vld [vmem:[%s6515_s13] ss:$0 sm:$0xff] }
 0x628   :  { %s6258_s17 = smov [#allocation12]  }
 0x629   :  { %s4935_s8 = sshll.u32 %s6258_s17, 4  ;;  %s4936_s8 = int_to_ptr.vmem [resolvable:$true] %s4935_s8 }
 0x62a   :  { %s6213_s5 = scalar_lea.vmem %s4936_s8, 32  ;;  %p6218_p3 = scmp.lt.s32.totalorder %s4936_s8, %s4936_s8 }
 0x62b   :  { %p6214_p2 = scmp.ne.s32.totalorder %s4936_s8, %s6213_s5  ;;  %p6219_p4 = scmp.lt.s32.totalorder %s6213_s5, %s6213_s5 }
 0x62d   :  { %p6220_p5 = por %p6219_p4, %p6218_p3 }
 0x62f   :  { %p6221_p6 = pnand %p6220_p5, %p6214_p2 }
 0x6e5   :  { %v5570_v6 = vpop.f32.mrf.mxu1 }
 0x6e7   :  { %v5571_v8 = vpop.f32.mrf.mxu1 }
 0x6e8   :  { %v5572_v9 = vadd.f32 %v5571_v8, %v5570_v6 }
 0x6e9   :  { %v5573_v10 = vpop.f32.mrf.mxu1 }
 0x6ea   :  { %v4901_v63 = vadd.f32 %v5572_v9, %v5536_v62 }
 0x6eb   :  { %v5574_v11 = vpop.f32.mrf.mxu1 }
 0x6ec   :  { %4918 = vst [vmem:[#allocation12] sm:$0x3] %v4901_v63 }
 0x6ed   :  { %6224 = shalt.err (!%p6221_p6)
}
 0x6ee   :  { %4938 = dma.vmem_to_hbm [thread:$0]  %s4936_s8, 32, %s6517_s15, [#allocation13]  }
 0x6ef   :  { %6239 = dma.done.wait [#allocation4], 64  }
 0x6f0   :  { %6240 = vsyncadd [#allocation4], 4294967232 }
 0x6f1   :  { %6241 = dma.done.wait [#allocation13], 32  }
 0x6f2   :  { %6242 = vsyncadd [#allocation13], 4294967264 }
 0x6f3   :  { %4945 = vsyncpa [#allocation3], 1 }
 0x6f4   :  { %4946 = vsyncpa [#allocation6], 1 }
 0x6f5   :  { %4947 = vsyncpa [#allocation9], 1 }
 0x6f6   :  { %4948 = vsyncpa [#allocation4], 1 }
 0x6f7   :  { %4949 = vsyncpa [#allocation13], 1 }

</bundles_post_ra>
